<compile_context>
chip_gen: v7x
topology: tpu7x:2x2x1
jax: 0.10.0
libtpu: 0.0.40
codegen_flags: <defaults>
</compile_context>

<pallas_src>
import functools

import jax
import jax.numpy as jnp
from jax.experimental import pallas as pl
from jax.experimental.pallas import tpu as pltpu


def _round_up(x, m):
    return ((x + m - 1) // m) * m


# ----------------------------------------------------------------------------
# Fused kernel: conv stack over the packed prem+hyp slab + classifier head
# ----------------------------------------------------------------------------
def cnn_kernel(slab_ref, w1_ref, b1_ref, w2_ref, b2_ref,
               lw1_ref, lb1_ref, lw2_ref, lb2_ref, out_ref,
               *, B_tile, L_pad, Lp8, Sp, Sh, K, P):
    # slab_ref : (B_tile*L_pad, E) bf16, per-batch row layout:
    #            [P zeros | prem Sp | zeros -> Lp8 | P zeros | hyp Sh | zeros -> Lh8]
    # w1 : (K, E, H) bf16   b1 : (1, H) f32
    # w2 : (K, H, H) bf16   b2 : (1, H) f32
    # lw1: (2H, H)  bf16    lb1: (1, H) f32
    # lw2: (H, Cp)  bf16    lb2: (1, Cp) f32     (Cp = lane-padded num_classes)
    # out_ref: (B_tile, Cp) f32
    NT = B_tile * L_pad
    H = w1_ref.shape[2]

    # Per-row "real data" mask, built in-kernel (no extra input streams).
    pos = jax.lax.broadcasted_iota(jnp.int32, (B_tile, L_pad, 1), 1)
    real = (((pos >= P) & (pos < P + Sp)) |
            ((pos >= Lp8 + P) & (pos < Lp8 + P + Sh)))
    mask3 = real.astype(jnp.float32)                      # (B_tile, L_pad, 1)

    def conv_relu_mask(x2, w_ref, b_ref):
        # x2: (NT, Cin) bf16 -> masked relu('same' conv(x2) + b), (B_tile,L_pad,H) f32.
        # Each tap is an unshifted matmul; the shift is applied to the result
        # with pltpu.roll (wrapped rows only land on masked pad rows).
        acc = jnp.dot(x2, w_ref[P], preferred_element_type=jnp.float32) + b_ref[...]
        for k in range(K):
            if k == P:
                continue
            y = jnp.dot(x2, w_ref[k], preferred_element_type=jnp.float32)
            acc = acc + pltpu.roll(y, shift=(P - k) % NT, axis=0)
        h = jnp.maximum(acc, 0.0)                         # bias + relu in f32
        return h.reshape(B_tile, L_pad, H) * mask3        # zero the pad rows

    x = slab_ref[...]
    h1 = conv_relu_mask(x, w1_ref, b1_ref)                # conv1 -> relu (dropout = id)
    h2 = conv_relu_mask(h1.reshape(NT, H).astype(jnp.bfloat16), w2_ref, b2_ref)

    # Vectorized max-pool: pad rows are 0 and all real rows are >= 0 (relu),
    # so the max over the full (8-aligned) segment equals the max over real rows.
    prem_pool = jnp.max(h2[:, :Lp8, :], axis=1)           # (B_tile, H) f32
    hyp_pool = jnp.max(h2[:, Lp8:, :], axis=1)            # (B_tile, H) f32

    # Head: linear1(concat) -> relu -> linear2 (split the concat matmul).
    lw1 = lw1_ref[...]
    hdd = (jnp.dot(prem_pool.astype(jnp.bfloat16), lw1[:H, :],
                   preferred_element_type=jnp.float32)
           + jnp.dot(hyp_pool.astype(jnp.bfloat16), lw1[H:, :],
                     preferred_element_type=jnp.float32)
           + lb1_ref[...])
    hdd = jnp.maximum(hdd, 0.0)
    out_ref[...] = jnp.dot(hdd.astype(jnp.bfloat16), lw2_ref[...],
                           preferred_element_type=jnp.float32) + lb2_ref[...]


# ----------------------------------------------------------------------------
# Wrapper: embedding gather + slab packing + single pallas_call
# ----------------------------------------------------------------------------
def cnn_forward(params, prem_ids, prem_len, hyp_ids, hyp_len,
                *, kernel_size, b_tile=256):
    # prem_len / hyp_len are unused in the reference forward pass as well.
    del prem_len, hyp_len
    K = kernel_size
    assert K % 2 == 1, "kernel_size must be odd for 'same' padding semantics"
    P = (K - 1) // 2

    # bf16 storage / MXU feeds, f32 biases.
    emb = params["embedding"].astype(jnp.bfloat16)
    w1 = params["w1"].astype(jnp.bfloat16)
    w2 = params["w2"].astype(jnp.bfloat16)
    lw1 = params["lw1"].astype(jnp.bfloat16)
    b1 = params["b1"].astype(jnp.float32)
    b2 = params["b2"].astype(jnp.float32)
    lb1 = params["lb1"].astype(jnp.float32)

    B, Sp = prem_ids.shape
    _, Sh = hyp_ids.shape
    E = emb.shape[1]
    H = w1.shape[2]
    C = params["lw2"].shape[1]

    Lp8 = _round_up(Sp + 2 * P, 8)        # 8-aligned premise segment
    Lh8 = _round_up(Sh + 2 * P, 8)        # 8-aligned hypothesis segment
    L_pad = Lp8 + Lh8                     # rows per batch element (multiple of 8)
    C_pad = _round_up(max(C, 128), 128)   # lane-dense output width

    # Batch tiling: big tiles amortize per-step overhead; >=2 tiles keeps both
    # v7x TensorCores busy when the batch is large enough; tiny batches run as
    # one tile (fewest grid steps on single-TC v5e/v6e).
    B_pad8 = _round_up(B, 8)
    if B_pad8 >= 2 * b_tile:
        B_tile = b_tile
    elif B_pad8 >= 256:
        B_tile = _round_up(pl.cdiv(B_pad8, 2), 8)
    else:
        B_tile = B_pad8
    B_pad = pl.cdiv(B_pad8, B_tile) * B_tile
    n_tiles = B_pad // B_tile

    # Embedding lookup stays in XLA glue (gather).
    prem_emb = jnp.take(emb, prem_ids, axis=0)            # (B, Sp, E) bf16
    hyp_emb = jnp.take(emb, hyp_ids, axis=0)              # (B, Sh, E) bf16

    # Pack both sequences into one slab per batch row; zero rows isolate
    # sequences so 'same' conv taps never mix neighbours.
    prem_seg = jnp.pad(prem_emb, ((0, B_pad - B), (P, Lp8 - P - Sp), (0, 0)))
    hyp_seg = jnp.pad(hyp_emb, ((0, B_pad - B), (P, Lh8 - P - Sh), (0, 0)))
    slab = jnp.concatenate([prem_seg, hyp_seg], axis=1).reshape(B_pad * L_pad, E)

    # Lane-pad the final linear so the kernel writes a dense (B_tile, 128) block.
    lw2_pad = jnp.zeros((H, C_pad), jnp.bfloat16).at[:, :C].set(
        params["lw2"].astype(jnp.bfloat16))
    lb2_pad = jnp.zeros((1, C_pad), jnp.float32).at[:, :C].set(
        params["lb2"].astype(jnp.float32))

    kernel = functools.partial(cnn_kernel, B_tile=B_tile, L_pad=L_pad,
                               Lp8=Lp8, Sp=Sp, Sh=Sh, K=K, P=P)

    logits = pl.pallas_call(
        kernel,
        out_shape=jax.ShapeDtypeStruct((B_pad, C_pad), jnp.float32),
        grid=(n_tiles,),
        in_specs=[
            pl.BlockSpec((B_tile * L_pad, E), lambda i: (i, 0)),   # packed slab
            pl.BlockSpec((K, E, H), lambda i: (0, 0, 0)),          # w1
            pl.BlockSpec((1, H), lambda i: (0, 0)),                # b1
            pl.BlockSpec((K, H, H), lambda i: (0, 0, 0)),          # w2
            pl.BlockSpec((1, H), lambda i: (0, 0)),                # b2
            pl.BlockSpec((2 * H, H), lambda i: (0, 0)),            # lw1
            pl.BlockSpec((1, H), lambda i: (0, 0)),                # lb1
            pl.BlockSpec((H, C_pad), lambda i: (0, 0)),            # lw2 (lane-padded)
            pl.BlockSpec((1, C_pad), lambda i: (0, 0)),            # lb2 (lane-padded)
        ],
        out_specs=pl.BlockSpec((B_tile, C_pad), lambda i: (i, 0)),
        compiler_params=pltpu.CompilerParams(
            dimension_semantics=("parallel",),
            vmem_limit_bytes=32 * 1024 * 1024),
    )(slab, w1, b1, w2, b2, lw1, lb1, lw2_pad, lb2_pad)

    return logits[:B, :C]


# ----------------------------------------------------------------------------
# Pure-JAX float32 reference (mirrors the PyTorch forward pass)
# ----------------------------------------------------------------------------
def _conv1d_same_ref(x, w, b, pad):
    # x: (B, S, Cin), w: (K, Cin, Cout), b: (1, Cout)
    K = w.shape[0]
    S = x.shape[1]
    xp = jnp.pad(x, ((0, 0), (pad, pad), (0, 0)))
    out = b[None, :, :]
    for k in range(K):
        out = out + jnp.einsum("bsc,cd->bsd", xp[:, k:k + S, :], w[k])
    return out


def cnn_forward_ref(params, prem_ids, hyp_ids, *, kernel_size):
    pad = (kernel_size - 1) // 2
    emb = params["embedding"]

    def enc(ids):
        x = jnp.take(emb, ids, axis=0)
        h = jax.nn.relu(_conv1d_same_ref(x, params["w1"], params["b1"], pad))
        h = jax.nn.relu(_conv1d_same_ref(h, params["w2"], params["b2"], pad))
        return jnp.max(h, axis=1)

    feat = jnp.concatenate([enc(prem_ids), enc(hyp_ids)], axis=1)
    h = jax.nn.relu(feat @ params["lw1"] + params["lb1"])
    return h @ params["lw2"] + params["lb2"]


if __name__ == "__main__":
    # Small deterministic configuration
    VOCAB = 50
    EMB = 32          # embedding size (from pre_trained_emb)
    HID = 32          # hidden_size
    KSIZE = 3         # kernel_size (odd -> 'same' padding)
    NCLASS = 3        # num_classes
    B = 16            # batch
    S_PREM = 8
    S_HYP = 12

    key = jax.random.PRNGKey(0)
    ks = jax.random.split(key, 12)

    params = {
        "embedding": jax.random.normal(ks[0], (VOCAB, EMB), jnp.float32) * 0.1,
        "w1": jax.random.normal(ks[1], (KSIZE, EMB, HID), jnp.float32) * 0.1,
        "b1": jax.random.normal(ks[2], (1, HID), jnp.float32) * 0.1,
        "w2": jax.random.normal(ks[3], (KSIZE, HID, HID), jnp.float32) * 0.1,
        "b2": jax.random.normal(ks[4], (1, HID), jnp.float32) * 0.1,
        "lw1": jax.random.normal(ks[5], (2 * HID, HID), jnp.float32) * 0.1,
        "lb1": jax.random.normal(ks[6], (1, HID), jnp.float32) * 0.1,
        "lw2": jax.random.normal(ks[7], (HID, NCLASS), jnp.float32) * 0.1,
        "lb2": jax.random.normal(ks[8], (1, NCLASS), jnp.float32) * 0.1,
    }

    prem = jax.random.randint(ks[9], (B, S_PREM), 0, VOCAB, dtype=jnp.int32)
    hyp = jax.random.randint(ks[10], (B, S_HYP), 0, VOCAB, dtype=jnp.int32)
    prem_len = jnp.full((B,), S_PREM, jnp.int32)   # unused by forward (as in torch)
    hyp_len = jnp.full((B,), S_HYP, jnp.int32)     # unused by forward (as in torch)

    # TODO(synk): dropout is a no-op here (eval-mode semantics); training-mode
    # stochastic dropout would use pltpu.prng_* inside the kernel.

    fwd = jax.jit(functools.partial(cnn_forward, kernel_size=KSIZE))
    logits = fwd(params, prem, prem_len, hyp, hyp_len)
    logits = jax.block_until_ready(logits)

    ref = cnn_forward_ref(params, prem, hyp, kernel_size=KSIZE)
    assert logits.shape == (B, NCLASS), logits.shape
    # bf16 storage / f32 accumulation vs. full-f32 reference -> loose tolerance
    assert jnp.allclose(logits, ref, atol=3e-2, rtol=3e-2), (
        float(jnp.max(jnp.abs(logits - ref))), logits, ref)

    print("KERNEL_OK")
</pallas_src>

<mosaic_0001>
module attributes {stable_mosaic.version = 11 : i64} {
  func.func @cnn_kernel(%arg0: i32, %arg1: memref<512x32xbf16, #tpu.memory_space<vmem>>, %arg2: memref<3x32x32xbf16, #tpu.memory_space<vmem>>, %arg3: memref<1x32xf32, #tpu.memory_space<vmem>>, %arg4: memref<3x32x32xbf16, #tpu.memory_space<vmem>>, %arg5: memref<1x32xf32, #tpu.memory_space<vmem>>, %arg6: memref<64x32xbf16, #tpu.memory_space<vmem>>, %arg7: memref<1x32xf32, #tpu.memory_space<vmem>>, %arg8: memref<32x128xbf16, #tpu.memory_space<vmem>>, %arg9: memref<1x128xf32, #tpu.memory_space<vmem>>, %arg10: memref<16x128xf32, #tpu.memory_space<vmem>>) attributes {dimension_semantics = [#tpu.dimension_semantics<parallel>], iteration_bounds = array<i64: 1>, scalar_prefetch = 0 : i64, scratch_operands = 0 : i64, tpu.core_type = #tpu.core_type<tc>, window_params = [{transform_indices = @transform_0, window_bounds = array<i64: 512, 32>}, {pipeline_mode = #tpu.pipeline_mode<synchronous>, transform_indices = @transform_1, window_bounds = array<i64: 3, 32, 32>}, {pipeline_mode = #tpu.pipeline_mode<synchronous>, transform_indices = @transform_2, window_bounds = array<i64: 1, 32>}, {pipeline_mode = #tpu.pipeline_mode<synchronous>, transform_indices = @transform_3, window_bounds = array<i64: 3, 32, 32>}, {pipeline_mode = #tpu.pipeline_mode<synchronous>, transform_indices = @transform_4, window_bounds = array<i64: 1, 32>}, {pipeline_mode = #tpu.pipeline_mode<synchronous>, transform_indices = @transform_5, window_bounds = array<i64: 64, 32>}, {pipeline_mode = #tpu.pipeline_mode<synchronous>, transform_indices = @transform_6, window_bounds = array<i64: 1, 32>}, {pipeline_mode = #tpu.pipeline_mode<synchronous>, transform_indices = @transform_7, window_bounds = array<i64: 32, 128>}, {pipeline_mode = #tpu.pipeline_mode<synchronous>, transform_indices = @transform_8, window_bounds = array<i64: 1, 128>}, {transform_indices = @transform_9, window_bounds = array<i64: 16, 128>}]} {
    %0 = tpu.iota {dimensions = array<i32: 1>} : vector<16x32x1xi32>
    %c1_i32 = arith.constant 1 : i32
    %1 = vector.broadcast %c1_i32 : i32 to vector<16x32x1xi32>
    %2 = arith.cmpi sge, %0, %1 : vector<16x32x1xi32>
    %c9_i32 = arith.constant 9 : i32
    %3 = vector.broadcast %c9_i32 : i32 to vector<16x32x1xi32>
    %4 = arith.cmpi slt, %0, %3 : vector<16x32x1xi32>
    %5 = arith.andi %2, %4 : vector<16x32x1xi1>
    %c17_i32 = arith.constant 17 : i32
    %6 = vector.broadcast %c17_i32 : i32 to vector<16x32x1xi32>
    %7 = arith.cmpi sge, %0, %6 : vector<16x32x1xi32>
    %c29_i32 = arith.constant 29 : i32
    %8 = vector.broadcast %c29_i32 : i32 to vector<16x32x1xi32>
    %9 = arith.cmpi slt, %0, %8 : vector<16x32x1xi32>
    %10 = arith.andi %7, %9 : vector<16x32x1xi1>
    %11 = arith.ori %5, %10 : vector<16x32x1xi1>
    %12 = arith.extui %11 : vector<16x32x1xi1> to vector<16x32x1xi32>
    %13 = arith.sitofp %12 : vector<16x32x1xi32> to vector<16x32x1xf32>
    %c0 = arith.constant 0 : index
    %c0_0 = arith.constant 0 : index
    %14 = vector.load %arg1[%c0, %c0_0] : memref<512x32xbf16, #tpu.memory_space<vmem>>, vector<512x32xbf16>
    %c1 = arith.constant 1 : index
    %c0_1 = arith.constant 0 : index
    %c0_2 = arith.constant 0 : index
    %15 = vector.load %arg2[%c1, %c0_1, %c0_2] : memref<3x32x32xbf16, #tpu.memory_space<vmem>>, vector<1x32x32xbf16>
    %16 = vector.shape_cast %15 : vector<1x32x32xbf16> to vector<32x32xbf16>
    %cst = arith.constant dense<0.000000e+00> : vector<512x32xf32>
    %17 = tpu.matmul %14, %16, %cst {dimension_numbers = #tpu.dot_dimension_numbers<[1], [0], [0], [1], [0, 0, 1, 1], [], []>} : vector<512x32xbf16>, vector<32x32xbf16>, vector<512x32xf32> -> vector<512x32xf32>
    %c0_3 = arith.constant 0 : index
    %c0_4 = arith.constant 0 : index
    %18 = vector.load %arg3[%c0_3, %c0_4] : memref<1x32xf32, #tpu.memory_space<vmem>>, vector<1x32xf32>
    %19 = vector.broadcast %18 : vector<1x32xf32> to vector<512x32xf32>
    %20 = arith.addf %17, %19 : vector<512x32xf32>
    %c0_5 = arith.constant 0 : index
    %c0_6 = arith.constant 0 : index
    %c0_7 = arith.constant 0 : index
    %21 = vector.load %arg2[%c0_5, %c0_6, %c0_7] : memref<3x32x32xbf16, #tpu.memory_space<vmem>>, vector<1x32x32xbf16>
    %22 = vector.shape_cast %21 : vector<1x32x32xbf16> to vector<32x32xbf16>
    %cst_8 = arith.constant dense<0.000000e+00> : vector<512x32xf32>
    %23 = tpu.matmul %14, %22, %cst_8 {dimension_numbers = #tpu.dot_dimension_numbers<[1], [0], [0], [1], [0, 0, 1, 1], [], []>} : vector<512x32xbf16>, vector<32x32xbf16>, vector<512x32xf32> -> vector<512x32xf32>
    %c1_i32_9 = arith.constant 1 : i32
    %24 = tpu.dynamic_rotate %23 by %c1_i32_9 dim 0 : vector<512x32xf32>, i32 -> vector<512x32xf32>
    %25 = arith.addf %20, %24 : vector<512x32xf32>
    %c2 = arith.constant 2 : index
    %c0_10 = arith.constant 0 : index
    %c0_11 = arith.constant 0 : index
    %26 = vector.load %arg2[%c2, %c0_10, %c0_11] : memref<3x32x32xbf16, #tpu.memory_space<vmem>>, vector<1x32x32xbf16>
    %27 = vector.shape_cast %26 : vector<1x32x32xbf16> to vector<32x32xbf16>
    %cst_12 = arith.constant dense<0.000000e+00> : vector<512x32xf32>
    %28 = tpu.matmul %14, %27, %cst_12 {dimension_numbers = #tpu.dot_dimension_numbers<[1], [0], [0], [1], [0, 0, 1, 1], [], []>} : vector<512x32xbf16>, vector<32x32xbf16>, vector<512x32xf32> -> vector<512x32xf32>
    %c511_i32 = arith.constant 511 : i32
    %29 = tpu.dynamic_rotate %28 by %c511_i32 dim 0 : vector<512x32xf32>, i32 -> vector<512x32xf32>
    %30 = arith.addf %25, %29 : vector<512x32xf32>
    %cst_13 = arith.constant 0.000000e+00 : f32
    %31 = vector.broadcast %cst_13 : f32 to vector<512x32xf32>
    %32 = arith.maximumf %30, %31 : vector<512x32xf32>
    %33 = vector.shape_cast %32 : vector<512x32xf32> to vector<16x32x32xf32>
    %34 = vector.broadcast %13 : vector<16x32x1xf32> to vector<16x32x32xf32>
    %35 = arith.mulf %33, %34 : vector<16x32x32xf32>
    %36 = vector.shape_cast %35 : vector<16x32x32xf32> to vector<512x32xf32>
    %37 = arith.truncf %36 : vector<512x32xf32> to vector<512x32xbf16>
    %c1_14 = arith.constant 1 : index
    %c0_15 = arith.constant 0 : index
    %c0_16 = arith.constant 0 : index
    %38 = vector.load %arg4[%c1_14, %c0_15, %c0_16] : memref<3x32x32xbf16, #tpu.memory_space<vmem>>, vector<1x32x32xbf16>
    %39 = vector.shape_cast %38 : vector<1x32x32xbf16> to vector<32x32xbf16>
    %cst_17 = arith.constant dense<0.000000e+00> : vector<512x32xf32>
    %40 = tpu.matmul %37, %39, %cst_17 {dimension_numbers = #tpu.dot_dimension_numbers<[1], [0], [0], [1], [0, 0, 1, 1], [], []>} : vector<512x32xbf16>, vector<32x32xbf16>, vector<512x32xf32> -> vector<512x32xf32>
    %c0_18 = arith.constant 0 : index
    %c0_19 = arith.constant 0 : index
    %41 = vector.load %arg5[%c0_18, %c0_19] : memref<1x32xf32, #tpu.memory_space<vmem>>, vector<1x32xf32>
    %42 = vector.broadcast %41 : vector<1x32xf32> to vector<512x32xf32>
    %43 = arith.addf %40, %42 : vector<512x32xf32>
    %c0_20 = arith.constant 0 : index
    %c0_21 = arith.constant 0 : index
    %c0_22 = arith.constant 0 : index
    %44 = vector.load %arg4[%c0_20, %c0_21, %c0_22] : memref<3x32x32xbf16, #tpu.memory_space<vmem>>, vector<1x32x32xbf16>
    %45 = vector.shape_cast %44 : vector<1x32x32xbf16> to vector<32x32xbf16>
    %cst_23 = arith.constant dense<0.000000e+00> : vector<512x32xf32>
    %46 = tpu.matmul %37, %45, %cst_23 {dimension_numbers = #tpu.dot_dimension_numbers<[1], [0], [0], [1], [0, 0, 1, 1], [], []>} : vector<512x32xbf16>, vector<32x32xbf16>, vector<512x32xf32> -> vector<512x32xf32>
    %c1_i32_24 = arith.constant 1 : i32
    %47 = tpu.dynamic_rotate %46 by %c1_i32_24 dim 0 : vector<512x32xf32>, i32 -> vector<512x32xf32>
    %48 = arith.addf %43, %47 : vector<512x32xf32>
    %c2_25 = arith.constant 2 : index
    %c0_26 = arith.constant 0 : index
    %c0_27 = arith.constant 0 : index
    %49 = vector.load %arg4[%c2_25, %c0_26, %c0_27] : memref<3x32x32xbf16, #tpu.memory_space<vmem>>, vector<1x32x32xbf16>
    %50 = vector.shape_cast %49 : vector<1x32x32xbf16> to vector<32x32xbf16>
    %cst_28 = arith.constant dense<0.000000e+00> : vector<512x32xf32>
    %51 = tpu.matmul %37, %50, %cst_28 {dimension_numbers = #tpu.dot_dimension_numbers<[1], [0], [0], [1], [0, 0, 1, 1], [], []>} : vector<512x32xbf16>, vector<32x32xbf16>, vector<512x32xf32> -> vector<512x32xf32>
    %c511_i32_29 = arith.constant 511 : i32
    %52 = tpu.dynamic_rotate %51 by %c511_i32_29 dim 0 : vector<512x32xf32>, i32 -> vector<512x32xf32>
    %53 = arith.addf %48, %52 : vector<512x32xf32>
    %cst_30 = arith.constant 0.000000e+00 : f32
    %54 = vector.broadcast %cst_30 : f32 to vector<512x32xf32>
    %55 = arith.maximumf %53, %54 : vector<512x32xf32>
    %56 = vector.shape_cast %55 : vector<512x32xf32> to vector<16x32x32xf32>
    %57 = vector.broadcast %13 : vector<16x32x1xf32> to vector<16x32x32xf32>
    %58 = arith.mulf %56, %57 : vector<16x32x32xf32>
    %59 = vector.extract_strided_slice %58 {offsets = [0, 0, 0], sizes = [16, 16, 32], strides = [1, 1, 1]} : vector<16x32x32xf32> to vector<16x16x32xf32>
    %cst_31 = arith.constant dense<0xFF800000> : vector<16x32xf32>
    %60 = vector.multi_reduction <maximumf>, %59, %cst_31 [1] : vector<16x16x32xf32> to vector<16x32xf32>
    %61 = vector.extract_strided_slice %58 {offsets = [0, 16, 0], sizes = [16, 16, 32], strides = [1, 1, 1]} : vector<16x32x32xf32> to vector<16x16x32xf32>
    %cst_32 = arith.constant dense<0xFF800000> : vector<16x32xf32>
    %62 = vector.multi_reduction <maximumf>, %61, %cst_32 [1] : vector<16x16x32xf32> to vector<16x32xf32>
    %c0_33 = arith.constant 0 : index
    %c0_34 = arith.constant 0 : index
    %63 = vector.load %arg6[%c0_33, %c0_34] : memref<64x32xbf16, #tpu.memory_space<vmem>>, vector<64x32xbf16>
    %64 = arith.truncf %60 : vector<16x32xf32> to vector<16x32xbf16>
    %65 = vector.extract_strided_slice %63 {offsets = [0, 0], sizes = [32, 32], strides = [1, 1]} : vector<64x32xbf16> to vector<32x32xbf16>
    %cst_35 = arith.constant dense<0.000000e+00> : vector<16x32xf32>
    %66 = tpu.matmul %64, %65, %cst_35 {dimension_numbers = #tpu.dot_dimension_numbers<[1], [0], [0], [1], [0, 0, 1, 1], [], []>} : vector<16x32xbf16>, vector<32x32xbf16>, vector<16x32xf32> -> vector<16x32xf32>
    %67 = arith.truncf %62 : vector<16x32xf32> to vector<16x32xbf16>
    %68 = vector.extract_strided_slice %63 {offsets = [32, 0], sizes = [32, 32], strides = [1, 1]} : vector<64x32xbf16> to vector<32x32xbf16>
    %cst_36 = arith.constant dense<0.000000e+00> : vector<16x32xf32>
    %69 = tpu.matmul %67, %68, %cst_36 {dimension_numbers = #tpu.dot_dimension_numbers<[1], [0], [0], [1], [0, 0, 1, 1], [], []>} : vector<16x32xbf16>, vector<32x32xbf16>, vector<16x32xf32> -> vector<16x32xf32>
    %70 = arith.addf %66, %69 : vector<16x32xf32>
    %c0_37 = arith.constant 0 : index
    %c0_38 = arith.constant 0 : index
    %71 = vector.load %arg7[%c0_37, %c0_38] : memref<1x32xf32, #tpu.memory_space<vmem>>, vector<1x32xf32>
    %72 = vector.broadcast %71 : vector<1x32xf32> to vector<16x32xf32>
    %73 = arith.addf %70, %72 : vector<16x32xf32>
    %cst_39 = arith.constant 0.000000e+00 : f32
    %74 = vector.broadcast %cst_39 : f32 to vector<16x32xf32>
    %75 = arith.maximumf %73, %74 : vector<16x32xf32>
    %76 = arith.truncf %75 : vector<16x32xf32> to vector<16x32xbf16>
    %c0_40 = arith.constant 0 : index
    %c0_41 = arith.constant 0 : index
    %77 = vector.load %arg8[%c0_40, %c0_41] : memref<32x128xbf16, #tpu.memory_space<vmem>>, vector<32x128xbf16>
    %cst_42 = arith.constant dense<0.000000e+00> : vector<16x128xf32>
    %78 = tpu.matmul %76, %77, %cst_42 {dimension_numbers = #tpu.dot_dimension_numbers<[1], [0], [0], [1], [0, 0, 1, 1], [], []>} : vector<16x32xbf16>, vector<32x128xbf16>, vector<16x128xf32> -> vector<16x128xf32>
    %c0_43 = arith.constant 0 : index
    %c0_44 = arith.constant 0 : index
    %79 = vector.load %arg9[%c0_43, %c0_44] : memref<1x128xf32, #tpu.memory_space<vmem>>, vector<1x128xf32>
    %80 = vector.broadcast %79 : vector<1x128xf32> to vector<16x128xf32>
    %81 = arith.addf %78, %80 : vector<16x128xf32>
    %c0_45 = arith.constant 0 : index
    %c0_46 = arith.constant 0 : index
    %82 = vector.load %arg10[%c0_45, %c0_46] : memref<16x128xf32, #tpu.memory_space<vmem>>, vector<16x128xf32>
    tpu.vector_store %arg10[%c0_45, %c0_46], %81 {strides = array<i32>} : memref<16x128xf32, #tpu.memory_space<vmem>>, vector<16x128xf32>,
    return
  }
  func.func @transform_0(%arg0: i32) -> (i32, i32) {
    %c0_i32 = arith.constant 0 : i32
    %c0_i32_0 = arith.constant 0 : i32
    return %arg0, %c0_i32 : i32, i32
  }
  func.func @transform_1(%arg0: i32) -> (i32, i32, i32) {
    %c0_i32 = arith.constant 0 : i32
    %c0_i32_0 = arith.constant 0 : i32
    %c0_i32_1 = arith.constant 0 : i32
    %c0_i32_2 = arith.constant 0 : i32
    return %c0_i32, %c0_i32_0, %c0_i32_1 : i32, i32, i32
  }
  func.func @transform_2(%arg0: i32) -> (i32, i32) {
    %c0_i32 = arith.constant 0 : i32
    %c0_i32_0 = arith.constant 0 : i32
    %c0_i32_1 = arith.constant 0 : i32
    return %c0_i32, %c0_i32_0 : i32, i32
  }
  func.func @transform_3(%arg0: i32) -> (i32, i32, i32) {
    %c0_i32 = arith.constant 0 : i32
    %c0_i32_0 = arith.constant 0 : i32
    %c0_i32_1 = arith.constant 0 : i32
    %c0_i32_2 = arith.constant 0 : i32
    return %c0_i32, %c0_i32_0, %c0_i32_1 : i32, i32, i32
  }
  func.func @transform_4(%arg0: i32) -> (i32, i32) {
    %c0_i32 = arith.constant 0 : i32
    %c0_i32_0 = arith.constant 0 : i32
    %c0_i32_1 = arith.constant 0 : i32
    return %c0_i32, %c0_i32_0 : i32, i32
  }
  func.func @transform_5(%arg0: i32) -> (i32, i32) {
    %c0_i32 = arith.constant 0 : i32
    %c0_i32_0 = arith.constant 0 : i32
    %c0_i32_1 = arith.constant 0 : i32
    return %c0_i32, %c0_i32_0 : i32, i32
  }
  func.func @transform_6(%arg0: i32) -> (i32, i32) {
    %c0_i32 = arith.constant 0 : i32
    %c0_i32_0 = arith.constant 0 : i32
    %c0_i32_1 = arith.constant 0 : i32
    return %c0_i32, %c0_i32_0 : i32, i32
  }
  func.func @transform_7(%arg0: i32) -> (i32, i32) {
    %c0_i32 = arith.constant 0 : i32
    %c0_i32_0 = arith.constant 0 : i32
    %c0_i32_1 = arith.constant 0 : i32
    return %c0_i32, %c0_i32_0 : i32, i32
  }
  func.func @transform_8(%arg0: i32) -> (i32, i32) {
    %c0_i32 = arith.constant 0 : i32
    %c0_i32_0 = arith.constant 0 : i32
    %c0_i32_1 = arith.constant 0 : i32
    return %c0_i32, %c0_i32_0 : i32, i32
  }
  func.func @transform_9(%arg0: i32) -> (i32, i32) {
    %c0_i32 = arith.constant 0 : i32
    %c0_i32_0 = arith.constant 0 : i32
    return %arg0, %c0_i32 : i32, i32
  }
}

</mosaic_0001>

<bundles_post_ra>
// kernel: cnn_forward.1
= control target key start
LH: loop header
LB: loop body
LE: loop exit
PB: predicated region body
PF: predicated region fallthrough
CT: control target
= control target key end

     0   :  { %vm322_vm0 = vcmask 261120   ;;  %v33_v40 = vlaneseq  ;;  %vm3757_vm7 = vcmask 1041409   ;;  %vm3759_vm8 = vcmask 1042434   ;;  %s7198_s1 = inlined_call_operand.vmem [shape: bf16[3,32,32], index: 1, kind: input, shape index: {}]   ;;  %s7199_s0 = inlined_call_operand.vmem [shape: bf16[512,32], index: 0, kind: input, shape index: {}]   ;;  %s7200_s3 = inlined_call_operand.vmem [shape: bf16[3,32,32], index: 3, kind: input, shape index: {}]   ;;  %s7201_s2 = inlined_call_operand.vmem [shape: f32[1,32], index: 2, kind: input, shape index: {}]   ;;  %s7202_s4 = inlined_call_operand.vmem [shape: f32[1,32], index: 4, kind: input, shape index: {}]   ;;  %s7203_s5 = inlined_call_operand.vmem [shape: bf16[64,32], index: 5, kind: input, shape index: {}]   ;;  %s7204_s7 = inlined_call_operand.vmem [shape: bf16[32,128], index: 7, kind: input, shape index: {}]   ;;  %s7205_s6 = inlined_call_operand.vmem [shape: f32[1,32], index: 6, kind: input, shape index: {}]   ;;  %s7206_s8 = inlined_call_operand.vmem [shape: f32[1,128], index: 8, kind: input, shape index: {}]   ;;  %s7207_s9 = inlined_call_operand.vmem [shape: f32[16,128], index: 9, kind: output, shape index: {}]  }
   0x1   :  { %v4939_v0 = vld [vmem:[%s7198_s1 + $0x10] sm:$0xff]   ;;  %v4940_v1 = vld [vmem:[%s7198_s1] sm:$0xff]   ;;  %v4941_v2 = vld [vmem:[%s7198_s1 + $0x18] sm:$0xff]   ;;  %vm3761_vm9 = vcmask 1043459   ;;  %vm3763_vm10 = vcmask 1044484   ;;  %vm3765_vm11 = vcmask 1045509  }
   0x2   :  { %4505 = vmatprep.subr.bf16.mxu0 %v4939_v0  ;;  %4573 = vmatprep.subr.bf16.mxu1 %v4940_v1  ;;  %v4942_v3 = vld [vmem:[%s7198_s1 + $0x8] sm:$0xff]   ;;  %v5056_v4 = vld [vmem:[%s7199_s0] sm:$0xff]   ;;  %v5073_v7 = vld [vmem:[%s7199_s0 + $0x10] sm:$0xff]   ;;  %v5389_v41 = vshrl.u32 %v33_v40, 7  ;;  %vm4990_vm12 = vmmov 0   ;;  %vm3767_vm13 = vcmask 1046534  }
   0x3   :  { %4506 = vmatpush3.bf16.msra.mxu0 %v4939_v0  ;;  %4574 = vmatpush3.bf16.msra.mxu1 %v4940_v1  ;;  %v5061_v5 = vld [vmem:[%s7199_s0 + $0x8] sm:$0xff]   ;;  %v4945_v6 = vld [vmem:[%s7198_s1 + $0x20] sm:$0xff]   ;;  %v5086_v8 = vld [vmem:[%s7199_s0 + $0x18] sm:$0xff]   ;;  %vm3769_vm14 = vcmask 1047559  }
   0x4   :  { %4507 = vmatprep.subr.bf16.mxu0 %v4941_v2  ;;  %4575 = vmatprep.subr.bf16.mxu1 %v4942_v3  ;;  %v5091_v9 = vld [vmem:[%s7199_s0 + $0x20] sm:$0xff]   ;;  %v5104_v10 = vld [vmem:[%s7199_s0 + $0x28] sm:$0xff]   ;;  %v5109_v11 = vld [vmem:[%s7199_s0 + $0x30] sm:$0xff]   ;;  %vm1077_vm1 = vcmp.lt.s32.totalorder %v5389_v41, 1  ;;  %vm1576_vm2 = vcmp.lt.s32.totalorder %v5389_v41, 7  ;;  %vm38_vm3 = vcmp.ge.s32.totalorder %v5389_v41, 1 }
   0x5   :  { %4509 = vmatprep.mubr.msk.bf16.mxu0 %vm322_vm0, %v5056_v4  ;;  %4577 = vmatprep.mubr.msk.bf16.mxu1 %vm322_vm0, %v5056_v4  ;;  %v4962_v12 = vld [vmem:[%s7198_s1 + $0x28] sm:$0xff]   ;;  %v5125_v13 = vld [vmem:[%s7199_s0 + $0x38] sm:$0xff]   ;;  %v5130_v14 = vld [vmem:[%s7199_s0 + $0x40] sm:$0xff]  }
   0x6   :  { %v5143_v15 = vld [vmem:[%s7199_s0 + $0x48] sm:$0xff]   ;;  %v5148_v16 = vld [vmem:[%s7199_s0 + $0x50] sm:$0xff]   ;;  %v5161_v17 = vld [vmem:[%s7199_s0 + $0x58] sm:$0xff]  }
   0x7   :  { %4508 = vmatpush3.bf16.msra.mxu0 %v4941_v2  ;;  %4576 = vmatpush3.bf16.msra.mxu1 %v4942_v3  ;;  %v5166_v18 = vld [vmem:[%s7199_s0 + $0x60] sm:$0xff]   ;;  %v5179_v19 = vld [vmem:[%s7199_s0 + $0x68] sm:$0xff]   ;;  %v5184_v20 = vld [vmem:[%s7199_s0 + $0x70] sm:$0xff]  }
   0x8   :  { %4641 = vmatprep.subr.bf16.mxu0 %v4945_v6  ;;  %v5197_v21 = vld [vmem:[%s7199_s0 + $0x78] sm:$0xff]   ;;  %v5202_v22 = vld [vmem:[%s7199_s0 + $0x80] sm:$0xff]   ;;  %v5215_v23 = vld [vmem:[%s7199_s0 + $0x88] sm:$0xff]  }
   0x9   :  { %v5220_v24 = vld [vmem:[%s7199_s0 + $0x90] sm:$0xff]   ;;  %v5233_v25 = vld [vmem:[%s7199_s0 + $0x98] sm:$0xff]   ;;  %v5238_v26 = vld [vmem:[%s7199_s0 + $0xa0] sm:$0xff]  }
   0xa   :  { %4510 = vmatmul.mubr.msk.bf16.vlgmr.msra.gmra.mrb[0].mxu0 %vm322_vm0, %v5061_v5  ;;  %4578 = vmatmul.mubr.msk.bf16.vlgmr.msra.gmra.mrb[0].mxu1 %vm322_vm0, %v5061_v5  ;;  %v4966_v27 = vld [vmem:[%s7199_s0 + $0xa8] sm:$0xff]   ;;  %v4967_v28 = vld [vmem:[%s7199_s0 + $0xb0] sm:$0xff]   ;;  %v5261_v29 = vld [vmem:[%s7199_s0 + $0xb8] sm:$0xff]  }
   0xb   :  { %4642 = vmatpush3.bf16.msra.mxu0 %v4945_v6  ;;  %4513 = vmatprep.mubr.msk.bf16.mxu0 %vm322_vm0, %v5073_v7  ;;  %v5266_v30 = vld [vmem:[%s7199_s0 + $0xc0] sm:$0xff]   ;;  %v5279_v31 = vld [vmem:[%s7199_s0 + $0xc8] sm:$0xff]   ;;  %v5284_v32 = vld [vmem:[%s7199_s0 + $0xd0] sm:$0xff]  }
   0xc   :  { %4581 = vmatprep.mubr.msk.bf16.mxu1 %vm322_vm0, %v5073_v7  ;;  %4643 = vmatprep.subr.bf16.mxu0 %v4962_v12  ;;  %v5297_v33 = vld [vmem:[%s7199_s0 + $0xd8] sm:$0xff]   ;;  %v5302_v34 = vld [vmem:[%s7199_s0 + $0xe0] sm:$0xff]   ;;  %v5315_v35 = vld [vmem:[%s7199_s0 + $0xe8] sm:$0xff]  }
   0xd   :  { %v5320_v36 = vld [vmem:[%s7199_s0 + $0xf0] sm:$0xff]   ;;  %v5336_v38 = vld [vmem:[%s7199_s0 + $0xf8] sm:$0xff]   ;;  %v5396_v45 = vld [vmem:[%s7201_s2] ss:$0 sm:$0xff] }
   0xe   :  { %v4977_v37 = vld [vmem:[%s7200_s3 + $0x10] sm:$0xff]   ;;  %v4978_v39 = vld [vmem:[%s7200_s3 + $0x18] sm:$0xff]  }
   0xf   :  { %4644 = vmatpush3.bf16.msra.mxu0 %v4962_v12  ;;  %4709 = vmatprep.subr.bf16.mxu1 %v4977_v37 }
  0x10   :  { %4710 = vmatpush3.bf16.msra.mxu1 %v4977_v37 }
  0x11   :  { %4711 = vmatprep.subr.bf16.mxu1 %v4978_v39 }
  0x12   :  { %4514 = vmatmul.mubr.msk.bf16.gmra.mrb[4].mxu0 %vm322_vm0, %v5086_v8  ;;  %4582 = vmatmul.mubr.msk.bf16.gmra.mrb[4].mxu1 %vm322_vm0, %v5086_v8 }
  0x13   :  { %4517 = vmatprep.mubr.msk.bf16.mxu0 %vm322_vm0, %v5091_v9  ;;  %4585 = vmatprep.mubr.msk.bf16.mxu1 %vm322_vm0, %v5091_v9 }
  0x14   :  { %4712 = vmatpush3.bf16.msra.mxu1 %v4978_v39 }
  0x1a   :  { %4518 = vmatmul.mubr.msk.bf16.gmra.mrb[8].mxu0 %vm322_vm0, %v5104_v10  ;;  %4586 = vmatmul.mubr.msk.bf16.gmra.mrb[8].mxu1 %vm322_vm0, %v5104_v10 }
  0x1b   :  { %4521 = vmatprep.mubr.msk.bf16.mxu0 %vm322_vm0, %v5109_v11  ;;  %4589 = vmatprep.mubr.msk.bf16.mxu1 %vm322_vm0, %v5109_v11 }
  0x22   :  { %4522 = vmatmul.mubr.msk.bf16.gmra.mrb[12].mxu0 %vm322_vm0, %v5125_v13  ;;  %4590 = vmatmul.mubr.msk.bf16.gmra.mrb[12].mxu1 %vm322_vm0, %v5125_v13 }
  0x23   :  { %4525 = vmatprep.mubr.msk.bf16.mxu0 %vm322_vm0, %v5130_v14  ;;  %4593 = vmatprep.mubr.msk.bf16.mxu1 %vm322_vm0, %v5130_v14 }
  0x2a   :  { %4526 = vmatmul.mubr.msk.bf16.gmra.mrb[16].mxu0 %vm322_vm0, %v5143_v15  ;;  %4594 = vmatmul.mubr.msk.bf16.gmra.mrb[16].mxu1 %vm322_vm0, %v5143_v15 }
  0x2b   :  { %4529 = vmatprep.mubr.msk.bf16.mxu0 %vm322_vm0, %v5148_v16  ;;  %4597 = vmatprep.mubr.msk.bf16.mxu1 %vm322_vm0, %v5148_v16 }
  0x32   :  { %4530 = vmatmul.mubr.msk.bf16.gmra.mrb[20].mxu0 %vm322_vm0, %v5161_v17  ;;  %4598 = vmatmul.mubr.msk.bf16.gmra.mrb[20].mxu1 %vm322_vm0, %v5161_v17 }
  0x33   :  { %4533 = vmatprep.mubr.msk.bf16.mxu0 %vm322_vm0, %v5166_v18  ;;  %4601 = vmatprep.mubr.msk.bf16.mxu1 %vm322_vm0, %v5166_v18 }
  0x3a   :  { %4534 = vmatmul.mubr.msk.bf16.gmra.mrb[24].mxu0 %vm322_vm0, %v5179_v19  ;;  %4602 = vmatmul.mubr.msk.bf16.gmra.mrb[24].mxu1 %vm322_vm0, %v5179_v19 }
  0x3b   :  { %4537 = vmatprep.mubr.msk.bf16.mxu0 %vm322_vm0, %v5184_v20  ;;  %4605 = vmatprep.mubr.msk.bf16.mxu1 %vm322_vm0, %v5184_v20 }
  0x42   :  { %4538 = vmatmul.mubr.msk.bf16.gmra.mrb[28].mxu0 %vm322_vm0, %v5197_v21  ;;  %4606 = vmatmul.mubr.msk.bf16.gmra.mrb[28].mxu1 %vm322_vm0, %v5197_v21 }
  0x43   :  { %4541 = vmatprep.mubr.msk.bf16.mxu0 %vm322_vm0, %v5202_v22  ;;  %4609 = vmatprep.mubr.msk.bf16.mxu1 %vm322_vm0, %v5202_v22 }
  0x4a   :  { %4542 = vmatmul.mubr.msk.bf16.gmra.mrb[32].mxu0 %vm322_vm0, %v5215_v23  ;;  %4610 = vmatmul.mubr.msk.bf16.gmra.mrb[32].mxu1 %vm322_vm0, %v5215_v23 }
  0x4b   :  { %4545 = vmatprep.mubr.msk.bf16.mxu0 %vm322_vm0, %v5220_v24  ;;  %4613 = vmatprep.mubr.msk.bf16.mxu1 %vm322_vm0, %v5220_v24 }
  0x52   :  { %4546 = vmatmul.mubr.msk.bf16.gmra.mrb[36].mxu0 %vm322_vm0, %v5233_v25  ;;  %4614 = vmatmul.mubr.msk.bf16.gmra.mrb[36].mxu1 %vm322_vm0, %v5233_v25 }
  0x53   :  { %4549 = vmatprep.mubr.msk.bf16.mxu0 %vm322_vm0, %v5238_v26  ;;  %4617 = vmatprep.mubr.msk.bf16.mxu1 %vm322_vm0, %v5238_v26 }
  0x5a   :  { %4550 = vmatmul.mubr.msk.bf16.gmra.mrb[40].mxu0 %vm322_vm0, %v4966_v27  ;;  %4618 = vmatmul.mubr.msk.bf16.gmra.mrb[40].mxu1 %vm322_vm0, %v4966_v27 }
  0x5b   :  { %4553 = vmatprep.mubr.msk.bf16.mxu0 %vm322_vm0, %v4967_v28  ;;  %4621 = vmatprep.mubr.msk.bf16.mxu1 %vm322_vm0, %v4967_v28 }
  0x62   :  { %4554 = vmatmul.mubr.msk.bf16.gmra.mrb[44].mxu0 %vm322_vm0, %v5261_v29  ;;  %4622 = vmatmul.mubr.msk.bf16.gmra.mrb[44].mxu1 %vm322_vm0, %v5261_v29 }
  0x63   :  { %4557 = vmatprep.mubr.msk.bf16.mxu0 %vm322_vm0, %v5266_v30  ;;  %4625 = vmatprep.mubr.msk.bf16.mxu1 %vm322_vm0, %v5266_v30 }
  0x6a   :  { %4558 = vmatmul.mubr.msk.bf16.gmra.mrb[48].mxu0 %vm322_vm0, %v5279_v31  ;;  %4626 = vmatmul.mubr.msk.bf16.gmra.mrb[48].mxu1 %vm322_vm0, %v5279_v31 }
  0x6b   :  { %4561 = vmatprep.mubr.msk.bf16.mxu0 %vm322_vm0, %v5284_v32  ;;  %4629 = vmatprep.mubr.msk.bf16.mxu1 %vm322_vm0, %v5284_v32 }
  0x72   :  { %4562 = vmatmul.mubr.msk.bf16.gmra.mrb[52].mxu0 %vm322_vm0, %v5297_v33  ;;  %4630 = vmatmul.mubr.msk.bf16.gmra.mrb[52].mxu1 %vm322_vm0, %v5297_v33 }
  0x73   :  { %4565 = vmatprep.mubr.msk.bf16.mxu0 %vm322_vm0, %v5302_v34  ;;  %4633 = vmatprep.mubr.msk.bf16.mxu1 %vm322_vm0, %v5302_v34 }
  0x7a   :  { %4566 = vmatmul.mubr.msk.bf16.gmra.mrb[56].mxu0 %vm322_vm0, %v5315_v35  ;;  %4634 = vmatmul.mubr.msk.bf16.gmra.mrb[56].mxu1 %vm322_vm0, %v5315_v35 }
  0x7b   :  { %4569 = vmatprep.mubr.msk.bf16.mxu0 %vm322_vm0, %v5320_v36  ;;  %4637 = vmatprep.mubr.msk.bf16.mxu1 %vm322_vm0, %v5320_v36 }
  0x82   :  { %4570 = vmatmul.mubr.msk.bf16.gmra.mrb[60].mxu0 %vm322_vm0, %v5336_v38  ;;  %4638 = vmatmul.mubr.msk.bf16.gmra.mrb[60].mxu1 %vm322_vm0, %v5336_v38 }
  0x83   :  { %4645 = vmatprep.mubr.msk.bf16.mxu0 %vm322_vm0, %v5056_v4 }
  0x8a   :  { %4646 = vmatmul.mubr.msk.bf16.vlgmr.msra.gmra.mrb[64].mxu0 %vm322_vm0, %v5061_v5 }
  0x8b   :  { %4649 = vmatprep.mubr.msk.bf16.mxu0 %vm322_vm0, %v5073_v7 }
  0x92   :  { %4650 = vmatmul.mubr.msk.bf16.gmra.mrb[68].mxu0 %vm322_vm0, %v5086_v8 }
  0x93   :  { %4653 = vmatprep.mubr.msk.bf16.mxu0 %vm322_vm0, %v5091_v9 }
  0x9a   :  { %4654 = vmatmul.mubr.msk.bf16.gmra.mrb[72].mxu0 %vm322_vm0, %v5104_v10 }
  0x9b   :  { %4657 = vmatprep.mubr.msk.bf16.mxu0 %vm322_vm0, %v5109_v11 }
  0xa2   :  { %4658 = vmatmul.mubr.msk.bf16.gmra.mrb[76].mxu0 %vm322_vm0, %v5125_v13 }
  0xa3   :  { %4661 = vmatprep.mubr.msk.bf16.mxu0 %vm322_vm0, %v5130_v14  ;;  %v4979_v14 = vld [vmem:[%s7200_s3] sm:$0xff]  }
  0xa4   :  { %4777 = vmatprep.subr.bf16.mxu0 %v4979_v14 }
  0xa5   :  { %4778 = vmatpush3.bf16.msra.mxu0 %v4979_v14 }
  0xaa   :  { %4662 = vmatmul.mubr.msk.bf16.gmra.mrb[80].mxu0 %vm322_vm0, %v5143_v15 }
  0xab   :  { %4665 = vmatprep.mubr.msk.bf16.mxu0 %vm322_vm0, %v5148_v16 }
  0xb2   :  { %4666 = vmatmul.mubr.msk.bf16.gmra.mrb[84].mxu0 %vm322_vm0, %v5161_v17 }
  0xb3   :  { %4669 = vmatprep.mubr.msk.bf16.mxu0 %vm322_vm0, %v5166_v18 }
  0xba   :  { %4670 = vmatmul.mubr.msk.bf16.gmra.mrb[88].mxu0 %vm322_vm0, %v5179_v19 }
  0xbb   :  { %4673 = vmatprep.mubr.msk.bf16.mxu0 %vm322_vm0, %v5184_v20 }
  0xc2   :  { %4674 = vmatmul.mubr.msk.bf16.gmra.mrb[92].mxu0 %vm322_vm0, %v5197_v21 }
  0xc3   :  { %4677 = vmatprep.mubr.msk.bf16.mxu0 %vm322_vm0, %v5202_v22 }
  0xca   :  { %4678 = vmatmul.mubr.msk.bf16.gmra.mrb[96].mxu0 %vm322_vm0, %v5215_v23 }
  0xcb   :  { %4681 = vmatprep.mubr.msk.bf16.mxu0 %vm322_vm0, %v5220_v24 }
  0xd2   :  { %4682 = vmatmul.mubr.msk.bf16.gmra.mrb[100].mxu0 %vm322_vm0, %v5233_v25 }
  0xd3   :  { %4685 = vmatprep.mubr.msk.bf16.mxu0 %vm322_vm0, %v5238_v26  ;;  %v4980_v26 = vld [vmem:[%s7200_s3 + $0x8] sm:$0xff]  }
  0xd4   :  { %4779 = vmatprep.subr.bf16.mxu0 %v4980_v26 }
  0xd5   :  { %4780 = vmatpush3.bf16.msra.mxu0 %v4980_v26 }
  0xda   :  { %4686 = vmatmul.mubr.msk.bf16.gmra.mrb[104].mxu0 %vm322_vm0, %v4966_v27 }
  0xdb   :  { %4689 = vmatprep.mubr.msk.bf16.mxu0 %vm322_vm0, %v4967_v28 }
  0xdd   :  { %v4511_v42 = vpop.f32.mrb[0].mxu0  ;;  %v4579_v43 = vpop.f32.mrb[0].mxu1 }
  0xde   :  { %v5391_v44 = vpop.f32.mrb[1].mxu0  ;;  %v1015_v46 = vrot.slane %v4579_v43, 7  ;;  %v5398_v47 = vpop.f32.mrb[1].mxu1  ;;  %v462_v57 = vadd.f32 %v4511_v42, %v5396_v45 }
  0xdf   :  { %v4512_v48 = vpop.f32.mrb[2].mxu0  ;;  %v7210_v49 = vrot.slane %v5398_v47, 7  ;;  %v4580_v51 = vpop.f32.mrb[2].mxu1 }
  0xe0   :  { %v465_v50 = vadd.f32 %v4512_v48, %v5396_v45  ;;  %v456_v52 = vpop.f32.mrb[3].mxu0  ;;  %v1016_v53 = vrot.slane %v4580_v51, 7  ;;  %v761_v55 = vpop.f32.mrb[3].mxu1 }
  0xe1   :  { %v457_v54 = vadd.f32 %v5396_v45, %v456_v52  ;;  %v1014_v56 = vrot.slane %v761_v55, 7 }
  0xe2   :  { %4690 = vmatmul.mubr.msk.bf16.gmra.mrb[108].mxu0 %vm322_vm0, %v5261_v29  ;;  %v1138_v58 = vsel %vm1077_vm1, %v1015_v46, %v1016_v53 }
  0xe3   :  { %4693 = vmatprep.mubr.msk.bf16.mxu0 %vm322_vm0, %v5266_v30  ;;  %v5411_v59 = vadd.f32 %v1138_v58, %v465_v50  ;;  %v1139_v60 = vsel %vm1077_vm1, %v1014_v56, %v1015_v46  ;;  %v1140_v61 = vsel %vm1077_vm1, %v7210_v49, %v1014_v56  ;;  %v7208_v50 = vmov 0.0  }
  0xe4   :  { %v5419_v62 = vadd.f32 %v1140_v61, %v457_v54  ;;  %v5421_v63 = vadd.f32 %v1139_v60, %v462_v57  ;;  %4913 = vmatprep.subr.bf16.mxu0 %v7208_v50 }
  0xe5   :  { %v4515_v0 = vpop.f32.mrb[4].mxu0  ;;  %v4583_v1 = vpop.f32.mrb[4].mxu1 }
  0xe6   :  { %v469_v2 = vpop.f32.mrb[5].mxu0  ;;  %v1019_v3 = vrot.slane %v4583_v1, 7  ;;  %v774_v5 = vpop.f32.mrb[5].mxu1  ;;  %v478_v17 = vadd.f32 %v4515_v0, %v5396_v45 }
  0xe7   :  { %v470_v4 = vadd.f32 %v5396_v45, %v469_v2  ;;  %v4516_v6 = vpop.f32.mrb[6].mxu0  ;;  %v1017_v7 = vrot.slane %v774_v5, 7  ;;  %v4584_v9 = vpop.f32.mrb[6].mxu1 }
  0xe8   :  { %v481_v8 = vadd.f32 %v4516_v6, %v5396_v45  ;;  %v472_v10 = vpop.f32.mrb[7].mxu0  ;;  %v1020_v11 = vrot.slane %v4584_v9, 7  ;;  %v777_v13 = vpop.f32.mrb[7].mxu1  ;;  %v5483_v9 = vld [vmem:[%s7200_s3 + $0x20] sm:$0xff]  }
  0xe9   :  { %v473_v12 = vadd.f32 %v5396_v45, %v472_v10  ;;  %v1137_v15 = vsel %vm1077_vm1, %v1016_v53, %v1017_v7  ;;  %v1018_v16 = vrot.slane %v777_v13, 7  ;;  %4845 = vmatprep.subr.bf16.mxu1 %v5483_v9 }
  0xea   :  { %4694 = vmatmul.mubr.msk.bf16.gmra.mrb[112].mxu0 %vm322_vm0, %v5279_v31  ;;  %v5434_v18 = vadd.f32 %v1137_v15, %v470_v4  ;;  %v1134_v19 = vsel %vm1077_vm1, %v1019_v3, %v1020_v11 }
  0xeb   :  { %4697 = vmatprep.mubr.msk.bf16.mxu0 %vm322_vm0, %v5284_v32  ;;  %v5440_v20 = vadd.f32 %v1134_v19, %v481_v8  ;;  %v1135_v21 = vsel %vm1077_vm1, %v1018_v16, %v1019_v3  ;;  %v1136_v22 = vsel %vm1077_vm1, %v1017_v7, %v1018_v16 }
  0xec   :  { %v5446_v23 = vadd.f32 %v1136_v22, %v473_v12  ;;  %v5448_v24 = vadd.f32 %v1135_v21, %v478_v17 }
  0xed   :  { %v4519_v25 = vpop.f32.mrb[8].mxu0  ;;  %v4587_v27 = vpop.f32.mrb[8].mxu1 }
  0xee   :  { %v485_v28 = vpop.f32.mrb[9].mxu0  ;;  %v1023_v29 = vrot.slane %v4587_v27, 7  ;;  %v790_v31 = vpop.f32.mrb[9].mxu1  ;;  %v494_v53 = vadd.f32 %v4519_v25, %v5396_v45 }
  0xef   :  { %v486_v30 = vadd.f32 %v5396_v45, %v485_v28  ;;  %v4520_v32 = vpop.f32.mrb[10].mxu0  ;;  %v1021_v37 = vrot.slane %v790_v31, 7  ;;  %v4588_v40 = vpop.f32.mrb[10].mxu1 }
  0xf0   :  { %v497_v39 = vadd.f32 %v4520_v32, %v5396_v45  ;;  %v488_v42 = vpop.f32.mrb[11].mxu0  ;;  %v1024_v43 = vrot.slane %v4588_v40, 7  ;;  %v793_v48 = vpop.f32.mrb[11].mxu1 }
  0xf1   :  { %v489_v46 = vadd.f32 %v5396_v45, %v488_v42  ;;  %v1133_v51 = vsel %vm1077_vm1, %v1020_v11, %v1021_v37  ;;  %v1022_v52 = vrot.slane %v793_v48, 7 }
  0xf2   :  { %4698 = vmatmul.mubr.msk.bf16.gmra.mrb[116].mxu0 %vm322_vm0, %v5297_v33  ;;  %v5462_v54 = vadd.f32 %v1133_v51, %v486_v30  ;;  %v1130_v55 = vsel %vm1077_vm1, %v1023_v29, %v1024_v43 }
  0xf3   :  { %4701 = vmatprep.mubr.msk.bf16.mxu0 %vm322_vm0, %v5302_v34  ;;  %v5468_v56 = vadd.f32 %v1130_v55, %v497_v39  ;;  %v1131_v57 = vsel %vm1077_vm1, %v1022_v52, %v1023_v29  ;;  %v1132_v58 = vsel %vm1077_vm1, %v1021_v37, %v1022_v52 }
  0xf4   :  { %v5474_v60 = vadd.f32 %v1132_v58, %v489_v46  ;;  %v5476_v33 = vadd.f32 %v1131_v57, %v494_v53 }
  0xf5   :  { %v4523_v61 = vpop.f32.mrb[12].mxu0  ;;  %v4591_v0 = vpop.f32.mrb[12].mxu1 }
  0xf6   :  { %v501_v1 = vpop.f32.mrb[13].mxu0  ;;  %v1027_v2 = vrot.slane %v4591_v0, 7  ;;  %v806_v4 = vpop.f32.mrb[13].mxu1  ;;  %v510_v15 = vadd.f32 %v4523_v61, %v5396_v45 }
  0xf7   :  { %v502_v3 = vadd.f32 %v5396_v45, %v501_v1  ;;  %v4524_v34 = vpop.f32.mrb[14].mxu0  ;;  %v1025_v5 = vrot.slane %v806_v4, 7  ;;  %v4592_v7 = vpop.f32.mrb[14].mxu1 }
  0xf8   :  { %v513_v6 = vadd.f32 %v4524_v34, %v5396_v45  ;;  %v504_v8 = vpop.f32.mrb[15].mxu0  ;;  %v1028_v10 = vrot.slane %v4592_v7, 7  ;;  %v809_v12 = vpop.f32.mrb[15].mxu1 }
  0xf9   :  { %v505_v11 = vadd.f32 %v5396_v45, %v504_v8  ;;  %v1129_v13 = vsel %vm1077_vm1, %v1024_v43, %v1025_v5  ;;  %v1026_v14 = vrot.slane %v809_v12, 7 }
  0xfa   :  { %4702 = vmatmul.mubr.msk.bf16.gmra.mrb[120].mxu0 %vm322_vm0, %v5315_v35  ;;  %v5492_v16 = vadd.f32 %v1129_v13, %v502_v3  ;;  %v1126_v17 = vsel %vm1077_vm1, %v1027_v2, %v1028_v10 }
  0xfb   :  { %4705 = vmatprep.mubr.msk.bf16.mxu0 %vm322_vm0, %v5320_v36  ;;  %v5498_v19 = vadd.f32 %v1126_v17, %v513_v6  ;;  %v1127_v21 = vsel %vm1077_vm1, %v1026_v14, %v1027_v2  ;;  %v1128_v35 = vsel %vm1077_vm1, %v1025_v5, %v1026_v14 }
  0xfc   :  { %v5504_v22 = vadd.f32 %v1128_v35, %v505_v11  ;;  %v5506_v25 = vadd.f32 %v1127_v21, %v510_v15 }
  0xfd   :  { %v4527_v26 = vpop.f32.mrb[16].mxu0  ;;  %v4595_v27 = vpop.f32.mrb[16].mxu1 }
  0xfe   :  { %v517_v28 = vpop.f32.mrb[17].mxu0  ;;  %v1031_v29 = vrot.slane %v4595_v27, 7  ;;  %v822_v31 = vpop.f32.mrb[17].mxu1  ;;  %v526_v52 = vadd.f32 %v4527_v26, %v5396_v45 }
  0xff   :  { %v518_v30 = vadd.f32 %v5396_v45, %v517_v28  ;;  %v4528_v36 = vpop.f32.mrb[18].mxu0  ;;  %v1029_v32 = vrot.slane %v822_v31, 7  ;;  %v4596_v39 = vpop.f32.mrb[18].mxu1 }
 0x100   :  { %v529_v37 = vadd.f32 %v4528_v36, %v5396_v45  ;;  %v520_v40 = vpop.f32.mrb[19].mxu0  ;;  %v1032_v42 = vrot.slane %v4596_v39, 7  ;;  %v825_v46 = vpop.f32.mrb[19].mxu1 }
 0x101   :  { %v521_v43 = vadd.f32 %v5396_v45, %v520_v40  ;;  %v1125_v48 = vsel %vm1077_vm1, %v1028_v10, %v1029_v32  ;;  %v1030_v51 = vrot.slane %v825_v46, 7 }
 0x102   :  { %4706 = vmatmul.mubr.msk.bf16.gmra.mrb[124].mxu0 %vm322_vm0, %v5336_v38  ;;  %v5516_v53 = vadd.f32 %v1125_v48, %v518_v30  ;;  %v1122_v55 = vsel %vm1077_vm1, %v1031_v29, %v1032_v42 }
 0x103   :  { %v5520_v57 = vadd.f32 %v1122_v55, %v529_v37  ;;  %v1123_v58 = vsel %vm1077_vm1, %v1030_v51, %v1031_v29  ;;  %v1124_v61 = vsel %vm1077_vm1, %v1029_v32, %v1030_v51 }
 0x104   :  { %v5526_v0 = vadd.f32 %v1124_v61, %v521_v43  ;;  %v5528_v1 = vadd.f32 %v1123_v58, %v526_v52 }
 0x105   :  { %v4531_v38 = vpop.f32.mrb[20].mxu0  ;;  %v4599_v2 = vpop.f32.mrb[20].mxu1 }
 0x106   :  { %v533_v3 = vpop.f32.mrb[21].mxu0  ;;  %v1035_v4 = vrot.slane %v4599_v2, 7  ;;  %v838_v5 = vpop.f32.mrb[21].mxu1  ;;  %v542_v21 = vadd.f32 %v4531_v38, %v5396_v45 }
 0x107   :  { %v534_v34 = vadd.f32 %v5396_v45, %v533_v3  ;;  %v4532_v6 = vpop.f32.mrb[22].mxu0  ;;  %v1033_v7 = vrot.slane %v838_v5, 7  ;;  %v4600_v10 = vpop.f32.mrb[22].mxu1 }
 0x108   :  { %v545_v8 = vadd.f32 %v4532_v6, %v5396_v45  ;;  %v536_v11 = vpop.f32.mrb[23].mxu0  ;;  %v1036_v12 = vrot.slane %v4600_v10, 7  ;;  %v841_v14 = vpop.f32.mrb[23].mxu1 }
 0x109   :  { %v537_v13 = vadd.f32 %v5396_v45, %v536_v11  ;;  %v1121_v15 = vsel %vm1077_vm1, %v1032_v42, %v1033_v7  ;;  %v1034_v17 = vrot.slane %v841_v14, 7 }
 0x10a   :  { %v5536_v35 = vadd.f32 %v1121_v15, %v534_v34  ;;  %v1118_v26 = vsel %vm1077_vm1, %v1035_v4, %v1036_v12 }
 0x10b   :  { %v5540_v27 = vadd.f32 %v1118_v26, %v545_v8  ;;  %v1119_v28 = vsel %vm1077_vm1, %v1034_v17, %v1035_v4  ;;  %v1120_v29 = vsel %vm1077_vm1, %v1033_v7, %v1034_v17 }
 0x10c   :  { %v5546_v30 = vadd.f32 %v1120_v29, %v537_v13  ;;  %v5548_v31 = vadd.f32 %v1119_v28, %v542_v21 }
 0x10d   :  { %v4535_v36 = vpop.f32.mrb[24].mxu0  ;;  %v4603_v32 = vpop.f32.mrb[24].mxu1 }
 0x10e   :  { %v549_v37 = vpop.f32.mrb[25].mxu0  ;;  %v1039_v39 = vrot.slane %v4603_v32, 7  ;;  %v854_v42 = vpop.f32.mrb[25].mxu1  ;;  %v558_v3 = vadd.f32 %v4535_v36, %v5396_v45 }
 0x10f   :  { %v550_v40 = vadd.f32 %v5396_v45, %v549_v37  ;;  %v4536_v43 = vpop.f32.mrb[26].mxu0  ;;  %v1037_v46 = vrot.slane %v854_v42, 7  ;;  %v4604_v51 = vpop.f32.mrb[26].mxu1 }
 0x110   :  { %v561_v48 = vadd.f32 %v4536_v43, %v5396_v45  ;;  %v552_v52 = vpop.f32.mrb[27].mxu0  ;;  %v1040_v55 = vrot.slane %v4604_v51, 7  ;;  %v857_v61 = vpop.f32.mrb[27].mxu1 }
 0x111   :  { %v553_v58 = vadd.f32 %v5396_v45, %v552_v52  ;;  %v1117_v38 = vsel %vm1077_vm1, %v1036_v12, %v1037_v46  ;;  %v1038_v2 = vrot.slane %v857_v61, 7 }
 0x112   :  { %v5556_v4 = vadd.f32 %v1117_v38, %v550_v40  ;;  %v1114_v34 = vsel %vm1077_vm1, %v1039_v39, %v1040_v55 }
 0x113   :  { %v5560_v5 = vadd.f32 %v1114_v34, %v561_v48  ;;  %v1115_v6 = vsel %vm1077_vm1, %v1038_v2, %v1039_v39  ;;  %v1116_v7 = vsel %vm1077_vm1, %v1037_v46, %v1038_v2 }
 0x114   :  { %v5566_v8 = vadd.f32 %v1116_v7, %v553_v58  ;;  %v5568_v10 = vadd.f32 %v1115_v6, %v558_v3 }
 0x115   :  { %v4539_v11 = vpop.f32.mrb[28].mxu0  ;;  %v4607_v12 = vpop.f32.mrb[28].mxu1 }
 0x116   :  { %v565_v13 = vpop.f32.mrb[29].mxu0  ;;  %v1043_v14 = vrot.slane %v4607_v12, 7  ;;  %v870_v17 = vpop.f32.mrb[29].mxu1  ;;  %v574_v43 = vadd.f32 %v4539_v11, %v5396_v45 }
 0x117   :  { %v566_v15 = vadd.f32 %v5396_v45, %v565_v13  ;;  %v4540_v21 = vpop.f32.mrb[30].mxu0  ;;  %v1041_v26 = vrot.slane %v870_v17, 7  ;;  %v4608_v29 = vpop.f32.mrb[30].mxu1 }
 0x118   :  { %v577_v28 = vadd.f32 %v4540_v21, %v5396_v45  ;;  %v568_v36 = vpop.f32.mrb[31].mxu0  ;;  %v1044_v32 = vrot.slane %v4608_v29, 7  ;;  %v873_v39 = vpop.f32.mrb[31].mxu1 }
 0x119   :  { %v569_v37 = vadd.f32 %v5396_v45, %v568_v36  ;;  %v1113_v40 = vsel %vm1077_vm1, %v1040_v55, %v1041_v26  ;;  %v1042_v42 = vrot.slane %v873_v39, 7 }
 0x11a   :  { %v5576_v46 = vadd.f32 %v1113_v40, %v566_v15  ;;  %v1110_v48 = vsel %vm1077_vm1, %v1043_v14, %v1044_v32 }
 0x11b   :  { %v5580_v51 = vadd.f32 %v1110_v48, %v577_v28  ;;  %v1111_v52 = vsel %vm1077_vm1, %v1042_v42, %v1043_v14  ;;  %v1112_v58 = vsel %vm1077_vm1, %v1041_v26, %v1042_v42 }
 0x11c   :  { %v5586_v61 = vadd.f32 %v1112_v58, %v569_v37  ;;  %v5588_v38 = vadd.f32 %v1111_v52, %v574_v43 }
 0x11d   :  { %v4543_v55 = vpop.f32.mrb[32].mxu0  ;;  %v4611_v2 = vpop.f32.mrb[32].mxu1 }
 0x11e   :  { %v581_v3 = vpop.f32.mrb[33].mxu0  ;;  %v1047_v34 = vrot.slane %v4611_v2, 7  ;;  %v886_v7 = vpop.f32.mrb[33].mxu1  ;;  %v590_v36 = vadd.f32 %v4543_v55, %v5396_v45 }
 0x11f   :  { %v582_v6 = vadd.f32 %v5396_v45, %v581_v3  ;;  %v4544_v11 = vpop.f32.mrb[34].mxu0  ;;  %v1045_v12 = vrot.slane %v886_v7, 7  ;;  %v4612_v15 = vpop.f32.mrb[34].mxu1 }
 0x120   :  { %v593_v13 = vadd.f32 %v4544_v11, %v5396_v45  ;;  %v584_v14 = vpop.f32.mrb[35].mxu0  ;;  %v1048_v17 = vrot.slane %v4612_v15, 7  ;;  %v889_v26 = vpop.f32.mrb[35].mxu1 }
 0x121   :  { %v585_v21 = vadd.f32 %v5396_v45, %v584_v14  ;;  %v1109_v28 = vsel %vm1077_vm1, %v1044_v32, %v1045_v12  ;;  %v1046_v29 = vrot.slane %v889_v26, 7 }
 0x122   :  { %v5596_v37 = vadd.f32 %v1109_v28, %v582_v6  ;;  %v1106_v39 = vsel %vm1077_vm1, %v1047_v34, %v1048_v17 }
 0x123   :  { %v5600_v40 = vadd.f32 %v1106_v39, %v593_v13  ;;  %v1107_v42 = vsel %vm1077_vm1, %v1046_v29, %v1047_v34  ;;  %v1108_v43 = vsel %vm1077_vm1, %v1045_v12, %v1046_v29 }
 0x124   :  { %v5606_v48 = vadd.f32 %v1108_v43, %v585_v21  ;;  %v5608_v52 = vadd.f32 %v1107_v42, %v590_v36 }
 0x125   :  { %v4547_v32 = vpop.f32.mrb[36].mxu0  ;;  %v4615_v58 = vpop.f32.mrb[36].mxu1 }
 0x126   :  { %v597_v55 = vpop.f32.mrb[37].mxu0  ;;  %v1051_v2 = vrot.slane %v4615_v58, 7  ;;  %v902_v6 = vpop.f32.mrb[37].mxu1  ;;  %v606_v29 = vadd.f32 %v4547_v32, %v5396_v45 }
 0x127   :  { %v598_v3 = vadd.f32 %v5396_v45, %v597_v55  ;;  %v4548_v7 = vpop.f32.mrb[38].mxu0  ;;  %v1049_v11 = vrot.slane %v902_v6, 7  ;;  %v4616_v15 = vpop.f32.mrb[38].mxu1 }
 0x128   :  { %v609_v13 = vadd.f32 %v4548_v7, %v5396_v45  ;;  %v600_v34 = vpop.f32.mrb[39].mxu0  ;;  %v1052_v14 = vrot.slane %v4616_v15, 7  ;;  %v905_v21 = vpop.f32.mrb[39].mxu1 }
 0x129   :  { %v601_v12 = vadd.f32 %v5396_v45, %v600_v34  ;;  %v1105_v26 = vsel %vm1077_vm1, %v1048_v17, %v1049_v11  ;;  %v1050_v28 = vrot.slane %v905_v21, 7 }
 0x12a   :  { %v5616_v36 = vadd.f32 %v1105_v26, %v598_v3  ;;  %v1102_v39 = vsel %vm1077_vm1, %v1051_v2, %v1052_v14 }
 0x12b   :  { %v5620_v42 = vadd.f32 %v1102_v39, %v609_v13  ;;  %v1103_v43 = vsel %vm1077_vm1, %v1050_v28, %v1051_v2  ;;  %v1104_v58 = vsel %vm1077_vm1, %v1049_v11, %v1050_v28 }
 0x12c   :  { %v5626_v55 = vadd.f32 %v1104_v58, %v601_v12  ;;  %v5628_v6 = vadd.f32 %v1103_v43, %v606_v29 }
 0x12d   :  { %7214 = vst [vmem:[#allocation2_spill] sm:$0xff] %v5620_v42  ;;  %v4551_v17 = vpop.f32.mrb[40].mxu0  ;;  %v4619_v7 = vpop.f32.mrb[40].mxu1 }
 0x12e   :  { %v613_v32 = vpop.f32.mrb[41].mxu0  ;;  %v1055_v3 = vrot.slane %v4619_v7, 7  ;;  %v918_v34 = vpop.f32.mrb[41].mxu1  ;;  %v622_v43 = vadd.f32 %v4551_v17, %v5396_v45 }
 0x12f   :  { %v614_v15 = vadd.f32 %v5396_v45, %v613_v32  ;;  %v4552_v21 = vpop.f32.mrb[42].mxu0  ;;  %v1053_v13 = vrot.slane %v918_v34, 7  ;;  %v4620_v39 = vpop.f32.mrb[42].mxu1 }
 0x130   :  { %v625_v26 = vadd.f32 %v4552_v21, %v5396_v45  ;;  %v616_v2 = vpop.f32.mrb[43].mxu0  ;;  %v1056_v50 = vrot.slane %v4620_v39, 7  ;;  %v921_v12 = vpop.f32.mrb[43].mxu1 }
 0x131   :  { %v617_v11 = vadd.f32 %v5396_v45, %v616_v2  ;;  %v1101_v28 = vsel %vm1077_vm1, %v1052_v14, %v1053_v13  ;;  %v1054_v29 = vrot.slane %v921_v12, 7 }
 0x132   :  { %v5636_v58 = vadd.f32 %v1101_v28, %v614_v15  ;;  %v1098_v7 = vsel %vm1077_vm1, %v1055_v3, %v1056_v50 }
 0x133   :  { %v5640_v32 = vadd.f32 %v1098_v7, %v625_v26  ;;  %v1099_v34 = vsel %vm1077_vm1, %v1054_v29, %v1055_v3  ;;  %v1100_v21 = vsel %vm1077_vm1, %v1053_v13, %v1054_v29 }
 0x134   :  { %7215 = vst [vmem:[#allocation3_spill] sm:$0xff] %v5636_v58  ;;  %v5646_v39 = vadd.f32 %v1100_v21, %v617_v11  ;;  %v5648_v2 = vadd.f32 %v1099_v34, %v622_v43 }
 0x135   :  { %7216 = vst [vmem:[#allocation4_spill] sm:$0xff] %v5640_v32  ;;  %v4555_v14 = vpop.f32.mrb[44].mxu0  ;;  %v4623_v12 = vpop.f32.mrb[44].mxu1 }
 0x136   :  { %7217 = vst [vmem:[#allocation5_spill] sm:$0xff] %v5646_v39  ;;  %7218 = vst [vmem:[#allocation6_spill] sm:$0xff] %v5648_v2  ;;  %v629_v17 = vpop.f32.mrb[45].mxu0  ;;  %v1059_v15 = vrot.slane %v4623_v12, 7  ;;  %v934_v49 = vpop.f32.mrb[45].mxu1  ;;  %v638_v34 = vadd.f32 %v4555_v14, %v5396_v45 }
 0x137   :  { %v630_v28 = vadd.f32 %v5396_v45, %v629_v17  ;;  %v4556_v58 = vpop.f32.mrb[46].mxu0  ;;  %v1057_v26 = vrot.slane %v934_v49, 7  ;;  %v4624_v32 = vpop.f32.mrb[46].mxu1 }
 0x138   :  { %v641_v7 = vadd.f32 %v4556_v58, %v5396_v45  ;;  %v632_v3 = vpop.f32.mrb[47].mxu0  ;;  %v1060_v42 = vrot.slane %v4624_v32, 7  ;;  %v937_v11 = vpop.f32.mrb[47].mxu1 }
 0x139   :  { %v633_v13 = vadd.f32 %v5396_v45, %v632_v3  ;;  %v1097_v29 = vsel %vm1077_vm1, %v1056_v50, %v1057_v26  ;;  %v1058_v43 = vrot.slane %v937_v11, 7 }
 0x13a   :  { %v5656_v21 = vadd.f32 %v1097_v29, %v630_v28  ;;  %v1094_v12 = vsel %vm1077_vm1, %v1059_v15, %v1060_v42 }
 0x13b   :  { %v5660_v49 = vadd.f32 %v1094_v12, %v641_v7  ;;  %v1095_v58 = vsel %vm1077_vm1, %v1058_v43, %v1059_v15  ;;  %v1096_v32 = vsel %vm1077_vm1, %v1057_v26, %v1058_v43 }
 0x13c   :  { %7219 = vst [vmem:[#allocation7_spill] sm:$0xff] %v5656_v21  ;;  %v5666_v17 = vadd.f32 %v1096_v32, %v633_v13  ;;  %v5668_v3 = vadd.f32 %v1095_v58, %v638_v34 }
 0x13d   :  { %7220 = vst [vmem:[#allocation8_spill] sm:$0xff] %v5660_v49  ;;  %v4559_v50 = vpop.f32.mrb[48].mxu0  ;;  %v4627_v11 = vpop.f32.mrb[48].mxu1 }
 0x13e   :  { %7221 = vst [vmem:[#allocation9_spill] sm:$0xff] %v5666_v17  ;;  %7222 = vst [vmem:[#allocation10_spill] sm:$0xff] %v5668_v3  ;;  %v645_v14 = vpop.f32.mrb[49].mxu0  ;;  %v1063_v28 = vrot.slane %v4627_v11, 7  ;;  %v950_v21 = vpop.f32.mrb[49].mxu1  ;;  %v654_v58 = vadd.f32 %v4559_v50, %v5396_v45 }
 0x13f   :  { %v646_v29 = vadd.f32 %v5396_v45, %v645_v14  ;;  %v4560_v39 = vpop.f32.mrb[50].mxu0  ;;  %v1061_v7 = vrot.slane %v950_v21, 7  ;;  %v4628_v49 = vpop.f32.mrb[50].mxu1 }
 0x140   :  { %v657_v12 = vadd.f32 %v4560_v39, %v5396_v45  ;;  %v648_v15 = vpop.f32.mrb[51].mxu0  ;;  %v1064_v2 = vrot.slane %v4628_v49, 7  ;;  %v953_v13 = vpop.f32.mrb[51].mxu1 }
 0x141   :  { %v649_v26 = vadd.f32 %v5396_v45, %v648_v15  ;;  %v1093_v43 = vsel %vm1077_vm1, %v1060_v42, %v1061_v7  ;;  %v1062_v34 = vrot.slane %v953_v13, 7 }
 0x142   :  { %v5676_v32 = vadd.f32 %v1093_v43, %v646_v29  ;;  %v1090_v11 = vsel %vm1077_vm1, %v1063_v28, %v1064_v2 }
 0x143   :  { %v5680_v21 = vadd.f32 %v1090_v11, %v657_v12  ;;  %v1091_v39 = vsel %vm1077_vm1, %v1062_v34, %v1063_v28  ;;  %v1092_v49 = vsel %vm1077_vm1, %v1061_v7, %v1062_v34 }
 0x144   :  { %7223 = vst [vmem:[#allocation11_spill] sm:$0xff] %v5676_v32  ;;  %v5686_v14 = vadd.f32 %v1092_v49, %v649_v26  ;;  %v5688_v15 = vadd.f32 %v1091_v39, %v654_v58 }
 0x145   :  { %7224 = vst [vmem:[#allocation12_spill] sm:$0xff] %v5680_v21  ;;  %v4563_v42 = vpop.f32.mrb[52].mxu0  ;;  %v4631_v13 = vpop.f32.mrb[52].mxu1 }
 0x146   :  { %7225 = vst [vmem:[#allocation13_spill] sm:$0xff] %v5686_v14  ;;  %7226 = vst [vmem:[#allocation14_spill] sm:$0xff] %v5688_v15  ;;  %v661_v50 = vpop.f32.mrb[53].mxu0  ;;  %v1067_v29 = vrot.slane %v4631_v13, 7  ;;  %v966_v32 = vpop.f32.mrb[53].mxu1  ;;  %v670_v39 = vadd.f32 %v4563_v42, %v5396_v45 }
 0x147   :  { %v662_v43 = vadd.f32 %v5396_v45, %v661_v50  ;;  %v4564_v17 = vpop.f32.mrb[54].mxu0  ;;  %v1065_v12 = vrot.slane %v966_v32, 7  ;;  %v4632_v21 = vpop.f32.mrb[54].mxu1 }
 0x148   :  { %v673_v11 = vadd.f32 %v4564_v17, %v5396_v45  ;;  %v664_v28 = vpop.f32.mrb[55].mxu0  ;;  %v1068_v3 = vrot.slane %v4632_v21, 7  ;;  %v969_v26 = vpop.f32.mrb[55].mxu1 }
 0x149   :  { %v665_v7 = vadd.f32 %v5396_v45, %v664_v28  ;;  %v1089_v34 = vsel %vm1077_vm1, %v1064_v2, %v1065_v12  ;;  %v1066_v58 = vrot.slane %v969_v26, 7 }
 0x14a   :  { %v5696_v49 = vadd.f32 %v1089_v34, %v662_v43  ;;  %v1086_v13 = vsel %vm1077_vm1, %v1067_v29, %v1068_v3 }
 0x14b   :  { %v5700_v32 = vadd.f32 %v1086_v13, %v673_v11  ;;  %v1087_v17 = vsel %vm1077_vm1, %v1066_v58, %v1067_v29  ;;  %v1088_v21 = vsel %vm1077_vm1, %v1065_v12, %v1066_v58 }
 0x14c   :  { %7227 = vst [vmem:[#allocation15_spill] sm:$0xff] %v5696_v49  ;;  %v5706_v50 = vadd.f32 %v1088_v21, %v665_v7  ;;  %v5708_v28 = vadd.f32 %v1087_v17, %v670_v39 }
 0x14d   :  { %7228 = vst [vmem:[#allocation16_spill] sm:$0xff] %v5700_v32  ;;  %v4567_v2 = vpop.f32.mrb[56].mxu0  ;;  %v4635_v26 = vpop.f32.mrb[56].mxu1 }
 0x14e   :  { %7229 = vst [vmem:[#allocation17_spill] sm:$0xff] %v5706_v50  ;;  %7230 = vst [vmem:[#allocation18_spill] sm:$0xff] %v5708_v28  ;;  %v677_v42 = vpop.f32.mrb[57].mxu0  ;;  %v1071_v43 = vrot.slane %v4635_v26, 7  ;;  %v982_v49 = vpop.f32.mrb[57].mxu1  ;;  %v686_v17 = vadd.f32 %v4567_v2, %v5396_v45 }
 0x14f   :  { %v678_v34 = vadd.f32 %v5396_v45, %v677_v42  ;;  %v4568_v14 = vpop.f32.mrb[58].mxu0  ;;  %v1069_v11 = vrot.slane %v982_v49, 7  ;;  %v4636_v32 = vpop.f32.mrb[58].mxu1 }
 0x150   :  { %v689_v13 = vadd.f32 %v4568_v14, %v5396_v45  ;;  %v680_v29 = vpop.f32.mrb[59].mxu0  ;;  %v1072_v15 = vrot.slane %v4636_v32, 7  ;;  %v985_v7 = vpop.f32.mrb[59].mxu1 }
 0x151   :  { %v681_v12 = vadd.f32 %v5396_v45, %v680_v29  ;;  %v1085_v58 = vsel %vm1077_vm1, %v1068_v3, %v1069_v11  ;;  %v1070_v39 = vrot.slane %v985_v7, 7 }
 0x152   :  { %v5716_v21 = vadd.f32 %v1085_v58, %v678_v34  ;;  %v1082_v26 = vsel %vm1077_vm1, %v1071_v43, %v1072_v15 }
 0x153   :  { %v5720_v49 = vadd.f32 %v1082_v26, %v689_v13  ;;  %v1083_v14 = vsel %vm1077_vm1, %v1070_v39, %v1071_v43  ;;  %v1084_v32 = vsel %vm1077_vm1, %v1069_v11, %v1070_v39  ;;  %v454_v39 = vadd.f32 %v5396_v45, %v5391_v44 }
 0x154   :  { %7231 = vst [vmem:[#allocation19_spill] sm:$0xff] %v5716_v21  ;;  %v5726_v42 = vadd.f32 %v1084_v32, %v681_v12  ;;  %v5728_v29 = vadd.f32 %v1083_v14, %v686_v17 }
 0x155   :  { %7232 = vst [vmem:[#allocation20_spill] sm:$0xff] %v5720_v49  ;;  %v4571_v3 = vpop.f32.mrb[60].mxu0  ;;  %v4639_v7 = vpop.f32.mrb[60].mxu1 }
 0x156   :  { %v693_v2 = vpop.f32.mrb[61].mxu0  ;;  %v1075_v34 = vrot.slane %v4639_v7, 7  ;;  %v998_v21 = vpop.f32.mrb[61].mxu1  ;;  %v702_v32 = vadd.f32 %v4571_v3, %v5396_v45 }
 0x157   :  { %v694_v58 = vadd.f32 %v5396_v45, %v693_v2  ;;  %v4572_v50 = vpop.f32.mrb[62].mxu0  ;;  %v1073_v13 = vrot.slane %v998_v21, 7  ;;  %v4640_v49 = vpop.f32.mrb[62].mxu1  ;;  %v7234_v21 = vrot.slane %v5398_v47, 7  ;;  %v35_v47 = vadd.s32 8, %v5389_v41 }
 0x158   :  { %v705_v26 = vadd.f32 %v4572_v50, %v5396_v45  ;;  %v696_v43 = vpop.f32.mrb[63].mxu0  ;;  %v1076_v28 = vrot.slane %v4640_v49, 7  ;;  %v1001_v12 = vpop.f32.mrb[63].mxu1 }
 0x159   :  { %v697_v11 = vadd.f32 %v5396_v45, %v696_v43  ;;  %v1081_v17 = vsel %vm1077_vm1, %v1072_v15, %v1073_v13  ;;  %v1074_v14 = vrot.slane %v1001_v12, 7  ;;  %vm43_vm4 = vcmp.lt.s32.totalorder %v35_v47, 9 }
 0x15a   :  { %v5738_v7 = vadd.f32 %v1081_v17, %v694_v58  ;;  %v1078_v50 = vsel %vm1077_vm1, %v1075_v34, %v1076_v28  ;;  %v1141_v49 = vsel %vm1077_vm1, %v1076_v28, %v7234_v21 }
 0x15b   :  { %v1142_v2 = vadd.f32 %v1141_v49, %v454_v39  ;;  %v5746_v43 = vadd.f32 %v1078_v50, %v705_v26  ;;  %v1079_v44 = vsel %vm1077_vm1, %v1074_v14, %v1075_v34  ;;  %v1080_v15 = vsel %vm1077_vm1, %v1073_v13, %v1074_v14 }
 0x15c   :  { %7233 = vst [vmem:[#allocation21_spill] sm:$0xff] %v5738_v7  ;;  %v5752_v45 = vadd.f32 %v1080_v15, %v697_v11  ;;  %v5754_v3 = vadd.f32 %v1079_v44, %v702_v32  ;;  %v36_v13 = vadd.s32 16, %v5389_v41  ;;  %v37_v49 = vadd.s32 24, %v5389_v41 }
 0x15d   :  { %7235 = vst [vmem:[#allocation22_spill] sm:$0xff] %v5746_v43  ;;  %v4647_v58 = vpop.f32.mrb[64].mxu0 }
 0x15e   :  { %7236 = vst [vmem:[#allocation23_spill] sm:$0xff] %v5752_v45  ;;  %v5756_v12 = vpop.f32.mrb[65].mxu0  ;;  %v1514_v28 = vrot.slane %v4647_v58, 1  ;;  %v7237_v58 = vmov 0.0   ;;  %vm52_vm5 = vcmp.ge.s32.totalorder %v36_v13, 17  ;;  %vm57_vm6 = vcmp.lt.s32.totalorder %v37_v49, 29 }
 0x15f   :  { %v4648_v17 = vpop.f32.mrb[66].mxu0  ;;  %v7211_v34 = vrot.slane %v5756_v12, 1  ;;  %v5778_v47 = vsel %vm43_vm4, 1.0, %v7237_v58 }
 0x160   :  { %v1515_v26 = vrot.slane %v4648_v17, 1  ;;  %v1260_v39 = vpop.f32.mrb[67].mxu0  ;;  %v5775_v17 = vsel %vm38_vm3, 1.0, %v7237_v58 }
 0x161   :  { %v1513_v50 = vrot.slane %v1260_v39, 1 }
 0x162   :  { %v1637_v11 = vsel %vm1576_vm2, %v1514_v28, %v1515_v26 }
 0x163   :  { %v1643_v14 = vadd.f32 %v1637_v11, %v5421_v63  ;;  %v1638_v32 = vsel %vm1576_vm2, %v1513_v50, %v1514_v28  ;;  %v1639_v21 = vsel %vm1576_vm2, %v7211_v34, %v1513_v50  ;;  %v5783_v34 = vsel %vm52_vm5, 1.0, %v7237_v58 }
 0x164   :  { %v1641_v44 = vadd.f32 %v1639_v21, %v1142_v2  ;;  %v1642_v15 = vadd.f32 %v1638_v32, %v5419_v62 }
 0x165   :  { %v4651_v63 = vpop.f32.mrb[68].mxu0 }
 0x166   :  { %v1705_v39 = vmax.f32 %v1641_v44, 0.0  ;;  %v1706_v28 = vmax.f32 %v1642_v15, 0.0  ;;  %v1273_v11 = vpop.f32.mrb[69].mxu0  ;;  %v1518_v21 = vrot.slane %v4651_v63, 1  ;;  %v1707_v44 = vmax.f32 %v1643_v14, 0.0 }
 0x167   :  { %v1516_v45 = vrot.slane %v1273_v11, 1  ;;  %v4652_v7 = vpop.f32.mrb[70].mxu0 }
 0x168   :  { %v1769_v50 = vmul.f32 %v5775_v17, %v1705_v39  ;;  %v1770_v2 = vmul.f32 %v5778_v47, %v1706_v28  ;;  %v1519_v62 = vrot.slane %v4652_v7, 1  ;;  %v1276_v32 = vpop.f32.mrb[71].mxu0  ;;  %v5793_v39 = vsel %vm57_vm6, 1.0, %v7237_v58 }
 0x169   :  { %v1636_v43 = vsel %vm1576_vm2, %v1515_v26, %v1516_v45  ;;  %v1517_v13 = vrot.slane %v1276_v32, 1 }
 0x16a   :  { %v1644_v15 = vadd.f32 %v1636_v43, %v5411_v59  ;;  %v1633_v49 = vsel %vm1576_vm2, %v1518_v21, %v1519_v62  ;;  %v5790_v11 = vpack.c.bf16 %v1770_v2, %v1769_v50 }
 0x16b   :  { %v1647_v7 = vadd.f32 %v1633_v49, %v5448_v24  ;;  %v1634_v63 = vsel %vm1576_vm2, %v1517_v13, %v1518_v21  ;;  %v1635_v26 = vsel %vm1576_vm2, %v1516_v45, %v1517_v13  ;;  %v1771_v24 = vmul.f32 %v5783_v34, %v1707_v44 }
 0x16c   :  { %7238 = vst [vmem:[#allocation24_spill] sm:$0xff] %v5790_v11  ;;  %v1708_v28 = vmax.f32 %v1644_v15, 0.0  ;;  %v1645_v14 = vadd.f32 %v1635_v26, %v5434_v18  ;;  %v1646_v59 = vadd.f32 %v1634_v63, %v5446_v23  ;;  %4713 = vmatprep.mubr.msk.bf16.mxu1 %vm322_vm0, %v5790_v11  ;;  %4781 = vmatprep.mubr.msk.bf16.mxu0 %vm322_vm0, %v5790_v11 }
 0x16d   :  { %v4655_v43 = vpop.f32.mrb[72].mxu0 }
 0x16e   :  { %v1772_v50 = vmul.f32 %v5793_v39, %v1708_v28  ;;  %v1709_v2 = vmax.f32 %v1645_v14, 0.0  ;;  %v1710_v21 = vmax.f32 %v1646_v59, 0.0  ;;  %v1289_v32 = vpop.f32.mrb[73].mxu0  ;;  %v1522_v45 = vrot.slane %v4655_v43, 1  ;;  %v4982_v28 = vld [vmem:[%s7200_s3 + $0x28] sm:$0xff]  }
 0x16f   :  { %v1520_v13 = vrot.slane %v1289_v32, 1  ;;  %v4656_v15 = vpop.f32.mrb[74].mxu0  ;;  %v1711_v14 = vmax.f32 %v1647_v7, 0.0 }
 0x170   :  { %v5808_v18 = vpack.c.bf16 %v1772_v50, %v1771_v24  ;;  %v1773_v23 = vmul.f32 %v5775_v17, %v1709_v2  ;;  %v1774_v49 = vmul.f32 %v5778_v47, %v1710_v21  ;;  %v1523_v63 = vrot.slane %v4656_v15, 1  ;;  %v1292_v26 = vpop.f32.mrb[75].mxu0 }
 0x171   :  { %v1632_v11 = vsel %vm1576_vm2, %v1519_v62, %v1520_v13  ;;  %v1521_v44 = vrot.slane %v1292_v26, 1  ;;  %v1775_v21 = vmul.f32 %v5783_v34, %v1711_v14 }
 0x172   :  { %v1648_v59 = vadd.f32 %v1632_v11, %v5440_v20  ;;  %v1629_v43 = vsel %vm1576_vm2, %v1522_v45, %v1523_v63  ;;  %4714 = vmatmul.mubr.msk.bf16.vlgmr.msra.gmra.mrb[64].mxu1 %vm322_vm0, %v5808_v18  ;;  %4782 = vmatmul.mubr.msk.bf16.vlgmr.msra.gmra.mrb[128].mxu0 %vm322_vm0, %v5808_v18  ;;  %v5824_v24 = vpack.c.bf16 %v1774_v49, %v1773_v23 }
 0x173   :  { %v1651_v62 = vadd.f32 %v1629_v43, %v5476_v33  ;;  %v1630_v50 = vsel %vm1576_vm2, %v1521_v44, %v1522_v45  ;;  %v1631_v7 = vsel %vm1576_vm2, %v1520_v13, %v1521_v44  ;;  %4846 = vmatpush3.bf16.msra.mxu1 %v5483_v9 }
 0x174   :  { %v1712_v20 = vmax.f32 %v1648_v59, 0.0  ;;  %v1649_v11 = vadd.f32 %v1631_v7, %v5462_v54  ;;  %v1650_v2 = vadd.f32 %v1630_v50, %v5474_v60  ;;  %4717 = vmatprep.mubr.msk.bf16.mxu1 %vm322_vm0, %v5824_v24  ;;  %4785 = vmatprep.mubr.msk.bf16.mxu0 %vm322_vm0, %v5824_v24 }
 0x175   :  { %v4659_v33 = vpop.f32.mrb[76].mxu0  ;;  %4847 = vmatprep.subr.bf16.mxu1 %v4982_v28  ;;  %v1715_v50 = vmax.f32 %v1651_v62, 0.0 }
 0x176   :  { %v1776_v32 = vmul.f32 %v5793_v39, %v1712_v20  ;;  %v1713_v45 = vmax.f32 %v1649_v11, 0.0  ;;  %v1714_v13 = vmax.f32 %v1650_v2, 0.0  ;;  %v1305_v9 = vpop.f32.mrb[77].mxu0  ;;  %v1526_v15 = vrot.slane %v4659_v33, 1 }
 0x177   :  { %v1524_v23 = vrot.slane %v1305_v9, 1  ;;  %v4660_v54 = vpop.f32.mrb[78].mxu0  ;;  %4848 = vmatpush3.bf16.msra.mxu1 %v4982_v28 }
 0x178   :  { %v1777_v60 = vmul.f32 %v5775_v17, %v1713_v45  ;;  %v1778_v49 = vmul.f32 %v5778_v47, %v1714_v13  ;;  %v1527_v26 = vrot.slane %v4660_v54, 1  ;;  %v1308_v44 = vpop.f32.mrb[79].mxu0  ;;  %v5842_v59 = vpack.c.bf16 %v1776_v32, %v1775_v21  ;;  %4921 = vmatprep.subr.bf16.mxu1 %v7237_v58 }
 0x179   :  { %v1628_v14 = vsel %vm1576_vm2, %v1523_v63, %v1524_v23  ;;  %v1525_v43 = vrot.slane %v1308_v44, 1 }
 0x17a   :  { %v1652_v7 = vadd.f32 %v1628_v14, %v5468_v56  ;;  %v1625_v28 = vsel %vm1576_vm2, %v1526_v15, %v1527_v26  ;;  %4718 = vmatmul.mubr.msk.bf16.gmra.mrb[68].mxu1 %vm322_vm0, %v5842_v59  ;;  %4786 = vmatmul.mubr.msk.bf16.gmra.mrb[132].mxu0 %vm322_vm0, %v5842_v59  ;;  %v5854_v20 = vpack.c.bf16 %v1778_v49, %v1777_v60 }
 0x17b   :  { %v1655_v11 = vadd.f32 %v1625_v28, %v5506_v25  ;;  %v1626_v63 = vsel %vm1576_vm2, %v1525_v43, %v1526_v15  ;;  %v1627_v62 = vsel %vm1576_vm2, %v1524_v23, %v1525_v43  ;;  %v1779_v25 = vmul.f32 %v5783_v34, %v1715_v50 }
 0x17c   :  { %v1716_v56 = vmax.f32 %v1652_v7, 0.0  ;;  %v1653_v2 = vadd.f32 %v1627_v62, %v5492_v16  ;;  %v1654_v33 = vadd.f32 %v1626_v63, %v5504_v22  ;;  %4721 = vmatprep.mubr.msk.bf16.mxu1 %vm322_vm0, %v5854_v20  ;;  %4789 = vmatprep.mubr.msk.bf16.mxu0 %vm322_vm0, %v5854_v20 }
 0x17d   :  { %v4663_v21 = vpop.f32.mrb[80].mxu0  ;;  %v1719_v50 = vmax.f32 %v1655_v11, 0.0 }
 0x17e   :  { %v1780_v32 = vmul.f32 %v5793_v39, %v1716_v56  ;;  %v1717_v45 = vmax.f32 %v1653_v2, 0.0  ;;  %v1718_v13 = vmax.f32 %v1654_v33, 0.0  ;;  %v1321_v9 = vpop.f32.mrb[81].mxu0  ;;  %v1530_v15 = vrot.slane %v4663_v21, 1 }
 0x17f   :  { %v1528_v23 = vrot.slane %v1321_v9, 1  ;;  %v4664_v54 = vpop.f32.mrb[82].mxu0 }
 0x180   :  { %v1781_v16 = vmul.f32 %v5775_v17, %v1717_v45  ;;  %v1782_v22 = vmul.f32 %v5778_v47, %v1718_v13  ;;  %v1531_v60 = vrot.slane %v4664_v54, 1  ;;  %v1324_v49 = vpop.f32.mrb[83].mxu0  ;;  %v5871_v44 = vpack.c.bf16 %v1780_v32, %v1779_v25 }
 0x181   :  { %v1624_v14 = vsel %vm1576_vm2, %v1527_v26, %v1528_v23  ;;  %v1529_v43 = vrot.slane %v1324_v49, 1 }
 0x182   :  { %v1656_v7 = vadd.f32 %v1624_v14, %v5498_v19  ;;  %v1621_v28 = vsel %vm1576_vm2, %v1530_v15, %v1531_v60  ;;  %4722 = vmatmul.mubr.msk.bf16.gmra.mrb[72].mxu1 %vm322_vm0, %v5871_v44  ;;  %4790 = vmatmul.mubr.msk.bf16.gmra.mrb[136].mxu0 %vm322_vm0, %v5871_v44  ;;  %v5882_v63 = vpack.c.bf16 %v1782_v22, %v1781_v16 }
 0x183   :  { %v1659_v62 = vadd.f32 %v1621_v28, %v5528_v1  ;;  %v1622_v26 = vsel %vm1576_vm2, %v1529_v43, %v1530_v15  ;;  %v1623_v11 = vsel %vm1576_vm2, %v1528_v23, %v1529_v43  ;;  %v1783_v1 = vmul.f32 %v5783_v34, %v1719_v50 }
 0x184   :  { %v1720_v19 = vmax.f32 %v1656_v7, 0.0  ;;  %v1657_v56 = vadd.f32 %v1623_v11, %v5516_v53  ;;  %v1658_v2 = vadd.f32 %v1622_v26, %v5526_v0  ;;  %4725 = vmatprep.mubr.msk.bf16.mxu1 %vm322_vm0, %v5882_v63  ;;  %4793 = vmatprep.mubr.msk.bf16.mxu0 %vm322_vm0, %v5882_v63 }
 0x185   :  { %v4667_v33 = vpop.f32.mrb[84].mxu0  ;;  %v1723_v14 = vmax.f32 %v1659_v62, 0.0 }
 0x186   :  { %v1784_v21 = vmul.f32 %v5793_v39, %v1720_v19  ;;  %v1721_v25 = vmax.f32 %v1657_v56, 0.0  ;;  %v1722_v32 = vmax.f32 %v1658_v2, 0.0  ;;  %v1337_v45 = vpop.f32.mrb[85].mxu0  ;;  %v1534_v13 = vrot.slane %v4667_v33, 1 }
 0x187   :  { %v1532_v9 = vrot.slane %v1337_v45, 1  ;;  %v4668_v15 = vpop.f32.mrb[86].mxu0 }
 0x188   :  { %v1785_v53 = vmul.f32 %v5775_v17, %v1721_v25  ;;  %v1786_v0 = vmul.f32 %v5778_v47, %v1722_v32  ;;  %v1535_v23 = vrot.slane %v4668_v15, 1  ;;  %v1340_v54 = vpop.f32.mrb[87].mxu0  ;;  %v5899_v16 = vpack.c.bf16 %v1784_v21, %v1783_v1 }
 0x189   :  { %v1620_v22 = vsel %vm1576_vm2, %v1531_v60, %v1532_v9  ;;  %v1533_v49 = vrot.slane %v1340_v54, 1 }
 0x18a   :  { %v1660_v43 = vadd.f32 %v1620_v22, %v5520_v57  ;;  %v1617_v50 = vsel %vm1576_vm2, %v1534_v13, %v1535_v23  ;;  %4726 = vmatmul.mubr.msk.bf16.gmra.mrb[76].mxu1 %vm322_vm0, %v5899_v16  ;;  %4794 = vmatmul.mubr.msk.bf16.gmra.mrb[140].mxu0 %vm322_vm0, %v5899_v16  ;;  %v5910_v7 = vpack.c.bf16 %v1786_v0, %v1785_v53 }
 0x18b   :  { %v1663_v28 = vadd.f32 %v1617_v50, %v5548_v31  ;;  %v1618_v60 = vsel %vm1576_vm2, %v1533_v49, %v1534_v13  ;;  %v1619_v62 = vsel %vm1576_vm2, %v1532_v9, %v1533_v49  ;;  %v1787_v31 = vmul.f32 %v5783_v34, %v1723_v14 }
 0x18c   :  { %v1724_v57 = vmax.f32 %v1660_v43, 0.0  ;;  %v1661_v26 = vadd.f32 %v1619_v62, %v5536_v35  ;;  %v1662_v11 = vadd.f32 %v1618_v60, %v5546_v30  ;;  %4729 = vmatprep.mubr.msk.bf16.mxu1 %vm322_vm0, %v5910_v7  ;;  %4797 = vmatprep.mubr.msk.bf16.mxu0 %vm322_vm0, %v5910_v7 }
 0x18d   :  { %v4671_v19 = vpop.f32.mrb[88].mxu0  ;;  %v1727_v0 = vmax.f32 %v1663_v28, 0.0 }
 0x18e   :  { %v1788_v56 = vmul.f32 %v5793_v39, %v1724_v57  ;;  %v1725_v2 = vmax.f32 %v1661_v26, 0.0  ;;  %v1726_v33 = vmax.f32 %v1662_v11, 0.0  ;;  %v1353_v1 = vpop.f32.mrb[89].mxu0  ;;  %v1538_v21 = vrot.slane %v4671_v19, 1 }
 0x18f   :  { %v1536_v25 = vrot.slane %v1353_v1, 1  ;;  %v4672_v32 = vpop.f32.mrb[90].mxu0 }
 0x190   :  { %v1789_v35 = vmul.f32 %v5775_v17, %v1725_v2  ;;  %v1790_v30 = vmul.f32 %v5778_v47, %v1726_v33  ;;  %v1539_v45 = vrot.slane %v4672_v32, 1  ;;  %v1356_v13 = vpop.f32.mrb[91].mxu0  ;;  %v5927_v9 = vpack.c.bf16 %v1788_v56, %v1787_v31 }
 0x191   :  { %v1616_v15 = vsel %vm1576_vm2, %v1535_v23, %v1536_v25  ;;  %v1537_v53 = vrot.slane %v1356_v13, 1 }
 0x192   :  { %v1664_v54 = vadd.f32 %v1616_v15, %v5540_v27  ;;  %v1613_v22 = vsel %vm1576_vm2, %v1538_v21, %v1539_v45  ;;  %4730 = vmatmul.mubr.msk.bf16.gmra.mrb[80].mxu1 %vm322_vm0, %v5927_v9  ;;  %4798 = vmatmul.mubr.msk.bf16.gmra.mrb[144].mxu0 %vm322_vm0, %v5927_v9  ;;  %v5938_v49 = vpack.c.bf16 %v1790_v30, %v1789_v35 }
 0x193   :  { %v1667_v14 = vadd.f32 %v1613_v22, %v5568_v10  ;;  %v1614_v23 = vsel %vm1576_vm2, %v1537_v53, %v1538_v21  ;;  %v1615_v43 = vsel %vm1576_vm2, %v1536_v25, %v1537_v53  ;;  %v1791_v10 = vmul.f32 %v5783_v34, %v1727_v0 }
 0x194   :  { %v1728_v27 = vmax.f32 %v1664_v54, 0.0  ;;  %v1665_v50 = vadd.f32 %v1615_v43, %v5556_v4  ;;  %v1666_v28 = vadd.f32 %v1614_v23, %v5566_v8  ;;  %4733 = vmatprep.mubr.msk.bf16.mxu1 %vm322_vm0, %v5938_v49  ;;  %4801 = vmatprep.mubr.msk.bf16.mxu0 %vm322_vm0, %v5938_v49 }
 0x195   :  { %v4675_v60 = vpop.f32.mrb[92].mxu0  ;;  %v1731_v32 = vmax.f32 %v1667_v14, 0.0 }
 0x196   :  { %v1792_v62 = vmul.f32 %v5793_v39, %v1728_v27  ;;  %v1729_v57 = vmax.f32 %v1665_v50, 0.0  ;;  %v1730_v26 = vmax.f32 %v1666_v28, 0.0  ;;  %v1369_v11 = vpop.f32.mrb[93].mxu0  ;;  %v1542_v19 = vrot.slane %v4675_v60, 1 }
 0x197   :  { %v1540_v31 = vrot.slane %v1369_v11, 1  ;;  %v4676_v56 = vpop.f32.mrb[94].mxu0 }
 0x198   :  { %v1793_v4 = vmul.f32 %v5775_v17, %v1729_v57  ;;  %v1794_v8 = vmul.f32 %v5778_v47, %v1730_v26  ;;  %v1543_v2 = vrot.slane %v4676_v56, 1  ;;  %v1372_v33 = vpop.f32.mrb[95].mxu0  ;;  %v5955_v1 = vpack.c.bf16 %v1792_v62, %v1791_v10 }
 0x199   :  { %v1612_v21 = vsel %vm1576_vm2, %v1539_v45, %v1540_v31  ;;  %v1541_v25 = vrot.slane %v1372_v33, 1 }
 0x19a   :  { %v1668_v35 = vadd.f32 %v1612_v21, %v5560_v5  ;;  %v1609_v30 = vsel %vm1576_vm2, %v1542_v19, %v1543_v2  ;;  %4734 = vmatmul.mubr.msk.bf16.gmra.mrb[84].mxu1 %vm322_vm0, %v5955_v1  ;;  %4802 = vmatmul.mubr.msk.bf16.gmra.mrb[148].mxu0 %vm322_vm0, %v5955_v1  ;;  %v5966_v13 = vpack.c.bf16 %v1794_v8, %v1793_v4 }
 0x19b   :  { %v1671_v15 = vadd.f32 %v1609_v30, %v5588_v38  ;;  %v1610_v45 = vsel %vm1576_vm2, %v1541_v25, %v1542_v19  ;;  %v1611_v53 = vsel %vm1576_vm2, %v1540_v31, %v1541_v25  ;;  %v1795_v38 = vmul.f32 %v5783_v34, %v1731_v32 }
 0x19c   :  { %v1732_v5 = vmax.f32 %v1668_v35, 0.0  ;;  %v1669_v0 = vadd.f32 %v1611_v53, %v5576_v46  ;;  %v1670_v54 = vadd.f32 %v1610_v45, %v5586_v61  ;;  %4737 = vmatprep.mubr.msk.bf16.mxu1 %vm322_vm0, %v5966_v13  ;;  %4805 = vmatprep.mubr.msk.bf16.mxu0 %vm322_vm0, %v5966_v13 }
 0x19d   :  { %v4679_v22 = vpop.f32.mrb[96].mxu0  ;;  %v1735_v19 = vmax.f32 %v1671_v15, 0.0 }
 0x19e   :  { %v1796_v14 = vmul.f32 %v5793_v39, %v1732_v5  ;;  %v1733_v23 = vmax.f32 %v1669_v0, 0.0  ;;  %v1734_v43 = vmax.f32 %v1670_v54, 0.0  ;;  %v1385_v27 = vpop.f32.mrb[97].mxu0  ;;  %v1546_v50 = vrot.slane %v4679_v22, 1 }
 0x19f   :  { %v1544_v28 = vrot.slane %v1385_v27, 1  ;;  %v4680_v60 = vpop.f32.mrb[98].mxu0 }
 0x1a0   :  { %v1797_v46 = vmul.f32 %v5775_v17, %v1733_v23  ;;  %v1798_v61 = vmul.f32 %v5778_v47, %v1734_v43  ;;  %v1547_v10 = vrot.slane %v4680_v60, 1  ;;  %v1388_v62 = vpop.f32.mrb[99].mxu0  ;;  %v5983_v57 = vpack.c.bf16 %v1796_v14, %v1795_v38 }
 0x1a1   :  { %v1608_v26 = vsel %vm1576_vm2, %v1543_v2, %v1544_v28  ;;  %v1545_v11 = vrot.slane %v1388_v62, 1 }
 0x1a2   :  { %v1672_v31 = vadd.f32 %v1608_v26, %v5580_v51  ;;  %v1605_v56 = vsel %vm1576_vm2, %v1546_v50, %v1547_v10  ;;  %4738 = vmatmul.mubr.msk.bf16.gmra.mrb[88].mxu1 %vm322_vm0, %v5983_v57  ;;  %4806 = vmatmul.mubr.msk.bf16.gmra.mrb[152].mxu0 %vm322_vm0, %v5983_v57  ;;  %v5994_v4 = vpack.c.bf16 %v1798_v61, %v1797_v46 }
 0x1a3   :  { %v1675_v8 = vadd.f32 %v1605_v56, %v5608_v52  ;;  %v1606_v2 = vsel %vm1576_vm2, %v1545_v11, %v1546_v50  ;;  %v1607_v33 = vsel %vm1576_vm2, %v1544_v28, %v1545_v11  ;;  %v1799_v52 = vmul.f32 %v5783_v34, %v1735_v19 }
 0x1a4   :  { %v1736_v51 = vmax.f32 %v1672_v31, 0.0  ;;  %v1673_v21 = vadd.f32 %v1607_v33, %v5596_v37  ;;  %v1674_v25 = vadd.f32 %v1606_v2, %v5606_v48  ;;  %4741 = vmatprep.mubr.msk.bf16.mxu1 %vm322_vm0, %v5994_v4  ;;  %4809 = vmatprep.mubr.msk.bf16.mxu0 %vm322_vm0, %v5994_v4 }
 0x1a5   :  { %v4683_v32 = vpop.f32.mrb[100].mxu0  ;;  %v1739_v43 = vmax.f32 %v1675_v8, 0.0 }
 0x1a6   :  { %v1800_v35 = vmul.f32 %v5793_v39, %v1736_v51  ;;  %v1737_v30 = vmax.f32 %v1673_v21, 0.0  ;;  %v1738_v15 = vmax.f32 %v1674_v25, 0.0  ;;  %v1401_v45 = vpop.f32.mrb[101].mxu0  ;;  %v1550_v53 = vrot.slane %v4683_v32, 1 }
 0x1a7   :  { %v1548_v5 = vrot.slane %v1401_v45, 1  ;;  %v4684_v0 = vpop.f32.mrb[102].mxu0 }
 0x1a8   :  { %v1801_v37 = vmul.f32 %v5775_v17, %v1737_v30  ;;  %v1802_v48 = vmul.f32 %v5778_v47, %v1738_v15  ;;  %v1551_v54 = vrot.slane %v4684_v0, 1  ;;  %v1404_v22 = vpop.f32.mrb[103].mxu0  ;;  %v6011_v38 = vpack.c.bf16 %v1800_v35, %v1799_v52  ;;  %v7239_v30 = vld [vmem:[#allocation2_spill] sm:$0xff] }
 0x1a9   :  { %v1604_v14 = vsel %vm1576_vm2, %v1547_v10, %v1548_v5  ;;  %v1549_v23 = vrot.slane %v1404_v22, 1  ;;  %v7241_v22 = vld [vmem:[#allocation3_spill] sm:$0xff] }
 0x1aa   :  { %v1676_v27 = vadd.f32 %v1604_v14, %v5600_v40  ;;  %v1601_v50 = vsel %vm1576_vm2, %v1550_v53, %v1551_v54  ;;  %4742 = vmatmul.mubr.msk.bf16.gmra.mrb[92].mxu1 %vm322_vm0, %v6011_v38  ;;  %4810 = vmatmul.mubr.msk.bf16.gmra.mrb[156].mxu0 %vm322_vm0, %v6011_v38  ;;  %v6022_v28 = vpack.c.bf16 %v1802_v48, %v1801_v37 }
 0x1ab   :  { %v1679_v60 = vadd.f32 %v1601_v50, %v5628_v6  ;;  %v1602_v46 = vsel %vm1576_vm2, %v1549_v23, %v1550_v53  ;;  %v1603_v61 = vsel %vm1576_vm2, %v1548_v5, %v1549_v23  ;;  %v1803_v6 = vmul.f32 %v5783_v34, %v1739_v43  ;;  %v7240_v5 = vld [vmem:[#allocation6_spill] sm:$0xff]  ;;  %v7242_v23 = vld [vmem:[#allocation5_spill] sm:$0xff] }
 0x1ac   :  { %v1740_v40 = vmax.f32 %v1676_v27, 0.0  ;;  %v1677_v10 = vadd.f32 %v1603_v61, %v5616_v36  ;;  %v1678_v62 = vadd.f32 %v1602_v46, %v5626_v55  ;;  %4745 = vmatprep.mubr.msk.bf16.mxu1 %vm322_vm0, %v6022_v28  ;;  %4813 = vmatprep.mubr.msk.bf16.mxu0 %vm322_vm0, %v6022_v28 }
 0x1ad   :  { %v4687_v26 = vpop.f32.mrb[104].mxu0  ;;  %v1743_v35 = vmax.f32 %v1679_v60, 0.0 }
 0x1ae   :  { %v1804_v11 = vmul.f32 %v5793_v39, %v1740_v40  ;;  %v1741_v19 = vmax.f32 %v1677_v10, 0.0  ;;  %v1742_v31 = vmax.f32 %v1678_v62, 0.0  ;;  %v1417_v56 = vpop.f32.mrb[105].mxu0  ;;  %v1554_v8 = vrot.slane %v4687_v26, 1 }
 0x1af   :  { %v1552_v2 = vrot.slane %v1417_v56, 1  ;;  %v4688_v33 = vpop.f32.mrb[106].mxu0  ;;  %v1807_v50 = vmul.f32 %v5783_v34, %v1743_v35 }
 0x1b0   :  { %v1805_v36 = vmul.f32 %v5775_v17, %v1741_v19  ;;  %v1806_v55 = vmul.f32 %v5778_v47, %v1742_v31  ;;  %v1555_v51 = vrot.slane %v4688_v33, 1  ;;  %v1420_v21 = vpop.f32.mrb[107].mxu0  ;;  %v6039_v25 = vpack.c.bf16 %v1804_v11, %v1803_v6 }
 0x1b1   :  { %v1600_v32 = vsel %vm1576_vm2, %v1551_v54, %v1552_v2  ;;  %v1553_v52 = vrot.slane %v1420_v21, 1 }
 0x1b2   :  { %v1680_v15 = vadd.f32 %v1600_v32, %v7239_v30  ;;  %v1597_v45 = vsel %vm1576_vm2, %v1554_v8, %v1555_v51  ;;  %4746 = vmatmul.mubr.msk.bf16.gmra.mrb[96].mxu1 %vm322_vm0, %v6039_v25  ;;  %4814 = vmatmul.mubr.msk.bf16.gmra.mrb[160].mxu0 %vm322_vm0, %v6039_v25  ;;  %v6050_v53 = vpack.c.bf16 %v1806_v55, %v1805_v36  ;;  %v7243_v36 = vld [vmem:[#allocation4_spill] sm:$0xff] }
 0x1b3   :  { %v1683_v0 = vadd.f32 %v1597_v45, %v7240_v5  ;;  %v1598_v37 = vsel %vm1576_vm2, %v1553_v52, %v1554_v8  ;;  %v1599_v48 = vsel %vm1576_vm2, %v1552_v2, %v1553_v52  ;;  %v7244_v52 = vld [vmem:[#allocation10_spill] sm:$0xff]  ;;  %v7245_v45 = vld [vmem:[#allocation7_spill] sm:$0xff] }
 0x1b4   :  { %v1744_v54 = vmax.f32 %v1680_v15, 0.0  ;;  %v1681_v14 = vadd.f32 %v1599_v48, %v7241_v22  ;;  %v1682_v43 = vadd.f32 %v1598_v37, %v7242_v23  ;;  %4749 = vmatprep.mubr.msk.bf16.mxu1 %vm322_vm0, %v6050_v53  ;;  %4817 = vmatprep.mubr.msk.bf16.mxu0 %vm322_vm0, %v6050_v53 }
 0x1b5   :  { %v4691_v27 = vpop.f32.mrb[108].mxu0  ;;  %v1747_v33 = vmax.f32 %v1683_v0, 0.0  ;;  %v7246_v0 = vld [vmem:[#allocation9_spill] sm:$0xff] }
 0x1b6   :  { %v1808_v60 = vmul.f32 %v5793_v39, %v1744_v54  ;;  %v1745_v46 = vmax.f32 %v1681_v14, 0.0  ;;  %v1746_v61 = vmax.f32 %v1682_v43, 0.0  ;;  %v1433_v40 = vpop.f32.mrb[109].mxu0  ;;  %v1558_v10 = vrot.slane %v4691_v27, 1 }
 0x1b7   :  { %v1556_v62 = vrot.slane %v1433_v40, 1  ;;  %v4692_v26 = vpop.f32.mrb[110].mxu0  ;;  %v1811_v54 = vmul.f32 %v5783_v34, %v1747_v33 }
 0x1b8   :  { %v1809_v6 = vmul.f32 %v5775_v17, %v1745_v46  ;;  %v1810_v11 = vmul.f32 %v5778_v47, %v1746_v61  ;;  %v1559_v19 = vrot.slane %v4692_v26, 1  ;;  %v1436_v31 = vpop.f32.mrb[111].mxu0  ;;  %v6067_v56 = vpack.c.bf16 %v1808_v60, %v1807_v50 }
 0x1b9   :  { %v1596_v8 = vsel %vm1576_vm2, %v1555_v51, %v1556_v62  ;;  %v1557_v2 = vrot.slane %v1436_v31, 1  ;;  %v7247_v31 = vld [vmem:[#allocation8_spill] sm:$0xff] }
 0x1ba   :  { %v1684_v55 = vadd.f32 %v1596_v8, %v7243_v36  ;;  %v1593_v21 = vsel %vm1576_vm2, %v1558_v10, %v1559_v19  ;;  %4750 = vmatmul.mubr.msk.bf16.gmra.mrb[100].mxu1 %vm322_vm0, %v6067_v56  ;;  %4818 = vmatmul.mubr.msk.bf16.gmra.mrb[164].mxu0 %vm322_vm0, %v6067_v56  ;;  %v6078_v32 = vpack.c.bf16 %v1810_v11, %v1809_v6  ;;  %v7248_v36 = vld [vmem:[#allocation14_spill] sm:$0xff] }
 0x1bb   :  { %v1687_v35 = vadd.f32 %v1593_v21, %v7244_v52  ;;  %v1594_v51 = vsel %vm1576_vm2, %v1557_v2, %v1558_v10  ;;  %v1595_v30 = vsel %vm1576_vm2, %v1556_v62, %v1557_v2 }
 0x1bc   :  { %v1748_v15 = vmax.f32 %v1684_v55, 0.0  ;;  %v1685_v5 = vadd.f32 %v1595_v30, %v7245_v45  ;;  %v1686_v37 = vadd.f32 %v1594_v51, %v7246_v0  ;;  %4753 = vmatprep.mubr.msk.bf16.mxu1 %vm322_vm0, %v6078_v32  ;;  %4821 = vmatprep.mubr.msk.bf16.mxu0 %vm322_vm0, %v6078_v32  ;;  %v7250_v30 = vld [vmem:[#allocation13_spill] sm:$0xff] }
 0x1bd   :  { %v4695_v48 = vpop.f32.mrb[112].mxu0  ;;  %v1751_v11 = vmax.f32 %v1687_v35, 0.0  ;;  %v7249_v35 = vld [vmem:[#allocation11_spill] sm:$0xff] }
 0x1be   :  { %v1812_v22 = vmul.f32 %v5793_v39, %v1748_v15  ;;  %v1749_v14 = vmax.f32 %v1685_v5, 0.0  ;;  %v1750_v23 = vmax.f32 %v1686_v37, 0.0  ;;  %v1449_v43 = vpop.f32.mrb[113].mxu0  ;;  %v1562_v27 = vrot.slane %v4695_v48, 1 }
 0x1bf   :  { %v1560_v50 = vrot.slane %v1449_v43, 1  ;;  %v4696_v60 = vpop.f32.mrb[114].mxu0  ;;  %v1815_v5 = vmul.f32 %v5783_v34, %v1751_v11 }
 0x1c0   :  { %v1813_v46 = vmul.f32 %v5775_v17, %v1749_v14  ;;  %v1814_v61 = vmul.f32 %v5778_v47, %v1750_v23  ;;  %v1563_v40 = vrot.slane %v4696_v60, 1  ;;  %v1452_v10 = vpop.f32.mrb[115].mxu0  ;;  %v6095_v62 = vpack.c.bf16 %v1812_v22, %v1811_v54 }
 0x1c1   :  { %v1592_v26 = vsel %vm1576_vm2, %v1559_v19, %v1560_v50  ;;  %v1561_v6 = vrot.slane %v1452_v10, 1 }
 0x1c2   :  { %v1688_v8 = vadd.f32 %v1592_v26, %v7247_v31  ;;  %v1589_v2 = vsel %vm1576_vm2, %v1562_v27, %v1563_v40  ;;  %4754 = vmatmul.mubr.msk.bf16.gmra.mrb[104].mxu1 %vm322_vm0, %v6095_v62  ;;  %4822 = vmatmul.mubr.msk.bf16.gmra.mrb[168].mxu0 %vm322_vm0, %v6095_v62  ;;  %v6106_v33 = vpack.c.bf16 %v1814_v61, %v1813_v46 }
 0x1c3   :  { %v1691_v55 = vadd.f32 %v1589_v2, %v7248_v36  ;;  %v1590_v19 = vsel %vm1576_vm2, %v1561_v6, %v1562_v27  ;;  %v1591_v21 = vsel %vm1576_vm2, %v1560_v50, %v1561_v6  ;;  %v7251_v6 = vld [vmem:[#allocation12_spill] sm:$0xff]  ;;  %v7252_v2 = vld [vmem:[#allocation18_spill] sm:$0xff] }
 0x1c4   :  { %v1752_v52 = vmax.f32 %v1688_v8, 0.0  ;;  %v1689_v51 = vadd.f32 %v1591_v21, %v7249_v35  ;;  %v1690_v15 = vadd.f32 %v1590_v19, %v7250_v30  ;;  %4757 = vmatprep.mubr.msk.bf16.mxu1 %vm322_vm0, %v6106_v33  ;;  %4825 = vmatprep.mubr.msk.bf16.mxu0 %vm322_vm0, %v6106_v33  ;;  %v7253_v21 = vld [vmem:[#allocation15_spill] sm:$0xff]  ;;  %v7254_v35 = vld [vmem:[#allocation17_spill] sm:$0xff] }
 0x1c5   :  { %v4699_v45 = vpop.f32.mrb[116].mxu0  ;;  %v1755_v26 = vmax.f32 %v1691_v55, 0.0 }
 0x1c6   :  { %v1816_v0 = vmul.f32 %v5793_v39, %v1752_v52  ;;  %v1753_v37 = vmax.f32 %v1689_v51, 0.0  ;;  %v1754_v48 = vmax.f32 %v1690_v15, 0.0  ;;  %v1465_v54 = vpop.f32.mrb[117].mxu0  ;;  %v1566_v22 = vrot.slane %v4699_v45, 1 }
 0x1c7   :  { %v1564_v14 = vrot.slane %v1465_v54, 1  ;;  %v4700_v23 = vpop.f32.mrb[118].mxu0  ;;  %v1819_v15 = vmul.f32 %v5783_v34, %v1755_v26 }
 0x1c8   :  { %v1817_v43 = vmul.f32 %v5775_v17, %v1753_v37  ;;  %v1818_v27 = vmul.f32 %v5778_v47, %v1754_v48  ;;  %v1567_v50 = vrot.slane %v4700_v23, 1  ;;  %v1468_v60 = vpop.f32.mrb[119].mxu0  ;;  %v6123_v46 = vpack.c.bf16 %v1816_v0, %v1815_v5 }
 0x1c9   :  { %v1588_v61 = vsel %vm1576_vm2, %v1563_v40, %v1564_v14  ;;  %v1565_v10 = vrot.slane %v1468_v60, 1 }
 0x1ca   :  { %v1692_v11 = vadd.f32 %v1588_v61, %v7251_v6  ;;  %v1585_v31 = vsel %vm1576_vm2, %v1566_v22, %v1567_v50  ;;  %4758 = vmatmul.mubr.msk.bf16.gmra.mrb[108].mxu1 %vm322_vm0, %v6123_v46  ;;  %4826 = vmatmul.mubr.msk.bf16.gmra.mrb[172].mxu0 %vm322_vm0, %v6123_v46  ;;  %v6134_v8 = vpack.c.bf16 %v1818_v27, %v1817_v43  ;;  %v7255_v6 = vld [vmem:[#allocation16_spill] sm:$0xff] }
 0x1cb   :  { %v1695_v36 = vadd.f32 %v1585_v31, %v7252_v2  ;;  %v1586_v40 = vsel %vm1576_vm2, %v1565_v10, %v1566_v22  ;;  %v1587_v55 = vsel %vm1576_vm2, %v1564_v14, %v1565_v10 }
 0x1cc   :  { %v1756_v19 = vmax.f32 %v1692_v11, 0.0  ;;  %v1693_v52 = vadd.f32 %v1587_v55, %v7253_v21  ;;  %v1694_v51 = vadd.f32 %v1586_v40, %v7254_v35  ;;  %4761 = vmatprep.mubr.msk.bf16.mxu1 %vm322_vm0, %v6134_v8  ;;  %4829 = vmatprep.mubr.msk.bf16.mxu0 %vm322_vm0, %v6134_v8 }
 0x1cd   :  { %v4703_v30 = vpop.f32.mrb[120].mxu0  ;;  %v1759_v26 = vmax.f32 %v1695_v36, 0.0 }
 0x1ce   :  { %v1820_v45 = vmul.f32 %v5793_v39, %v1756_v19  ;;  %v1757_v5 = vmax.f32 %v1693_v52, 0.0  ;;  %v1758_v0 = vmax.f32 %v1694_v51, 0.0  ;;  %v1481_v37 = vpop.f32.mrb[121].mxu0  ;;  %v1570_v48 = vrot.slane %v4703_v30, 1  ;;  %v7256_v19 = vld [vmem:[#allocation19_spill] sm:$0xff] }
 0x1cf   :  { %v1568_v54 = vrot.slane %v1481_v37, 1  ;;  %v4704_v22 = vpop.f32.mrb[122].mxu0 }
 0x1d0   :  { %v1821_v14 = vmul.f32 %v5775_v17, %v1757_v5  ;;  %v1822_v23 = vmul.f32 %v5778_v47, %v1758_v0  ;;  %v1571_v43 = vrot.slane %v4704_v22, 1  ;;  %v1484_v27 = vpop.f32.mrb[123].mxu0  ;;  %v6151_v60 = vpack.c.bf16 %v1820_v45, %v1819_v15 }
 0x1d1   :  { %v1584_v61 = vsel %vm1576_vm2, %v1567_v50, %v1568_v54  ;;  %v1569_v10 = vrot.slane %v1484_v27, 1 }
 0x1d2   :  { %v1696_v11 = vadd.f32 %v1584_v61, %v7255_v6  ;;  %v1581_v31 = vsel %vm1576_vm2, %v1570_v48, %v1571_v43  ;;  %4762 = vmatmul.mubr.msk.bf16.gmra.mrb[112].mxu1 %vm322_vm0, %v6151_v60  ;;  %4830 = vmatmul.mubr.msk.bf16.gmra.mrb[176].mxu0 %vm322_vm0, %v6151_v60  ;;  %v6162_v2 = vpack.c.bf16 %v1822_v23, %v1821_v14 }
 0x1d3   :  { %v1699_v40 = vadd.f32 %v1581_v31, %v5728_v29  ;;  %v1582_v50 = vsel %vm1576_vm2, %v1569_v10, %v1570_v48  ;;  %v1583_v36 = vsel %vm1576_vm2, %v1568_v54, %v1569_v10  ;;  %v1823_v29 = vmul.f32 %v5783_v34, %v1759_v26  ;;  %v7257_v10 = vld [vmem:[#allocation20_spill] sm:$0xff] }
 0x1d4   :  { %v1760_v55 = vmax.f32 %v1696_v11, 0.0  ;;  %v1697_v21 = vadd.f32 %v1583_v36, %v7256_v19  ;;  %v1698_v52 = vadd.f32 %v1582_v50, %v5726_v42  ;;  %4765 = vmatprep.mubr.msk.bf16.mxu1 %vm322_vm0, %v6162_v2  ;;  %4833 = vmatprep.mubr.msk.bf16.mxu0 %vm322_vm0, %v6162_v2  ;;  %v7258_v11 = vrot.slane %v5756_v12, 1  ;;  %v7259_v50 = vld [vmem:[#allocation22_spill] sm:$0xff]  ;;  %v7260_v19 = vld [vmem:[#allocation21_spill] sm:$0xff] }
 0x1d5   :  { %v4707_v35 = vpop.f32.mrb[124].mxu0  ;;  %v1763_v61 = vmax.f32 %v1699_v40, 0.0 }
 0x1d6   :  { %v1824_v51 = vmul.f32 %v5793_v39, %v1760_v55  ;;  %v1761_v30 = vmax.f32 %v1697_v21, 0.0  ;;  %v1762_v15 = vmax.f32 %v1698_v52, 0.0  ;;  %v1497_v45 = vpop.f32.mrb[125].mxu0  ;;  %v1574_v5 = vrot.slane %v4707_v35, 1  ;;  %v7261_v52 = vld [vmem:[#allocation23_spill] sm:$0xff] }
 0x1d7   :  { %v1572_v0 = vrot.slane %v1497_v45, 1  ;;  %v4708_v37 = vpop.f32.mrb[126].mxu0 }
 0x1d8   :  { %v1825_v48 = vmul.f32 %v5775_v17, %v1761_v30  ;;  %v1826_v42 = vmul.f32 %v5778_v47, %v1762_v15  ;;  %v1575_v54 = vrot.slane %v4708_v37, 1  ;;  %v1500_v22 = vpop.f32.mrb[127].mxu0  ;;  %v6179_v14 = vpack.c.bf16 %v1824_v51, %v1823_v29 }
 0x1d9   :  { %v1580_v23 = vsel %vm1576_vm2, %v1571_v43, %v1572_v0  ;;  %v1573_v27 = vrot.slane %v1500_v22, 1  ;;  %v1827_v15 = vmul.f32 %v5783_v34, %v1763_v61 }
 0x1da   :  { %v1700_v26 = vadd.f32 %v1580_v23, %v7257_v10  ;;  %v1577_v6 = vsel %vm1576_vm2, %v1574_v5, %v1575_v54  ;;  %v1640_v31 = vsel %vm1576_vm2, %v1575_v54, %v7258_v11  ;;  %4766 = vmatmul.mubr.msk.bf16.gmra.mrb[116].mxu1 %vm322_vm0, %v6179_v14  ;;  %4834 = vmatmul.mubr.msk.bf16.gmra.mrb[180].mxu0 %vm322_vm0, %v6179_v14 }
 0x1db   :  { %v1703_v43 = vadd.f32 %v1577_v6, %v5754_v3  ;;  %v1704_v40 = vadd.f32 %v1640_v31, %v7259_v50  ;;  %v1578_v36 = vsel %vm1576_vm2, %v1573_v27, %v1574_v5  ;;  %v1579_v55 = vsel %vm1576_vm2, %v1572_v0, %v1573_v27  ;;  %v7262_v27 = vld [vmem:[#allocation24_spill] sm:$0xff] }
 0x1dc   :  { %v1764_v12 = vmax.f32 %v1700_v26, 0.0  ;;  %v1701_v21 = vadd.f32 %v1579_v55, %v7260_v19  ;;  %v1702_v35 = vadd.f32 %v1578_v36, %v7261_v52  ;;  %v6202_v29 = vpack.c.bf16 %v1826_v42, %v1825_v48 }
 0x1dd   :  { %v1767_v51 = vmax.f32 %v1703_v43, 0.0  ;;  %v1768_v30 = vmax.f32 %v1704_v40, 0.0 }
 0x1de   :  { %v1828_v3 = vmul.f32 %v5793_v39, %v1764_v12  ;;  %v1765_v45 = vmax.f32 %v1701_v21, 0.0  ;;  %v1766_v37 = vmax.f32 %v1702_v35, 0.0  ;;  %4769 = vmatprep.mubr.msk.bf16.mxu1 %vm322_vm0, %v6202_v29  ;;  %4837 = vmatprep.mubr.msk.bf16.mxu0 %vm322_vm0, %v6202_v29 }
 0x1df   :  { %v1831_v5 = vmul.f32 %v5783_v34, %v1767_v51  ;;  %v1832_v0 = vmul.f32 %v5793_v39, %v1768_v30 }
 0x1e0   :  { %v1829_v48 = vmul.f32 %v5775_v17, %v1765_v45  ;;  %v1830_v42 = vmul.f32 %v5778_v47, %v1766_v37  ;;  %v6214_v54 = vpack.c.bf16 %v1828_v3, %v1827_v15 }
 0x1e1   :  { %v6216_v22 = vpack.c.bf16 %v1832_v0, %v1831_v5 }
 0x1e2   :  { %4770 = vmatmul.mubr.msk.bf16.gmra.mrb[120].mxu1 %vm322_vm0, %v6214_v54  ;;  %4838 = vmatmul.mubr.msk.bf16.gmra.mrb[184].mxu0 %vm322_vm0, %v6214_v54  ;;  %v6222_v23 = vpack.c.bf16 %v1830_v42, %v1829_v48 }
 0x1e4   :  { %4773 = vmatprep.mubr.msk.bf16.mxu1 %vm322_vm0, %v6222_v23  ;;  %4841 = vmatprep.mubr.msk.bf16.mxu0 %vm322_vm0, %v6222_v23 }
 0x1ea   :  { %4774 = vmatmul.mubr.msk.bf16.gmra.mrb[124].mxu1 %vm322_vm0, %v6216_v22  ;;  %4842 = vmatmul.mubr.msk.bf16.gmra.mrb[188].mxu0 %vm322_vm0, %v6216_v22 }
 0x1eb   :  { %4849 = vmatprep.mubr.msk.bf16.mxu1 %vm322_vm0, %v7262_v27  ;;  %4917 = vmatprep.mubr.msk.bf16.mxu0 %vm4990_vm12, %v7237_v58 }
 0x1f2   :  { %4850 = vmatmul.mubr.msk.bf16.vlgmr.msra.gmra.mrb[128].mxu1 %vm322_vm0, %v5808_v18 }
 0x1f3   :  { %4853 = vmatprep.mubr.msk.bf16.mxu1 %vm322_vm0, %v5824_v24 }
 0x1fa   :  { %4854 = vmatmul.mubr.msk.bf16.gmra.mrb[132].mxu1 %vm322_vm0, %v5842_v59 }
 0x1fb   :  { %4857 = vmatprep.mubr.msk.bf16.mxu1 %vm322_vm0, %v5854_v20 }
 0x202   :  { %4858 = vmatmul.mubr.msk.bf16.gmra.mrb[136].mxu1 %vm322_vm0, %v5871_v44  ;;  %v6285_v44 = vld [vmem:[%s7202_s4] ss:$0 sm:$0xff] }
 0x203   :  { %4861 = vmatprep.mubr.msk.bf16.mxu1 %vm322_vm0, %v5882_v63 }
 0x20a   :  { %4862 = vmatmul.mubr.msk.bf16.gmra.mrb[140].mxu1 %vm322_vm0, %v5899_v16 }
 0x20b   :  { %4865 = vmatprep.mubr.msk.bf16.mxu1 %vm322_vm0, %v5910_v7 }
 0x212   :  { %4866 = vmatmul.mubr.msk.bf16.gmra.mrb[144].mxu1 %vm322_vm0, %v5927_v9 }
 0x213   :  { %4869 = vmatprep.mubr.msk.bf16.mxu1 %vm322_vm0, %v5938_v49 }
 0x21a   :  { %4870 = vmatmul.mubr.msk.bf16.gmra.mrb[148].mxu1 %vm322_vm0, %v5955_v1 }
 0x21b   :  { %4873 = vmatprep.mubr.msk.bf16.mxu1 %vm322_vm0, %v5966_v13 }
 0x222   :  { %4874 = vmatmul.mubr.msk.bf16.gmra.mrb[152].mxu1 %vm322_vm0, %v5983_v57 }
 0x223   :  { %4877 = vmatprep.mubr.msk.bf16.mxu1 %vm322_vm0, %v5994_v4 }
 0x22a   :  { %4878 = vmatmul.mubr.msk.bf16.gmra.mrb[156].mxu1 %vm322_vm0, %v6011_v38 }
 0x22b   :  { %4881 = vmatprep.mubr.msk.bf16.mxu1 %vm322_vm0, %v6022_v28 }
 0x232   :  { %4882 = vmatmul.mubr.msk.bf16.gmra.mrb[160].mxu1 %vm322_vm0, %v6039_v25 }
 0x233   :  { %4885 = vmatprep.mubr.msk.bf16.mxu1 %vm322_vm0, %v6050_v53 }
 0x23a   :  { %4886 = vmatmul.mubr.msk.bf16.gmra.mrb[164].mxu1 %vm322_vm0, %v6067_v56 }
 0x23b   :  { %4889 = vmatprep.mubr.msk.bf16.mxu1 %vm322_vm0, %v6078_v32 }
 0x242   :  { %4890 = vmatmul.mubr.msk.bf16.gmra.mrb[168].mxu1 %vm322_vm0, %v6095_v62 }
 0x243   :  { %4893 = vmatprep.mubr.msk.bf16.mxu1 %vm322_vm0, %v6106_v33 }
 0x245   :  { %v4715_v18 = vpop.f32.mrb[64].mxu1  ;;  %v4783_v24 = vpop.f32.mrb[128].mxu0 }
 0x246   :  { %v6278_v59 = vpop.f32.mrb[65].mxu1  ;;  %v6280_v20 = vpop.f32.mrb[129].mxu0  ;;  %v2581_v7 = vrot.slane %v4783_v24, 7  ;;  %v2028_v28 = vadd.f32 %v4715_v18, %v6285_v44 }
 0x247   :  { %v4716_v63 = vpop.f32.mrb[66].mxu1  ;;  %v4784_v16 = vpop.f32.mrb[130].mxu0  ;;  %v7213_v57 = vrot.slane %v6280_v20, 7 }
 0x248   :  { %v2031_v9 = vadd.f32 %v4716_v63, %v6285_v44  ;;  %v2582_v49 = vrot.slane %v4784_v16, 7  ;;  %v2022_v1 = vpop.f32.mrb[67].mxu1  ;;  %v2327_v13 = vpop.f32.mrb[131].mxu0 }
 0x249   :  { %v2023_v4 = vadd.f32 %v6285_v44, %v2022_v1  ;;  %v2580_v38 = vrot.slane %v2327_v13, 7 }
 0x24a   :  { %v2703_v25 = vsel %vm1077_vm1, %v2581_v7, %v2582_v49  ;;  %4894 = vmatmul.mubr.msk.bf16.gmra.mrb[172].mxu1 %vm322_vm0, %v6123_v46 }
 0x24b   :  { %v6295_v53 = vadd.f32 %v2703_v25, %v2031_v9  ;;  %v2704_v56 = vsel %vm1077_vm1, %v2580_v38, %v2581_v7  ;;  %v2705_v32 = vsel %vm1077_vm1, %v7213_v57, %v2580_v38  ;;  %4897 = vmatprep.mubr.msk.bf16.mxu1 %vm322_vm0, %v6134_v8 }
 0x24c   :  { %v6305_v62 = vadd.f32 %v2705_v32, %v2023_v4  ;;  %v6307_v33 = vadd.f32 %v2704_v56, %v2028_v28 }
 0x24d   :  { %v4719_v61 = vpop.f32.mrb[68].mxu1  ;;  %v4787_v10 = vpop.f32.mrb[132].mxu0 }
 0x24e   :  { %v2035_v46 = vpop.f32.mrb[69].mxu1  ;;  %v2340_v26 = vpop.f32.mrb[133].mxu0  ;;  %v2585_v50 = vrot.slane %v4787_v10, 7  ;;  %v2044_v52 = vadd.f32 %v4719_v61, %v6285_v44 }
 0x24f   :  { %v2036_v6 = vadd.f32 %v6285_v44, %v2035_v46  ;;  %v2583_v11 = vrot.slane %v2340_v26, 7  ;;  %v4720_v31 = vpop.f32.mrb[70].mxu1  ;;  %v4788_v43 = vpop.f32.mrb[134].mxu0 }
 0x250   :  { %v2047_v40 = vadd.f32 %v4720_v31, %v6285_v44  ;;  %v2586_v36 = vrot.slane %v4788_v43, 7  ;;  %v2038_v55 = vpop.f32.mrb[71].mxu1  ;;  %v2343_v12 = vpop.f32.mrb[135].mxu0 }
 0x251   :  { %v2702_v8 = vsel %vm1077_vm1, %v2582_v49, %v2583_v11  ;;  %v2039_v19 = vadd.f32 %v6285_v44, %v2038_v55  ;;  %v2584_v21 = vrot.slane %v2343_v12, 7 }
 0x252   :  { %v6315_v35 = vadd.f32 %v2702_v8, %v2036_v6  ;;  %v2699_v51 = vsel %vm1077_vm1, %v2585_v50, %v2586_v36  ;;  %4898 = vmatmul.mubr.msk.bf16.gmra.mrb[176].mxu1 %vm322_vm0, %v6151_v60 }
 0x253   :  { %v6321_v30 = vadd.f32 %v2699_v51, %v2047_v40  ;;  %v2700_v15 = vsel %vm1077_vm1, %v2584_v21, %v2585_v50  ;;  %v2701_v3 = vsel %vm1077_vm1, %v2583_v11, %v2584_v21  ;;  %4901 = vmatprep.mubr.msk.bf16.mxu1 %vm322_vm0, %v6162_v2 }
 0x254   :  { %v6329_v45 = vadd.f32 %v2701_v3, %v2039_v19  ;;  %v6331_v37 = vadd.f32 %v2700_v15, %v2044_v52 }
 0x255   :  { %v4723_v5 = vpop.f32.mrb[72].mxu1  ;;  %v4791_v0 = vpop.f32.mrb[136].mxu0 }
 0x256   :  { %v2051_v48 = vpop.f32.mrb[73].mxu1  ;;  %v2356_v42 = vpop.f32.mrb[137].mxu0  ;;  %v2589_v63 = vrot.slane %v4791_v0, 7  ;;  %v2060_v4 = vadd.f32 %v4723_v5, %v6285_v44 }
 0x257   :  { %v2052_v60 = vadd.f32 %v6285_v44, %v2051_v48  ;;  %v2587_v27 = vrot.slane %v2356_v42, 7  ;;  %v4724_v18 = vpop.f32.mrb[74].mxu1  ;;  %v4792_v24 = vpop.f32.mrb[138].mxu0 }
 0x258   :  { %v2063_v16 = vadd.f32 %v4724_v18, %v6285_v44  ;;  %v2590_v7 = vrot.slane %v4792_v24, 7  ;;  %v2054_v9 = vpop.f32.mrb[75].mxu1  ;;  %v2359_v49 = vpop.f32.mrb[139].mxu0 }
 0x259   :  { %v2698_v2 = vsel %vm1077_vm1, %v2586_v36, %v2587_v27  ;;  %v2055_v1 = vadd.f32 %v6285_v44, %v2054_v9  ;;  %v2588_v13 = vrot.slane %v2359_v49, 7 }
 0x25a   :  { %v6339_v38 = vadd.f32 %v2698_v2, %v2052_v60  ;;  %v2695_v28 = vsel %vm1077_vm1, %v2589_v63, %v2590_v7  ;;  %4902 = vmatmul.mubr.msk.bf16.gmra.mrb[180].mxu1 %vm322_vm0, %v6179_v14 }
 0x25b   :  { %v6345_v25 = vadd.f32 %v2695_v28, %v2063_v16  ;;  %v2696_v56 = vsel %vm1077_vm1, %v2588_v13, %v2589_v63  ;;  %v2697_v32 = vsel %vm1077_vm1, %v2587_v27, %v2588_v13  ;;  %4905 = vmatprep.mubr.msk.bf16.mxu1 %vm322_vm0, %v6202_v29 }
 0x25c   :  { %v6353_v61 = vadd.f32 %v2697_v32, %v2055_v1  ;;  %v6355_v10 = vadd.f32 %v2696_v56, %v2060_v4 }
 0x25d   :  { %v4727_v46 = vpop.f32.mrb[76].mxu1  ;;  %v4795_v26 = vpop.f32.mrb[140].mxu0 }
 0x25e   :  { %v2067_v6 = vpop.f32.mrb[77].mxu1  ;;  %v2372_v11 = vpop.f32.mrb[141].mxu0  ;;  %v2593_v40 = vrot.slane %v4795_v26, 7  ;;  %v2076_v52 = vadd.f32 %v4727_v46, %v6285_v44 }
 0x25f   :  { %v2068_v14 = vadd.f32 %v6285_v44, %v2067_v6  ;;  %v2591_v31 = vrot.slane %v2372_v11, 7  ;;  %v4728_v43 = vpop.f32.mrb[78].mxu1  ;;  %v4796_v50 = vpop.f32.mrb[142].mxu0 }
 0x260   :  { %v2079_v36 = vadd.f32 %v4728_v43, %v6285_v44  ;;  %v2594_v55 = vrot.slane %v4796_v50, 7  ;;  %v2070_v12 = vpop.f32.mrb[79].mxu1  ;;  %v2375_v8 = vpop.f32.mrb[143].mxu0 }
 0x261   :  { %v2694_v29 = vsel %vm1077_vm1, %v2590_v7, %v2591_v31  ;;  %v2071_v19 = vadd.f32 %v6285_v44, %v2070_v12  ;;  %v2592_v21 = vrot.slane %v2375_v8, 7 }
 0x262   :  { %v6363_v51 = vadd.f32 %v2694_v29, %v2068_v14  ;;  %v2691_v15 = vsel %vm1077_vm1, %v2593_v40, %v2594_v55  ;;  %4906 = vmatmul.mubr.msk.bf16.gmra.mrb[184].mxu1 %vm322_vm0, %v6214_v54 }
 0x263   :  { %v6369_v3 = vadd.f32 %v2691_v15, %v2079_v36  ;;  %v2692_v5 = vsel %vm1077_vm1, %v2592_v21, %v2593_v40  ;;  %v2693_v0 = vsel %vm1077_vm1, %v2591_v31, %v2592_v21  ;;  %4909 = vmatprep.mubr.msk.bf16.mxu1 %vm322_vm0, %v6222_v23 }
 0x264   :  { %v6377_v48 = vadd.f32 %v2693_v0, %v2071_v19  ;;  %v6379_v42 = vadd.f32 %v2692_v5, %v2076_v52 }
 0x265   :  { %v4731_v60 = vpop.f32.mrb[80].mxu1  ;;  %v4799_v27 = vpop.f32.mrb[144].mxu0 }
 0x266   :  { %v2083_v18 = vpop.f32.mrb[81].mxu1  ;;  %v2388_v24 = vpop.f32.mrb[145].mxu0  ;;  %v2597_v9 = vrot.slane %v4799_v27, 7  ;;  %v2092_v56 = vadd.f32 %v4731_v60, %v6285_v44 }
 0x267   :  { %v2084_v54 = vadd.f32 %v6285_v44, %v2083_v18  ;;  %v2595_v63 = vrot.slane %v2388_v24, 7  ;;  %v4732_v16 = vpop.f32.mrb[82].mxu1  ;;  %v4800_v7 = vpop.f32.mrb[146].mxu0 }
 0x268   :  { %v2095_v49 = vadd.f32 %v4732_v16, %v6285_v44  ;;  %v2598_v2 = vrot.slane %v4800_v7, 7  ;;  %v2086_v1 = vpop.f32.mrb[83].mxu1  ;;  %v2391_v13 = vpop.f32.mrb[147].mxu0 }
 0x269   :  { %v2690_v23 = vsel %vm1077_vm1, %v2594_v55, %v2595_v63  ;;  %v2087_v4 = vadd.f32 %v6285_v44, %v2086_v1  ;;  %v2596_v28 = vrot.slane %v2391_v13, 7 }
 0x26a   :  { %v6387_v32 = vadd.f32 %v2690_v23, %v2084_v54  ;;  %v2687_v46 = vsel %vm1077_vm1, %v2597_v9, %v2598_v2  ;;  %4910 = vmatmul.mubr.msk.bf16.gmra.mrb[188].mxu1 %vm322_vm0, %v6216_v22 }
 0x26b   :  { %v6393_v26 = vadd.f32 %v2687_v46, %v2095_v49  ;;  %v2688_v6 = vsel %vm1077_vm1, %v2596_v28, %v2597_v9  ;;  %v2689_v11 = vsel %vm1077_vm1, %v2595_v63, %v2596_v28  ;;  %4925 = vmatprep.mubr.msk.bf16.mxu1 %vm4990_vm12, %v7237_v58 }
 0x26c   :  { %v6399_v14 = vadd.f32 %v2689_v11, %v2087_v4  ;;  %v6401_v31 = vadd.f32 %v2688_v6, %v2092_v56 }
 0x26d   :  { %v4735_v43 = vpop.f32.mrb[84].mxu1  ;;  %v4803_v50 = vpop.f32.mrb[148].mxu0 }
 0x26e   :  { %v2099_v40 = vpop.f32.mrb[85].mxu1  ;;  %v2404_v36 = vpop.f32.mrb[149].mxu0  ;;  %v2601_v29 = vrot.slane %v4803_v50, 7  ;;  %v2108_v27 = vadd.f32 %v4735_v43, %v6285_v44 }
 0x26f   :  { %v2100_v55 = vadd.f32 %v6285_v44, %v2099_v40  ;;  %v2599_v12 = vrot.slane %v2404_v36, 7  ;;  %v4736_v22 = vpop.f32.mrb[86].mxu1  ;;  %v4804_v8 = vpop.f32.mrb[150].mxu0 }
 0x270   :  { %v2111_v19 = vadd.f32 %v4736_v22, %v6285_v44  ;;  %v2602_v21 = vrot.slane %v4804_v8, 7  ;;  %v2102_v52 = vpop.f32.mrb[87].mxu1  ;;  %v2407_v15 = vpop.f32.mrb[151].mxu0 }
 0x271   :  { %v2686_v5 = vsel %vm1077_vm1, %v2598_v2, %v2599_v12  ;;  %v2103_v0 = vadd.f32 %v6285_v44, %v2102_v52  ;;  %v2600_v60 = vrot.slane %v2407_v15, 7 }
 0x272   :  { %v6409_v18 = vadd.f32 %v2686_v5, %v2100_v55  ;;  %v2683_v24 = vsel %vm1077_vm1, %v2601_v29, %v2602_v21 }
 0x273   :  { %v6413_v54 = vadd.f32 %v2683_v24, %v2111_v19  ;;  %v2684_v63 = vsel %vm1077_vm1, %v2600_v60, %v2601_v29  ;;  %v2685_v16 = vsel %vm1077_vm1, %v2599_v12, %v2600_v60 }
 0x274   :  { %v6419_v7 = vadd.f32 %v2685_v16, %v2103_v0  ;;  %v6421_v9 = vadd.f32 %v2684_v63, %v2108_v27 }
 0x275   :  { %v4739_v49 = vpop.f32.mrb[88].mxu1  ;;  %v4807_v2 = vpop.f32.mrb[152].mxu0 }
 0x276   :  { %v2115_v1 = vpop.f32.mrb[89].mxu1  ;;  %v2420_v13 = vpop.f32.mrb[153].mxu0  ;;  %v2605_v46 = vrot.slane %v4807_v2, 7  ;;  %v2124_v12 = vadd.f32 %v4739_v49, %v6285_v44 }
 0x277   :  { %v2116_v23 = vadd.f32 %v6285_v44, %v2115_v1  ;;  %v2603_v4 = vrot.slane %v2420_v13, 7  ;;  %v4740_v28 = vpop.f32.mrb[90].mxu1  ;;  %v4808_v56 = vpop.f32.mrb[154].mxu0 }
 0x278   :  { %v2127_v6 = vadd.f32 %v4740_v28, %v6285_v44  ;;  %v2606_v11 = vrot.slane %v4808_v56, 7  ;;  %v2118_v43 = vpop.f32.mrb[91].mxu1  ;;  %v2423_v50 = vpop.f32.mrb[155].mxu0 }
 0x279   :  { %v2682_v40 = vsel %vm1077_vm1, %v2602_v21, %v2603_v4  ;;  %v2119_v36 = vadd.f32 %v6285_v44, %v2118_v43  ;;  %v2604_v55 = vrot.slane %v2423_v50, 7 }
 0x27a   :  { %v6429_v22 = vadd.f32 %v2682_v40, %v2116_v23  ;;  %v2679_v8 = vsel %vm1077_vm1, %v2605_v46, %v2606_v11 }
 0x27b   :  { %v6433_v29 = vadd.f32 %v2679_v8, %v2127_v6  ;;  %v2680_v19 = vsel %vm1077_vm1, %v2604_v55, %v2605_v46  ;;  %v2681_v52 = vsel %vm1077_vm1, %v2603_v4, %v2604_v55  ;;  %v4983_v8 = vld [vmem:[%s7203_s5 + $0x10] sm:$0xff]  }
 0x27c   :  { %v6439_v15 = vadd.f32 %v2681_v52, %v2119_v36  ;;  %v6441_v21 = vadd.f32 %v2680_v19, %v2124_v12  ;;  %4914 = vmatpush3.bf16.msra.mxu0 %v4983_v8 }
 0x27d   :  { %v4743_v5 = vpop.f32.mrb[92].mxu1  ;;  %v4811_v0 = vpop.f32.mrb[156].mxu0  ;;  %4915 = vmatprep.subr.bf16.mxu0 %v7237_v58 }
 0x27e   :  { %v2131_v60 = vpop.f32.mrb[93].mxu1  ;;  %v2436_v27 = vpop.f32.mrb[157].mxu0  ;;  %v2609_v2 = vrot.slane %v4811_v0, 7  ;;  %v2140_v6 = vadd.f32 %v4743_v5, %v6285_v44 }
 0x27f   :  { %v2132_v24 = vadd.f32 %v6285_v44, %v2131_v60  ;;  %v2607_v63 = vrot.slane %v2436_v27, 7  ;;  %v4744_v16 = vpop.f32.mrb[94].mxu1  ;;  %v4812_v49 = vpop.f32.mrb[158].mxu0  ;;  %v4984_v60 = vld [vmem:[%s7203_s5] sm:$0xff]  }
 0x280   :  { %v2143_v1 = vadd.f32 %v4744_v16, %v6285_v44  ;;  %v2610_v13 = vrot.slane %v4812_v49, 7  ;;  %v2134_v23 = vpop.f32.mrb[95].mxu1  ;;  %v2439_v28 = vpop.f32.mrb[159].mxu0  ;;  %4922 = vmatpush3.bf16.msra.mxu1 %v4984_v60 }
 0x281   :  { %v2678_v4 = vsel %vm1077_vm1, %v2606_v11, %v2607_v63  ;;  %v2135_v56 = vadd.f32 %v6285_v44, %v2134_v23  ;;  %v2608_v46 = vrot.slane %v2439_v28, 7  ;;  %4923 = vmatprep.subr.bf16.mxu1 %v7237_v58 }
 0x282   :  { %v6449_v43 = vadd.f32 %v2678_v4, %v2132_v24  ;;  %v2675_v50 = vsel %vm1077_vm1, %v2609_v2, %v2610_v13 }
 0x283   :  { %v6453_v40 = vadd.f32 %v2675_v50, %v2143_v1  ;;  %v2676_v36 = vsel %vm1077_vm1, %v2608_v46, %v2609_v2  ;;  %v2677_v55 = vsel %vm1077_vm1, %v2607_v63, %v2608_v46 }
 0x284   :  { %v6459_v12 = vadd.f32 %v2677_v55, %v2135_v56  ;;  %v6461_v11 = vadd.f32 %v2676_v36, %v2140_v6 }
 0x285   :  { %v4747_v19 = vpop.f32.mrb[96].mxu1  ;;  %v4815_v52 = vpop.f32.mrb[160].mxu0 }
 0x286   :  { %v2147_v5 = vpop.f32.mrb[97].mxu1  ;;  %v2452_v0 = vpop.f32.mrb[161].mxu0  ;;  %v2613_v49 = vrot.slane %v4815_v52, 7  ;;  %v2156_v6 = vadd.f32 %v4747_v19, %v6285_v44 }
 0x287   :  { %v2148_v27 = vadd.f32 %v6285_v44, %v2147_v5  ;;  %v2611_v24 = vrot.slane %v2452_v0, 7  ;;  %v4748_v63 = vpop.f32.mrb[98].mxu1  ;;  %v4816_v16 = vpop.f32.mrb[162].mxu0 }
 0x288   :  { %v2159_v2 = vadd.f32 %v4748_v63, %v6285_v44  ;;  %v2614_v1 = vrot.slane %v4816_v16, 7  ;;  %v2150_v23 = vpop.f32.mrb[99].mxu1  ;;  %v2455_v28 = vpop.f32.mrb[163].mxu0 }
 0x289   :  { %v2674_v4 = vsel %vm1077_vm1, %v2610_v13, %v2611_v24  ;;  %v2151_v56 = vadd.f32 %v6285_v44, %v2150_v23  ;;  %v2612_v46 = vrot.slane %v2455_v28, 7 }
 0x28a   :  { %v6477_v50 = vadd.f32 %v2674_v4, %v2148_v27  ;;  %v2671_v36 = vsel %vm1077_vm1, %v2613_v49, %v2614_v1 }
 0x28b   :  { %v6481_v55 = vadd.f32 %v2671_v36, %v2159_v2  ;;  %v2672_v8 = vsel %vm1077_vm1, %v2612_v46, %v2613_v49  ;;  %v2673_v13 = vsel %vm1077_vm1, %v2611_v24, %v2612_v46 }
 0x28c   :  { %v6487_v52 = vadd.f32 %v2673_v13, %v2151_v56  ;;  %v6489_v5 = vadd.f32 %v2672_v8, %v2156_v6 }
 0x28d   :  { %7263 = vst [vmem:[#allocation2_spill] sm:$0xff] %v6481_v55  ;;  %v4751_v0 = vpop.f32.mrb[100].mxu1  ;;  %v4819_v60 = vpop.f32.mrb[164].mxu0 }
 0x28e   :  { %7264 = vst [vmem:[#allocation6_spill] sm:$0xff] %v6487_v52  ;;  %v2163_v19 = vpop.f32.mrb[101].mxu1  ;;  %v2468_v27 = vpop.f32.mrb[165].mxu0  ;;  %v2617_v28 = vrot.slane %v4819_v60, 7  ;;  %v2172_v6 = vadd.f32 %v4751_v0, %v6285_v44 }
 0x28f   :  { %v2164_v63 = vadd.f32 %v6285_v44, %v2163_v19  ;;  %v2615_v16 = vrot.slane %v2468_v27, 7  ;;  %v4752_v23 = vpop.f32.mrb[102].mxu1  ;;  %v4820_v2 = vpop.f32.mrb[166].mxu0 }
 0x290   :  { %v2175_v4 = vadd.f32 %v4752_v23, %v6285_v44  ;;  %v2618_v49 = vrot.slane %v4820_v2, 7  ;;  %v2166_v36 = vpop.f32.mrb[103].mxu1  ;;  %v2471_v57 = vpop.f32.mrb[167].mxu0 }
 0x291   :  { %v2670_v24 = vsel %vm1077_vm1, %v2614_v1, %v2615_v16  ;;  %v2167_v56 = vadd.f32 %v6285_v44, %v2166_v36  ;;  %v2616_v46 = vrot.slane %v2471_v57, 7 }
 0x292   :  { %v6497_v8 = vadd.f32 %v2670_v24, %v2164_v63  ;;  %v2667_v13 = vsel %vm1077_vm1, %v2617_v28, %v2618_v49 }
 0x293   :  { %v6501_v19 = vadd.f32 %v2667_v13, %v2175_v4  ;;  %v2668_v60 = vsel %vm1077_vm1, %v2616_v46, %v2617_v28  ;;  %v2669_v27 = vsel %vm1077_vm1, %v2615_v16, %v2616_v46 }
 0x294   :  { %7265 = vst [vmem:[#allocation3_spill] sm:$0xff] %v6497_v8  ;;  %v6507_v23 = vadd.f32 %v2669_v27, %v2167_v56  ;;  %v6509_v1 = vadd.f32 %v2668_v60, %v2172_v6 }
 0x295   :  { %7266 = vst [vmem:[#allocation5_spill] sm:$0xff] %v6501_v19  ;;  %v4755_v57 = vpop.f32.mrb[104].mxu1  ;;  %v4823_v2 = vpop.f32.mrb[168].mxu0 }
 0x296   :  { %7267 = vst [vmem:[#allocation4_spill] sm:$0xff] %v6507_v23  ;;  %7268 = vst [vmem:[#allocation10_spill] sm:$0xff] %v6509_v1  ;;  %v2179_v0 = vpop.f32.mrb[105].mxu1  ;;  %v2484_v63 = vpop.f32.mrb[169].mxu0  ;;  %v2621_v13 = vrot.slane %v4823_v2, 7  ;;  %v2188_v6 = vadd.f32 %v4755_v57, %v6285_v44 }
 0x297   :  { %v2180_v36 = vadd.f32 %v6285_v44, %v2179_v0  ;;  %v2619_v24 = vrot.slane %v2484_v63, 7  ;;  %v4756_v8 = vpop.f32.mrb[106].mxu1  ;;  %v4824_v4 = vpop.f32.mrb[170].mxu0 }
 0x298   :  { %v2191_v19 = vadd.f32 %v4756_v8, %v6285_v44  ;;  %v2622_v28 = vrot.slane %v4824_v4, 7  ;;  %v2182_v55 = vpop.f32.mrb[107].mxu1  ;;  %v2487_v52 = vpop.f32.mrb[171].mxu0 }
 0x299   :  { %v2666_v16 = vsel %vm1077_vm1, %v2618_v49, %v2619_v24  ;;  %v2183_v56 = vadd.f32 %v6285_v44, %v2182_v55  ;;  %v2620_v46 = vrot.slane %v2487_v52, 7 }
 0x29a   :  { %v6517_v60 = vadd.f32 %v2666_v16, %v2180_v36  ;;  %v2663_v27 = vsel %vm1077_vm1, %v2621_v13, %v2622_v28 }
 0x29b   :  { %v6521_v0 = vadd.f32 %v2663_v27, %v2191_v19  ;;  %v2664_v8 = vsel %vm1077_vm1, %v2620_v46, %v2621_v13  ;;  %v2665_v2 = vsel %vm1077_vm1, %v2619_v24, %v2620_v46 }
 0x29c   :  { %7269 = vst [vmem:[#allocation7_spill] sm:$0xff] %v6517_v60  ;;  %v6527_v63 = vadd.f32 %v2665_v2, %v2183_v56  ;;  %v6529_v49 = vadd.f32 %v2664_v8, %v2188_v6 }
 0x29d   :  { %7270 = vst [vmem:[#allocation9_spill] sm:$0xff] %v6521_v0  ;;  %v4759_v55 = vpop.f32.mrb[108].mxu1  ;;  %v4827_v52 = vpop.f32.mrb[172].mxu0 }
 0x29e   :  { %7271 = vst [vmem:[#allocation8_spill] sm:$0xff] %v6527_v63  ;;  %7272 = vst [vmem:[#allocation14_spill] sm:$0xff] %v6529_v49  ;;  %v2195_v57 = vpop.f32.mrb[109].mxu1  ;;  %v2500_v36 = vpop.f32.mrb[173].mxu0  ;;  %v2625_v27 = vrot.slane %v4827_v52, 7  ;;  %v2204_v6 = vadd.f32 %v4759_v55, %v6285_v44 }
 0x29f   :  { %v2196_v4 = vadd.f32 %v6285_v44, %v2195_v57  ;;  %v2623_v16 = vrot.slane %v2500_v36, 7  ;;  %v4760_v60 = vpop.f32.mrb[110].mxu1  ;;  %v4828_v19 = vpop.f32.mrb[174].mxu0 }
 0x2a0   :  { %v2207_v0 = vadd.f32 %v4760_v60, %v6285_v44  ;;  %v2626_v13 = vrot.slane %v4828_v19, 7  ;;  %v2198_v23 = vpop.f32.mrb[111].mxu1  ;;  %v2503_v1 = vpop.f32.mrb[175].mxu0 }
 0x2a1   :  { %v2662_v24 = vsel %vm1077_vm1, %v2622_v28, %v2623_v16  ;;  %v2199_v56 = vadd.f32 %v6285_v44, %v2198_v23  ;;  %v2624_v46 = vrot.slane %v2503_v1, 7 }
 0x2a2   :  { %v6537_v8 = vadd.f32 %v2662_v24, %v2196_v4  ;;  %v2659_v2 = vsel %vm1077_vm1, %v2625_v27, %v2626_v13 }
 0x2a3   :  { %v6541_v57 = vadd.f32 %v2659_v2, %v2207_v0  ;;  %v2660_v60 = vsel %vm1077_vm1, %v2624_v46, %v2625_v27  ;;  %v2661_v52 = vsel %vm1077_vm1, %v2623_v16, %v2624_v46 }
 0x2a4   :  { %7273 = vst [vmem:[#allocation11_spill] sm:$0xff] %v6537_v8  ;;  %v6547_v36 = vadd.f32 %v2661_v52, %v2199_v56  ;;  %v6549_v28 = vadd.f32 %v2660_v60, %v2204_v6 }
 0x2a5   :  { %7274 = vst [vmem:[#allocation13_spill] sm:$0xff] %v6541_v57  ;;  %v4763_v23 = vpop.f32.mrb[112].mxu1  ;;  %v4831_v1 = vpop.f32.mrb[176].mxu0 }
 0x2a6   :  { %7275 = vst [vmem:[#allocation12_spill] sm:$0xff] %v6547_v36  ;;  %7276 = vst [vmem:[#allocation18_spill] sm:$0xff] %v6549_v28  ;;  %v2211_v55 = vpop.f32.mrb[113].mxu1  ;;  %v2516_v4 = vpop.f32.mrb[177].mxu0  ;;  %v2629_v2 = vrot.slane %v4831_v1, 7  ;;  %v2220_v6 = vadd.f32 %v4763_v23, %v6285_v44 }
 0x2a7   :  { %v2212_v19 = vadd.f32 %v6285_v44, %v2211_v55  ;;  %v2627_v24 = vrot.slane %v2516_v4, 7  ;;  %v4764_v8 = vpop.f32.mrb[114].mxu1  ;;  %v4832_v0 = vpop.f32.mrb[178].mxu0 }
 0x2a8   :  { %v2223_v57 = vadd.f32 %v4764_v8, %v6285_v44  ;;  %v2630_v27 = vrot.slane %v4832_v0, 7  ;;  %v2214_v63 = vpop.f32.mrb[115].mxu1  ;;  %v2519_v49 = vpop.f32.mrb[179].mxu0 }
 0x2a9   :  { %v2658_v16 = vsel %vm1077_vm1, %v2626_v13, %v2627_v24  ;;  %v2215_v56 = vadd.f32 %v6285_v44, %v2214_v63  ;;  %v2628_v46 = vrot.slane %v2519_v49, 7 }
 0x2aa   :  { %v6557_v60 = vadd.f32 %v2658_v16, %v2212_v19  ;;  %v2655_v52 = vsel %vm1077_vm1, %v2629_v2, %v2630_v27 }
 0x2ab   :  { %v6561_v55 = vadd.f32 %v2655_v52, %v2223_v57  ;;  %v2656_v8 = vsel %vm1077_vm1, %v2628_v46, %v2629_v2  ;;  %v2657_v1 = vsel %vm1077_vm1, %v2627_v24, %v2628_v46 }
 0x2ac   :  { %7277 = vst [vmem:[#allocation15_spill] sm:$0xff] %v6557_v60  ;;  %v6567_v4 = vadd.f32 %v2657_v1, %v2215_v56  ;;  %v6569_v13 = vadd.f32 %v2656_v8, %v2220_v6 }
 0x2ad   :  { %7278 = vst [vmem:[#allocation17_spill] sm:$0xff] %v6561_v55  ;;  %v4767_v63 = vpop.f32.mrb[116].mxu1  ;;  %v4835_v49 = vpop.f32.mrb[180].mxu0 }
 0x2ae   :  { %7279 = vst [vmem:[#allocation16_spill] sm:$0xff] %v6567_v4  ;;  %7280 = vst [vmem:[#allocation19_spill] sm:$0xff] %v6569_v13  ;;  %v2227_v23 = vpop.f32.mrb[117].mxu1  ;;  %v2532_v19 = vpop.f32.mrb[181].mxu0  ;;  %v2633_v52 = vrot.slane %v4835_v49, 7  ;;  %v2236_v6 = vadd.f32 %v4767_v63, %v6285_v44 }
 0x2af   :  { %v2228_v0 = vadd.f32 %v6285_v44, %v2227_v23  ;;  %v2631_v16 = vrot.slane %v2532_v19, 7  ;;  %v4768_v60 = vpop.f32.mrb[118].mxu1  ;;  %v4836_v57 = vpop.f32.mrb[182].mxu0 }
 0x2b0   :  { %v2239_v55 = vadd.f32 %v4768_v60, %v6285_v44  ;;  %v2634_v2 = vrot.slane %v4836_v57, 7  ;;  %v2230_v36 = vpop.f32.mrb[119].mxu1  ;;  %v2535_v28 = vpop.f32.mrb[183].mxu0 }
 0x2b1   :  { %v2654_v24 = vsel %vm1077_vm1, %v2630_v27, %v2631_v16  ;;  %v2231_v56 = vadd.f32 %v6285_v44, %v2230_v36  ;;  %v2632_v46 = vrot.slane %v2535_v28, 7 }
 0x2b2   :  { %v6577_v8 = vadd.f32 %v2654_v24, %v2228_v0  ;;  %v2651_v1 = vsel %vm1077_vm1, %v2633_v52, %v2634_v2 }
 0x2b3   :  { %v6581_v23 = vadd.f32 %v2651_v1, %v2239_v55  ;;  %v2652_v60 = vsel %vm1077_vm1, %v2632_v46, %v2633_v52  ;;  %v2653_v49 = vsel %vm1077_vm1, %v2631_v16, %v2632_v46 }
 0x2b4   :  { %7281 = vst [vmem:[#allocation20_spill] sm:$0xff] %v6577_v8  ;;  %v6587_v19 = vadd.f32 %v2653_v49, %v2231_v56  ;;  %v6589_v27 = vadd.f32 %v2652_v60, %v2236_v6 }
 0x2b5   :  { %7282 = vst [vmem:[#allocation22_spill] sm:$0xff] %v6581_v23  ;;  %v4771_v36 = vpop.f32.mrb[120].mxu1  ;;  %v4839_v28 = vpop.f32.mrb[184].mxu0 }
 0x2b6   :  { %7283 = vst [vmem:[#allocation21_spill] sm:$0xff] %v6587_v19  ;;  %7284 = vst [vmem:[#allocation23_spill] sm:$0xff] %v6589_v27  ;;  %v2243_v63 = vpop.f32.mrb[121].mxu1  ;;  %v2548_v0 = vpop.f32.mrb[185].mxu0  ;;  %v2637_v1 = vrot.slane %v4839_v28, 7  ;;  %v2252_v6 = vadd.f32 %v4771_v36, %v6285_v44 }
 0x2b7   :  { %v2244_v57 = vadd.f32 %v6285_v44, %v2243_v63  ;;  %v2635_v24 = vrot.slane %v2548_v0, 7  ;;  %v4772_v8 = vpop.f32.mrb[122].mxu1  ;;  %v4840_v55 = vpop.f32.mrb[186].mxu0 }
 0x2b8   :  { %v2255_v23 = vadd.f32 %v4772_v8, %v6285_v44  ;;  %v2638_v52 = vrot.slane %v4840_v55, 7  ;;  %v2246_v4 = vpop.f32.mrb[123].mxu1  ;;  %v2551_v13 = vpop.f32.mrb[187].mxu0 }
 0x2b9   :  { %v2650_v16 = vsel %vm1077_vm1, %v2634_v2, %v2635_v24  ;;  %v2247_v56 = vadd.f32 %v6285_v44, %v2246_v4  ;;  %v2636_v46 = vrot.slane %v2551_v13, 7 }
 0x2ba   :  { %v6597_v60 = vadd.f32 %v2650_v16, %v2244_v57  ;;  %v2647_v49 = vsel %vm1077_vm1, %v2637_v1, %v2638_v52 }
 0x2bb   :  { %v6601_v63 = vadd.f32 %v2647_v49, %v2255_v23  ;;  %v2648_v8 = vsel %vm1077_vm1, %v2636_v46, %v2637_v1  ;;  %v2649_v28 = vsel %vm1077_vm1, %v2635_v24, %v2636_v46  ;;  %v2020_v24 = vadd.f32 %v6285_v44, %v6278_v59 }
 0x2bc   :  { %7285 = vst [vmem:[#allocation24_spill] sm:$0xff] %v6597_v60  ;;  %v6607_v0 = vadd.f32 %v2649_v28, %v2247_v56  ;;  %v6609_v2 = vadd.f32 %v2648_v8, %v2252_v6 }
 0x2bd   :  { %7286 = vst [vmem:[#allocation25_spill] sm:$0xff] %v6601_v63  ;;  %v4775_v4 = vpop.f32.mrb[124].mxu1  ;;  %v4843_v13 = vpop.f32.mrb[188].mxu0 }
 0x2be   :  { %v2259_v36 = vpop.f32.mrb[125].mxu1  ;;  %v2564_v57 = vpop.f32.mrb[189].mxu0  ;;  %v2641_v49 = vrot.slane %v4843_v13, 7  ;;  %v2268_v8 = vadd.f32 %v4775_v4, %v6285_v44 }
 0x2bf   :  { %v2260_v55 = vadd.f32 %v6285_v44, %v2259_v36  ;;  %v2639_v16 = vrot.slane %v2564_v57, 7  ;;  %v4776_v60 = vpop.f32.mrb[126].mxu1  ;;  %v4844_v23 = vpop.f32.mrb[190].mxu0 }
 0x2c0   :  { %v2271_v63 = vadd.f32 %v4776_v60, %v6285_v44  ;;  %v2642_v1 = vrot.slane %v4844_v23, 7  ;;  %v2262_v19 = vpop.f32.mrb[127].mxu1  ;;  %v2567_v27 = vpop.f32.mrb[191].mxu0  ;;  %v7288_v60 = vrot.slane %v6280_v20, 7 }
 0x2c1   :  { %v2646_v56 = vsel %vm1077_vm1, %v2638_v52, %v2639_v16  ;;  %v2263_v46 = vadd.f32 %v6285_v44, %v2262_v19  ;;  %v2640_v6 = vrot.slane %v2567_v27, 7 }
 0x2c2   :  { %v6619_v28 = vadd.f32 %v2646_v56, %v2260_v55  ;;  %v2643_v13 = vsel %vm1077_vm1, %v2641_v49, %v2642_v1  ;;  %v2706_v36 = vsel %vm1077_vm1, %v2642_v1, %v7288_v60 }
 0x2c3   :  { %v2707_v57 = vadd.f32 %v2706_v36, %v2020_v24  ;;  %v6627_v59 = vadd.f32 %v2643_v13, %v2271_v63  ;;  %v2644_v52 = vsel %vm1077_vm1, %v2640_v6, %v2641_v49  ;;  %v2645_v19 = vsel %vm1077_vm1, %v2639_v16, %v2640_v6 }
 0x2c4   :  { %7287 = vst [vmem:[#allocation26_spill] sm:$0xff] %v6619_v28  ;;  %v6633_v44 = vadd.f32 %v2645_v19, %v2263_v46  ;;  %v6635_v27 = vadd.f32 %v2644_v52, %v2268_v8 }
 0x2c5   :  { %7289 = vst [vmem:[#allocation27_spill] sm:$0xff] %v6627_v59  ;;  %v4851_v4 = vpop.f32.mrb[128].mxu1 }
 0x2c6   :  { %7290 = vst [vmem:[#allocation28_spill] sm:$0xff] %v6633_v44  ;;  %v6637_v55 = vpop.f32.mrb[129].mxu1  ;;  %v3079_v23 = vrot.slane %v4851_v4, 1 }
 0x2c7   :  { %v4852_v20 = vpop.f32.mrb[130].mxu1  ;;  %v3077_v63 = vrot.slane %v6637_v55, 1 }
 0x2c8   :  { %v3080_v56 = vrot.slane %v4852_v20, 1  ;;  %v2825_v1 = vpop.f32.mrb[131].mxu1 }
 0x2c9   :  { %v3078_v24 = vrot.slane %v2825_v1, 1 }
 0x2ca   :  { %v3201_v49 = vsel %vm1576_vm2, %v3079_v23, %v3080_v56 }
 0x2cb   :  { %v3207_v13 = vadd.f32 %v3201_v49, %v6307_v33  ;;  %v3202_v16 = vsel %vm1576_vm2, %v3078_v24, %v3079_v23  ;;  %v3203_v46 = vsel %vm1576_vm2, %v3077_v63, %v3078_v24 }
 0x2cc   :  { %v3205_v6 = vadd.f32 %v3203_v46, %v2707_v57  ;;  %v3206_v8 = vadd.f32 %v3202_v16, %v6305_v62 }
 0x2cd   :  { %v3271_v60 = vmax.f32 %v3207_v13, 0.0  ;;  %v4855_v36 = vpop.f32.mrb[132].mxu1 }
 0x2ce   :  { %v3269_v52 = vmax.f32 %v3205_v6, 0.0  ;;  %v3270_v19 = vmax.f32 %v3206_v8, 0.0  ;;  %v2838_v4 = vpop.f32.mrb[133].mxu1  ;;  %v3083_v23 = vrot.slane %v4855_v36, 1 }
 0x2cf   :  { %v3081_v20 = vrot.slane %v2838_v4, 1  ;;  %v4856_v1 = vpop.f32.mrb[134].mxu1  ;;  %v3335_v59 = vmul.f32 %v5783_v34, %v3271_v60 }
 0x2d0   :  { %v3333_v33 = vmul.f32 %v5775_v17, %v3269_v52  ;;  %v3334_v49 = vmul.f32 %v5778_v47, %v3270_v19  ;;  %v3084_v44 = vrot.slane %v4856_v1, 1  ;;  %v2841_v28 = vpop.f32.mrb[135].mxu1 }
 0x2d1   :  { %v3200_v57 = vsel %vm1576_vm2, %v3080_v56, %v3081_v20  ;;  %v3082_v62 = vrot.slane %v2841_v28, 1  ;;  %v3541_v1 = vsel %vm322_vm0, %v3335_v59, -inf }
 0x2d2   :  { %v3397_v24 = vsel %vm322_vm0, %v3333_v33, -inf  ;;  %v3398_v13 = vsel %vm322_vm0, %v3334_v49, -inf  ;;  %v3208_v16 = vadd.f32 %v3200_v57, %v6295_v53  ;;  %v3197_v46 = vsel %vm1576_vm2, %v3083_v23, %v3084_v44 }
 0x2d3   :  { %v3399_v6 = vmax.f32 %v3397_v24, %v3398_v13  ;;  %v3211_v8 = vadd.f32 %v3197_v46, %v6331_v37  ;;  %v3198_v36 = vsel %vm1576_vm2, %v3082_v62, %v3083_v23  ;;  %v3199_v60 = vsel %vm1576_vm2, %v3081_v20, %v3082_v62 }
 0x2d4   :  { %v3272_v56 = vmax.f32 %v3208_v16, 0.0  ;;  %v3209_v28 = vadd.f32 %v3199_v60, %v6315_v35  ;;  %v3210_v52 = vadd.f32 %v3198_v36, %v6329_v45 }
 0x2d5   :  { %v3400_v19 = vrot.slane %v3399_v6, 4  ;;  %v3275_v4 = vmax.f32 %v3211_v8, 0.0  ;;  %v4859_v53 = vpop.f32.mrb[136].mxu1 }
 0x2d6   :  { %v3336_v33 = vmul.f32 %v5793_v39, %v3272_v56  ;;  %v3273_v49 = vmax.f32 %v3209_v28, 0.0  ;;  %v3274_v37 = vmax.f32 %v3210_v52, 0.0  ;;  %v2854_v57 = vpop.f32.mrb[137].mxu1  ;;  %v3087_v13 = vrot.slane %v4859_v53, 1 }
 0x2d7   :  { %v3401_v24 = vmax.f32 %v3399_v6, %v3400_v19  ;;  %v3339_v23 = vmul.f32 %v5783_v34, %v3275_v4  ;;  %v3085_v20 = vrot.slane %v2854_v57, 1  ;;  %v4860_v62 = vpop.f32.mrb[138].mxu1 }
 0x2d8   :  { %v3542_v35 = vsel %vm322_vm0, %v3336_v33, -inf  ;;  %v3337_v45 = vmul.f32 %v5775_v17, %v3273_v49  ;;  %v3338_v16 = vmul.f32 %v5778_v47, %v3274_v37  ;;  %v3088_v46 = vrot.slane %v4860_v62, 1  ;;  %v2857_v8 = vpop.f32.mrb[139].mxu1 }
 0x2d9   :  { %v3402_v59 = vrot.slane %v3401_v24, 2  ;;  %v3543_v36 = vmax.f32 %v3541_v1, %v3542_v35  ;;  %v3196_v60 = vsel %vm1576_vm2, %v3084_v44, %v3085_v20  ;;  %v4985_v1 = vld [vmem:[%s7203_s5 + $0x18] sm:$0xff]   ;;  %v4986_v44 = vld [vmem:[%s7203_s5 + $0x8] sm:$0xff]   ;;  %v3550_v49 = vsel %vm322_vm0, %v3339_v23, -inf }
 0x2da   :  { %v3406_v6 = vsel %vm322_vm0, %v3337_v45, -inf  ;;  %v3407_v56 = vsel %vm322_vm0, %v3338_v16, -inf  ;;  %v3212_v28 = vadd.f32 %v3196_v60, %v6321_v30  ;;  %v3193_v52 = vsel %vm1576_vm2, %v3087_v13, %v3088_v46  ;;  %4916 = vmatpush3.bf16.msra.mxu0 %v4985_v1  ;;  %4924 = vmatpush3.bf16.msra.mxu1 %v4986_v44 }
 0x2db   :  { %v3403_v19 = vmax.f32 %v3401_v24, %v3402_v59  ;;  %v3544_v4 = vrot.slane %v3543_v36, 4  ;;  %v3408_v53 = vmax.f32 %v3406_v6, %v3407_v56  ;;  %v3215_v33 = vadd.f32 %v3193_v52, %v6355_v10  ;;  %4929 = vmatprep.subr.bf16.mxu0 %v7237_v58 }
 0x2dc   :  { %v3276_v37 = vmax.f32 %v3212_v28, 0.0  ;;  %v3086_v30 = vrot.slane %v2857_v8, 1 }
 0x2dd   :  { %v3404_v57 = vrot.slane %v3403_v19, 1  ;;  %v3545_v62 = vmax.f32 %v3543_v36, %v3544_v4  ;;  %v3409_v35 = vrot.slane %v3408_v53, 4  ;;  %v3279_v24 = vmax.f32 %v3215_v33, 0.0  ;;  %v4863_v45 = vpop.f32.mrb[140].mxu1 }
 0x2de   :  { %v3340_v10 = vmul.f32 %v5793_v39, %v3276_v37  ;;  %v3194_v16 = vsel %vm1576_vm2, %v3086_v30, %v3087_v13  ;;  %v3195_v59 = vsel %vm1576_vm2, %v3085_v20, %v3086_v30  ;;  %v3091_v60 = vrot.slane %v4863_v45, 1  ;;  %v2870_v6 = vpop.f32.mrb[141].mxu1 }
 0x2df   :  { %v3405_v23 = vmax.f32 %v3403_v19, %v3404_v57  ;;  %v3546_v8 = vrot.slane %v3545_v62, 2  ;;  %v3410_v36 = vmax.f32 %v3408_v53, %v3409_v35  ;;  %v3343_v56 = vmul.f32 %v5783_v34, %v3279_v24  ;;  %v6695_v28 = vpop.f32.mrb[142].mxu1 }
 0x2e0   :  { %v3551_v52 = vsel %vm322_vm0, %v3340_v10, -inf  ;;  %v3213_v4 = vadd.f32 %v3195_v59, %v6339_v38  ;;  %v3214_v13 = vadd.f32 %v3194_v16, %v6353_v61  ;;  %v3089_v33 = vrot.slane %v2870_v6, 1  ;;  %v2873_v1 = vpop.f32.mrb[143].mxu1 }
 0x2e1   :  { %v3693_v20 = vpack.c.bf16 %v3405_v23, %v3405_v23  ;;  %v3547_v44 = vmax.f32 %v3545_v62, %v3546_v8  ;;  %v3411_v37 = vrot.slane %v3410_v36, 2  ;;  %v3552_v30 = vmax.f32 %v3550_v49, %v3551_v52 }
 0x2e2   :  { %v3559_v19 = vsel %vm322_vm0, %v3343_v56, -inf  ;;  %v3277_v53 = vmax.f32 %v3213_v4, 0.0  ;;  %v3278_v57 = vmax.f32 %v3214_v13, 0.0  ;;  %v3192_v35 = vsel %vm1576_vm2, %v3088_v46, %v3089_v33 }
 0x2e3   :  { %v3851_v24 = vunpack.c.l.b16 %v3693_v20  ;;  %v3548_v45 = vrot.slane %v3547_v44, 1  ;;  %v3412_v10 = vmax.f32 %v3410_v36, %v3411_v37  ;;  %v3553_v38 = vrot.slane %v3552_v30, 4 }
 0x2e4   :  { %v3341_v61 = vmul.f32 %v5775_v17, %v3277_v53  ;;  %v3342_v16 = vmul.f32 %v5778_v47, %v3278_v57  ;;  %v3216_v62 = vadd.f32 %v3192_v35, %v6345_v25  ;;  %v3092_v49 = vrot.slane %v6695_v28, 1 }
 0x2e5   :  { %v3549_v59 = vmax.f32 %v3547_v44, %v3548_v45  ;;  %v3413_v6 = vrot.slane %v3412_v10, 1  ;;  %v3554_v23 = vmax.f32 %v3552_v30, %v3553_v38  ;;  %v3090_v8 = vrot.slane %v2873_v1, 1  ;;  %v4867_v56 = vpop.f32.mrb[144].mxu1 }
 0x2e6   :  { %v3415_v52 = vsel %vm322_vm0, %v3341_v61, -inf  ;;  %v3416_v46 = vsel %vm322_vm0, %v3342_v16, -inf  ;;  %v3280_v4 = vmax.f32 %v3216_v62, 0.0  ;;  %v3189_v36 = vsel %vm1576_vm2, %v3091_v60, %v3092_v49  ;;  %v2886_v13 = vpop.f32.mrb[145].mxu1 }
 0x2e7   :  { %v3709_v20 = vpack.c.bf16 %v3549_v59, %v3549_v59  ;;  %v3414_v37 = vmax.f32 %v3412_v10, %v3413_v6  ;;  %v3555_v53 = vrot.slane %v3554_v23, 2  ;;  %v3417_v25 = vmax.f32 %v3415_v52, %v3416_v46  ;;  %v6711_v57 = vpop.f32.mrb[146].mxu1 }
 0x2e8   :  { %v3344_v28 = vmul.f32 %v5793_v39, %v3280_v4  ;;  %v3219_v1 = vadd.f32 %v3189_v36, %v6379_v42  ;;  %v3190_v44 = vsel %vm1576_vm2, %v3090_v8, %v3091_v60  ;;  %v3191_v30 = vsel %vm1576_vm2, %v3089_v33, %v3090_v8  ;;  %v2889_v35 = vpop.f32.mrb[147].mxu1 }
 0x2e9   :  { %v3741_v45 = vunpack.c.l.b16 %v3709_v20  ;;  %v3694_v38 = vpack.c.bf16 %v3414_v37, %v3414_v37  ;;  %v3556_v61 = vmax.f32 %v3554_v23, %v3555_v53  ;;  %v3418_v16 = vrot.slane %v3417_v25, 4 }
 0x2ea   :  { %v3560_v10 = vsel %vm322_vm0, %v3344_v28, -inf  ;;  %v3283_v62 = vmax.f32 %v3219_v1, 0.0  ;;  %v3217_v59 = vadd.f32 %v3191_v30, %v6363_v51  ;;  %v3218_v6 = vadd.f32 %v3190_v44, %v6377_v48 }
 0x2eb   :  { %v3852_v52 = vunpack.c.l.b16 %v3694_v38  ;;  %v3557_v42 = vrot.slane %v3556_v61, 1  ;;  %v3419_v46 = vmax.f32 %v3417_v25, %v3418_v16  ;;  %v3561_v4 = vmax.f32 %v3559_v19, %v3560_v10 }
 0x2ec   :  { %v3347_v60 = vmul.f32 %v5783_v34, %v3283_v62  ;;  %v3281_v36 = vmax.f32 %v3217_v59, 0.0  ;;  %v3282_v33 = vmax.f32 %v3218_v6, 0.0  ;;  %v3095_v8 = vrot.slane %v4867_v56, 1 }
 0x2ed   :  { %v3867_v20 = vsel %vm3757_vm7, %v3852_v52, %v3851_v24  ;;  %v3558_v23 = vmax.f32 %v3556_v61, %v3557_v42  ;;  %v3420_v37 = vrot.slane %v3419_v46, 2  ;;  %v3562_v53 = vrot.slane %v3561_v4, 4  ;;  %v6724_v28 = vpop.f32.mrb[148].mxu1 }
 0x2ee   :  { %v3568_v51 = vsel %vm322_vm0, %v3347_v60, -inf  ;;  %v3345_v48 = vmul.f32 %v5775_v17, %v3281_v36  ;;  %v3346_v25 = vmul.f32 %v5778_v47, %v3282_v33  ;;  %v3093_v19 = vrot.slane %v2886_v13, 1  ;;  %v6729_v1 = vpop.f32.mrb[149].mxu1 }
 0x2ef   :  { %v3710_v44 = vpack.c.bf16 %v3558_v23, %v3558_v23  ;;  %v3421_v30 = vmax.f32 %v3419_v46, %v3420_v37  ;;  %v3563_v56 = vmax.f32 %v3561_v4, %v3562_v53  ;;  %v3096_v24 = vrot.slane %v6711_v57, 1  ;;  %v6732_v38 = vpop.f32.mrb[150].mxu1 }
 0x2f0   :  { %v3424_v61 = vsel %vm322_vm0, %v3345_v48, -inf  ;;  %v3425_v16 = vsel %vm322_vm0, %v3346_v25, -inf  ;;  %v3188_v10 = vsel %vm1576_vm2, %v3092_v49, %v3093_v19  ;;  %v3094_v62 = vrot.slane %v2889_v35, 1  ;;  %v6738_v59 = vpop.f32.mrb[151].mxu1 }
 0x2f1   :  { %v3742_v13 = vunpack.c.l.b16 %v3710_v44  ;;  %v3422_v6 = vrot.slane %v3421_v30, 1  ;;  %v3564_v52 = vrot.slane %v3563_v56, 2  ;;  %v3426_v42 = vmax.f32 %v3424_v61, %v3425_v16 }
 0x2f2   :  { %v3220_v46 = vadd.f32 %v3188_v10, %v6369_v3  ;;  %v3185_v57 = vsel %vm1576_vm2, %v3095_v8, %v3096_v24  ;;  %v3186_v4 = vsel %vm1576_vm2, %v3094_v62, %v3095_v8  ;;  %v3187_v60 = vsel %vm1576_vm2, %v3093_v19, %v3094_v62 }
 0x2f3   :  { %v3758_v49 = vsel %vm3757_vm7, %v3742_v13, %v3741_v45  ;;  %v3423_v35 = vmax.f32 %v3421_v30, %v3422_v6  ;;  %v3565_v36 = vmax.f32 %v3563_v56, %v3564_v52  ;;  %v3427_v33 = vrot.slane %v3426_v42, 4 }
 0x2f4   :  { %v3284_v23 = vmax.f32 %v3220_v46, 0.0  ;;  %v3223_v37 = vadd.f32 %v3185_v57, %v6401_v31  ;;  %v3221_v53 = vadd.f32 %v3187_v60, %v6387_v32  ;;  %v3222_v3 = vadd.f32 %v3186_v4, %v6399_v14 }
 0x2f5   :  { %v3695_v48 = vpack.c.bf16 %v3423_v35, %v3423_v35  ;;  %v3566_v25 = vrot.slane %v3565_v36, 1  ;;  %v3428_v44 = vmax.f32 %v3426_v42, %v3427_v33  ;;  %v3099_v8 = vrot.slane %v6724_v28, 1  ;;  %v6752_v61 = vpop.f32.mrb[152].mxu1 }
 0x2f6   :  { %v3348_v19 = vmul.f32 %v5793_v39, %v3284_v23  ;;  %v3287_v45 = vmax.f32 %v3223_v37, 0.0  ;;  %v3285_v30 = vmax.f32 %v3221_v53, 0.0  ;;  %v3286_v56 = vmax.f32 %v3222_v3, 0.0  ;;  %v6755_v16 = vpop.f32.mrb[153].mxu1 }
 0x2f7   :  { %v3853_v10 = vunpack.c.l.b16 %v3695_v48  ;;  %v3567_v31 = vmax.f32 %v3565_v36, %v3566_v25  ;;  %v3429_v62 = vrot.slane %v3428_v44, 2  ;;  %v3097_v32 = vrot.slane %v6729_v1, 1  ;;  %v6758_v14 = vpop.f32.mrb[154].mxu1 }
 0x2f8   :  { %v3569_v13 = vsel %vm322_vm0, %v3348_v19, -inf  ;;  %v3351_v28 = vmul.f32 %v5783_v34, %v3287_v45  ;;  %v3349_v6 = vmul.f32 %v5775_v17, %v3285_v30  ;;  %v3350_v52 = vmul.f32 %v5778_v47, %v3286_v56  ;;  %v6764_v42 = vpop.f32.mrb[155].mxu1 }
 0x2f9   :  { %v3868_v46 = vsel %vm3759_vm8, %v3853_v10, %v3867_v20  ;;  %v3711_v57 = vpack.c.bf16 %v3567_v31, %v3567_v31  ;;  %v3430_v4 = vmax.f32 %v3428_v44, %v3429_v62  ;;  %v3570_v60 = vmax.f32 %v3568_v51, %v3569_v13 }
 0x2fa   :  { %v3577_v1 = vsel %vm322_vm0, %v3351_v28, -inf  ;;  %v3433_v35 = vsel %vm322_vm0, %v3349_v6, -inf  ;;  %v3434_v36 = vsel %vm322_vm0, %v3350_v52, -inf  ;;  %v3184_v33 = vsel %vm1576_vm2, %v3096_v24, %v3097_v32 }
 0x2fb   :  { %v3743_v23 = vunpack.c.l.b16 %v3711_v57  ;;  %v3431_v37 = vrot.slane %v3430_v4, 1  ;;  %v3571_v53 = vrot.slane %v3570_v60, 4  ;;  %v3435_v3 = vmax.f32 %v3433_v35, %v3434_v36 }
 0x2fc   :  { %v3224_v48 = vadd.f32 %v3184_v33, %v6393_v26  ;;  %v3100_v20 = vrot.slane %v6732_v38, 1  ;;  %v3098_v25 = vrot.slane %v6738_v59, 1  ;;  %v3103_v51 = vrot.slane %v6752_v61, 1 }
 0x2fd   :  { %v6777_v44 = vsel %vm3759_vm8, %v3743_v23, %v3758_v49  ;;  %v3432_v19 = vmax.f32 %v3430_v4, %v3431_v37  ;;  %v3572_v45 = vmax.f32 %v3570_v60, %v3571_v53  ;;  %v3436_v30 = vrot.slane %v3435_v3, 4  ;;  %v6779_v56 = vpop.f32.mrb[156].mxu1 }
 0x2fe   :  { %v3288_v24 = vmax.f32 %v3224_v48, 0.0  ;;  %v3181_v10 = vsel %vm1576_vm2, %v3099_v8, %v3100_v20  ;;  %v3182_v26 = vsel %vm1576_vm2, %v3098_v25, %v3099_v8  ;;  %v3183_v38 = vsel %vm1576_vm2, %v3097_v32, %v3098_v25  ;;  %v6787_v59 = vpop.f32.mrb[157].mxu1 }
 0x2ff   :  { %v3696_v31 = vpack.c.bf16 %v3432_v19, %v3432_v19  ;;  %v3573_v49 = vrot.slane %v3572_v45, 2  ;;  %v3437_v62 = vmax.f32 %v3435_v3, %v3436_v30  ;;  %v3227_v13 = vadd.f32 %v3181_v10, %v6421_v9  ;;  %v6790_v28 = vpop.f32.mrb[158].mxu1 }
 0x300   :  { %v3352_v6 = vmul.f32 %v5793_v39, %v3288_v24  ;;  %v3225_v52 = vadd.f32 %v3183_v38, %v6409_v18  ;;  %v3226_v57 = vadd.f32 %v3182_v26, %v6419_v7  ;;  %v3101_v8 = vrot.slane %v6755_v16, 1  ;;  %v6796_v4 = vpop.f32.mrb[159].mxu1 }
 0x301   :  { %v3854_v32 = vunpack.c.l.b16 %v3696_v31  ;;  %v3574_v60 = vmax.f32 %v3572_v45, %v3573_v49  ;;  %v3438_v35 = vrot.slane %v3437_v62, 2  ;;  %v3291_v36 = vmax.f32 %v3227_v13, 0.0 }
 0x302   :  { %v3578_v33 = vsel %vm322_vm0, %v3352_v6, -inf  ;;  %v3289_v9 = vmax.f32 %v3225_v52, 0.0  ;;  %v3290_v23 = vmax.f32 %v3226_v57, 0.0  ;;  %v3180_v37 = vsel %vm1576_vm2, %v3100_v20, %v3101_v8 }
 0x303   :  { %v3869_v18 = vsel %vm3761_vm9, %v3854_v32, %v3868_v46  ;;  %v3575_v53 = vrot.slane %v3574_v60, 1  ;;  %v3439_v7 = vmax.f32 %v3437_v62, %v3438_v35  ;;  %v3579_v3 = vmax.f32 %v3577_v1, %v3578_v33 }
 0x304   :  { %v3355_v16 = vmul.f32 %v5783_v34, %v3291_v36  ;;  %v3353_v48 = vmul.f32 %v5775_v17, %v3289_v9  ;;  %v3354_v25 = vmul.f32 %v5778_v47, %v3290_v23  ;;  %v3228_v19 = vadd.f32 %v3180_v37, %v6413_v54 }
 0x305   :  { %v3576_v45 = vmax.f32 %v3574_v60, %v3575_v53  ;;  %v3440_v30 = vrot.slane %v3439_v7, 1  ;;  %v3580_v24 = vrot.slane %v3579_v3, 4  ;;  %v3104_v10 = vrot.slane %v6758_v14, 1  ;;  %v6807_v26 = vpop.f32.mrb[160].mxu1 }
 0x306   :  { %v3586_v46 = vsel %vm322_vm0, %v3355_v16, -inf  ;;  %v3442_v20 = vsel %vm322_vm0, %v3353_v48, -inf  ;;  %v3443_v1 = vsel %vm322_vm0, %v3354_v25, -inf  ;;  %v3292_v38 = vmax.f32 %v3228_v19, 0.0  ;;  %v6812_v31 = vpop.f32.mrb[161].mxu1 }
 0x307   :  { %v3712_v49 = vpack.c.bf16 %v3576_v45, %v3576_v45  ;;  %v3441_v62 = vmax.f32 %v3439_v7, %v3440_v30  ;;  %v3581_v13 = vmax.f32 %v3579_v3, %v3580_v24  ;;  %v3444_v54 = vmax.f32 %v3442_v20, %v3443_v1  ;;  %v6814_v6 = vpop.f32.mrb[162].mxu1 }
 0x308   :  { %v3356_v52 = vmul.f32 %v5793_v39, %v3292_v38  ;;  %v3177_v14 = vsel %vm1576_vm2, %v3103_v51, %v3104_v10  ;;  %v3102_v57 = vrot.slane %v6764_v42, 1  ;;  %v3107_v32 = vrot.slane %v6779_v56, 1  ;;  %v6823_v60 = vpop.f32.mrb[163].mxu1 }
 0x309   :  { %v3744_v35 = vunpack.c.l.b16 %v3712_v49  ;;  %v3697_v36 = vpack.c.bf16 %v3441_v62, %v3441_v62  ;;  %v3582_v33 = vrot.slane %v3581_v13, 2  ;;  %v3445_v9 = vrot.slane %v3444_v54, 4 }
 0x30a   :  { %v3587_v23 = vsel %vm322_vm0, %v3356_v52, -inf  ;;  %v3231_v37 = vadd.f32 %v3177_v14, %v6441_v21  ;;  %v3178_v53 = vsel %vm1576_vm2, %v3102_v57, %v3103_v51  ;;  %v3179_v42 = vsel %vm1576_vm2, %v3101_v8, %v3102_v57 }
 0x30b   :  { %v3762_v56 = vsel %vm3761_vm9, %v3744_v35, %v6777_v44  ;;  %v3855_v7 = vunpack.c.l.b16 %v3697_v36  ;;  %v3583_v3 = vmax.f32 %v3581_v13, %v3582_v33  ;;  %v3446_v16 = vmax.f32 %v3444_v54, %v3445_v9 }
 0x30c   :  { %v3588_v48 = vmax.f32 %v3586_v46, %v3587_v23  ;;  %v3295_v25 = vmax.f32 %v3231_v37, 0.0  ;;  %v3229_v19 = vadd.f32 %v3179_v42, %v6429_v22  ;;  %v3230_v21 = vadd.f32 %v3178_v53, %v6439_v15 }
 0x30d   :  { %v6838_v61 = vsel %vm3763_vm10, %v3855_v7, %v3869_v18  ;;  %v3584_v45 = vrot.slane %v3583_v3, 1  ;;  %v3447_v51 = vrot.slane %v3446_v16, 2  ;;  %v3105_v30 = vrot.slane %v6787_v59, 1  ;;  %v6841_v8 = vpop.f32.mrb[164].mxu1 }
 0x30e   :  { %v3589_v24 = vrot.slane %v3588_v48, 4  ;;  %v3359_v44 = vmul.f32 %v5783_v34, %v3295_v25  ;;  %v3293_v20 = vmax.f32 %v3229_v19, 0.0  ;;  %v3294_v1 = vmax.f32 %v3230_v21, 0.0  ;;  %v6844_v46 = vpop.f32.mrb[165].mxu1 }
 0x30f   :  { %v3585_v38 = vmax.f32 %v3583_v3, %v3584_v45  ;;  %v3448_v22 = vmax.f32 %v3446_v16, %v3447_v51  ;;  %v3176_v15 = vsel %vm1576_vm2, %v3104_v10, %v3105_v30  ;;  %v3108_v18 = vrot.slane %v6790_v28, 1  ;;  %v6849_v49 = vpop.f32.mrb[166].mxu1 }
 0x310   :  { %v3590_v62 = vmax.f32 %v3588_v48, %v3589_v24  ;;  %v3595_v59 = vsel %vm322_vm0, %v3359_v44, -inf  ;;  %v3357_v13 = vmul.f32 %v5775_v17, %v3293_v20  ;;  %v3358_v54 = vmul.f32 %v5778_v47, %v3294_v1  ;;  %v6854_v52 = vpop.f32.mrb[167].mxu1 }
 0x311   :  { %v3713_v14 = vpack.c.bf16 %v3585_v38, %v3585_v38  ;;  %v3449_v57 = vrot.slane %v3448_v22, 1  ;;  %v3232_v35 = vadd.f32 %v3176_v15, %v6433_v29  ;;  %v3173_v10 = vsel %vm1576_vm2, %v3107_v32, %v3108_v18 }
 0x312   :  { %v3591_v36 = vrot.slane %v3590_v62, 2  ;;  %v3451_v28 = vsel %vm322_vm0, %v3357_v13, -inf  ;;  %v3452_v33 = vsel %vm322_vm0, %v3358_v54, -inf  ;;  %v3235_v9 = vadd.f32 %v3173_v10, %v6461_v11 }
 0x313   :  { %v3745_v23 = vunpack.c.l.b16 %v3713_v14  ;;  %v3450_v37 = vmax.f32 %v3448_v22, %v3449_v57  ;;  %v3453_v53 = vmax.f32 %v3451_v28, %v3452_v33  ;;  %v3296_v42 = vmax.f32 %v3232_v35, 0.0 }
 0x314   :  { %v3592_v7 = vmax.f32 %v3590_v62, %v3591_v36  ;;  %v3299_v3 = vmax.f32 %v3235_v9, 0.0  ;;  %v3106_v16 = vrot.slane %v6796_v4, 1  ;;  %v3111_v29 = vrot.slane %v6807_v26, 1 }
 0x315   :  { %v6865_v48 = vsel %vm3763_vm10, %v3745_v23, %v3762_v56  ;;  %v3698_v25 = vpack.c.bf16 %v3450_v37, %v3450_v37  ;;  %v3454_v19 = vrot.slane %v3453_v53, 4  ;;  %v3360_v21 = vmul.f32 %v5793_v39, %v3296_v42  ;;  %v6868_v45 = vpop.f32.mrb[168].mxu1 }
 0x316   :  { %v3593_v11 = vrot.slane %v3592_v7, 1  ;;  %v3363_v51 = vmul.f32 %v5783_v34, %v3299_v3  ;;  %v3174_v24 = vsel %vm1576_vm2, %v3106_v16, %v3107_v32  ;;  %v3175_v4 = vsel %vm1576_vm2, %v3105_v30, %v3106_v16  ;;  %v6875_v44 = vpop.f32.mrb[169].mxu1 }
 0x317   :  { %v6877_v26 = vunpack.c.l.b16 %v3698_v25  ;;  %v3455_v56 = vmax.f32 %v3453_v53, %v3454_v19  ;;  %v3596_v20 = vsel %vm322_vm0, %v3360_v21, -inf  ;;  %v3233_v1 = vadd.f32 %v3175_v4, %v6449_v43  ;;  %v6881_v38 = vpop.f32.mrb[170].mxu1  ;;  %v7291_v4 = vld [vmem:[#allocation6_spill] sm:$0xff] }
 0x318   :  { %v3594_v22 = vmax.f32 %v3592_v7, %v3593_v11  ;;  %v3597_v15 = vmax.f32 %v3595_v59, %v3596_v20  ;;  %v3604_v62 = vsel %vm322_vm0, %v3363_v51, -inf  ;;  %v3234_v32 = vadd.f32 %v3174_v24, %v6459_v12  ;;  %v6885_v13 = vpop.f32.mrb[171].mxu1 }
 0x319   :  { %v3456_v30 = vrot.slane %v3455_v56, 2  ;;  %v3297_v54 = vmax.f32 %v3233_v1, 0.0  ;;  %v3109_v14 = vrot.slane %v6812_v31, 1  ;;  %v3112_v57 = vrot.slane %v6814_v6, 1 }
 0x31a   :  { %v3714_v35 = vpack.c.bf16 %v3594_v22, %v3594_v22  ;;  %v3598_v10 = vrot.slane %v3597_v15, 4  ;;  %v3298_v36 = vmax.f32 %v3234_v32, 0.0  ;;  %v3110_v43 = vrot.slane %v6823_v60, 1 }
 0x31b   :  { %v3457_v28 = vmax.f32 %v3455_v56, %v3456_v30  ;;  %v3361_v59 = vmul.f32 %v5775_v17, %v3297_v54  ;;  %v3172_v33 = vsel %vm1576_vm2, %v3108_v18, %v3109_v14  ;;  %v3169_v12 = vsel %vm1576_vm2, %v3111_v29, %v3112_v57 }
 0x31c   :  { %v6895_v9 = vunpack.c.l.b16 %v3714_v35  ;;  %v3599_v23 = vmax.f32 %v3597_v15, %v3598_v10  ;;  %v3362_v31 = vmul.f32 %v5778_v47, %v3298_v36  ;;  %v3236_v6 = vadd.f32 %v3172_v33, %v6453_v40 }
 0x31d   :  { %v3458_v37 = vrot.slane %v3457_v28, 1  ;;  %v3460_v53 = vsel %vm322_vm0, %v3361_v59, -inf  ;;  %v3239_v60 = vadd.f32 %v3169_v12, %v6489_v5  ;;  %v3170_v42 = vsel %vm1576_vm2, %v3110_v43, %v3111_v29  ;;  %v6903_v7 = vpop.f32.mrb[172].mxu1 }
 0x31e   :  { %v3600_v18 = vrot.slane %v3599_v23, 2  ;;  %v3461_v3 = vsel %vm322_vm0, %v3362_v31, -inf  ;;  %v3300_v16 = vmax.f32 %v3236_v6, 0.0  ;;  %v3171_v25 = vsel %vm1576_vm2, %v3109_v14, %v3110_v43  ;;  %v6908_v19 = vpop.f32.mrb[173].mxu1  ;;  %v7292_v6 = vld [vmem:[#allocation2_spill] sm:$0xff] }
 0x31f   :  { %v3459_v40 = vmax.f32 %v3457_v28, %v3458_v37  ;;  %v3462_v21 = vmax.f32 %v3460_v53, %v3461_v3  ;;  %v3303_v11 = vmax.f32 %v3239_v60, 0.0  ;;  %v3237_v51 = vadd.f32 %v3171_v25, %v6477_v50  ;;  %v6911_v5 = vpop.f32.mrb[174].mxu1 }
 0x320   :  { %v3601_v24 = vmax.f32 %v3599_v23, %v3600_v18  ;;  %v3364_v29 = vmul.f32 %v5793_v39, %v3300_v16  ;;  %v3238_v56 = vadd.f32 %v3170_v42, %v7291_v4  ;;  %v3115_v20 = vrot.slane %v6841_v8, 1  ;;  %v6916_v1 = vpop.f32.mrb[175].mxu1 }
 0x321   :  { %v3699_v22 = vpack.c.bf16 %v3459_v40, %v3459_v40  ;;  %v3463_v15 = vrot.slane %v3462_v21, 4  ;;  %v3367_v32 = vmul.f32 %v5783_v34, %v3303_v11  ;;  %v3301_v30 = vmax.f32 %v3237_v51, 0.0 }
 0x322   :  { %v3602_v54 = vrot.slane %v3601_v24, 1  ;;  %v3605_v14 = vsel %vm322_vm0, %v3364_v29, -inf  ;;  %v3302_v50 = vmax.f32 %v3238_v56, 0.0  ;;  %v3113_v35 = vrot.slane %v6844_v46, 1 }
 0x323   :  { %v6921_v10 = vunpack.c.l.b16 %v3699_v22  ;;  %v3464_v36 = vmax.f32 %v3462_v21, %v3463_v15  ;;  %v3606_v43 = vmax.f32 %v3604_v62, %v3605_v14  ;;  %v3613_v28 = vsel %vm322_vm0, %v3367_v32, -inf  ;;  %v7293_v15 = vld [vmem:[#allocation10_spill] sm:$0xff]  ;;  %v7295_v14 = vld [vmem:[#allocation4_spill] sm:$0xff] }
 0x324   :  { %v3603_v8 = vmax.f32 %v3601_v24, %v3602_v54  ;;  %v3365_v59 = vmul.f32 %v5775_v17, %v3301_v30  ;;  %v3366_v33 = vmul.f32 %v5778_v47, %v3302_v50  ;;  %v3168_v12 = vsel %vm1576_vm2, %v3112_v57, %v3113_v35  ;;  %v7294_v30 = vld [vmem:[#allocation3_spill] sm:$0xff] }
 0x325   :  { %v3465_v23 = vrot.slane %v3464_v36, 2  ;;  %v3607_v31 = vrot.slane %v3606_v43, 4  ;;  %v3240_v37 = vadd.f32 %v3168_v12, %v7292_v6  ;;  %v3116_v46 = vrot.slane %v6849_v49, 1  ;;  %v6930_v53 = vpop.f32.mrb[176].mxu1 }
 0x326   :  { %v3715_v60 = vpack.c.bf16 %v3603_v8, %v3603_v8  ;;  %v3469_v62 = vsel %vm322_vm0, %v3365_v59, -inf  ;;  %v3470_v42 = vsel %vm322_vm0, %v3366_v33, -inf  ;;  %v3114_v18 = vrot.slane %v6854_v52, 1  ;;  %v6935_v3 = vpop.f32.mrb[177].mxu1 }
 0x327   :  { %v3466_v16 = vmax.f32 %v3464_v36, %v3465_v23  ;;  %v3608_v25 = vmax.f32 %v3606_v43, %v3607_v31  ;;  %v3471_v57 = vmax.f32 %v3469_v62, %v3470_v42  ;;  %v3304_v40 = vmax.f32 %v3240_v37, 0.0  ;;  %v6937_v21 = vpop.f32.mrb[178].mxu1 }
 0x328   :  { %v6939_v11 = vunpack.c.l.b16 %v3715_v60  ;;  %v3165_v49 = vsel %vm1576_vm2, %v3115_v20, %v3116_v46  ;;  %v3166_v51 = vsel %vm1576_vm2, %v3114_v18, %v3115_v20  ;;  %v3167_v24 = vsel %vm1576_vm2, %v3113_v35, %v3114_v18  ;;  %v6947_v52 = vpop.f32.mrb[179].mxu1 }
 0x329   :  { %v3467_v29 = vrot.slane %v3466_v16, 1  ;;  %v3609_v4 = vrot.slane %v3608_v25, 2  ;;  %v3472_v56 = vrot.slane %v3471_v57, 4  ;;  %v3368_v22 = vmul.f32 %v5793_v39, %v3304_v40 }
 0x32a   :  { %v3243_v32 = vadd.f32 %v3165_v49, %v7293_v15  ;;  %v3241_v54 = vadd.f32 %v3167_v24, %v7294_v30  ;;  %v3242_v50 = vadd.f32 %v3166_v51, %v7295_v14  ;;  %v3119_v36 = vrot.slane %v6868_v45, 1  ;;  %v7296_v30 = vld [vmem:[#allocation5_spill] sm:$0xff] }
 0x32b   :  { %v3468_v43 = vmax.f32 %v3466_v16, %v3467_v29  ;;  %v3610_v20 = vmax.f32 %v3608_v25, %v3609_v4  ;;  %v3473_v8 = vmax.f32 %v3471_v57, %v3472_v56  ;;  %v3614_v35 = vsel %vm322_vm0, %v3368_v22, -inf }
 0x32c   :  { %v3615_v59 = vmax.f32 %v3613_v28, %v3614_v35  ;;  %v3307_v33 = vmax.f32 %v3243_v32, 0.0  ;;  %v3305_v12 = vmax.f32 %v3241_v54, 0.0  ;;  %v3306_v23 = vmax.f32 %v3242_v50, 0.0 }
 0x32d   :  { %v3700_v31 = vpack.c.bf16 %v3468_v43, %v3468_v43  ;;  %v3611_v6 = vrot.slane %v3610_v20, 1  ;;  %v3474_v37 = vrot.slane %v3473_v8, 2  ;;  %v3117_v60 = vrot.slane %v6875_v44, 1  ;;  %v6956_v62 = vpop.f32.mrb[180].mxu1 }
 0x32e   :  { %v3616_v42 = vrot.slane %v3615_v59, 4  ;;  %v3371_v18 = vmul.f32 %v5783_v34, %v3307_v33  ;;  %v3369_v45 = vmul.f32 %v5775_v17, %v3305_v12  ;;  %v3370_v16 = vmul.f32 %v5778_v47, %v3306_v23  ;;  %v6961_v25 = vpop.f32.mrb[181].mxu1 }
 0x32f   :  { %v6963_v28 = vunpack.c.l.b16 %v3700_v31  ;;  %v3612_v57 = vmax.f32 %v3610_v20, %v3611_v6  ;;  %v3475_v40 = vmax.f32 %v3473_v8, %v3474_v37  ;;  %v3164_v49 = vsel %vm1576_vm2, %v3116_v46, %v3117_v60  ;;  %v6967_v51 = vpop.f32.mrb[182].mxu1 }
 0x330   :  { %v3617_v44 = vmax.f32 %v3615_v59, %v3616_v42  ;;  %v3622_v24 = vsel %vm322_vm0, %v3371_v18, -inf  ;;  %v3478_v29 = vsel %vm322_vm0, %v3369_v45, -inf  ;;  %v3479_v4 = vsel %vm322_vm0, %v3370_v16, -inf  ;;  %v6972_v56 = vpop.f32.mrb[183].mxu1  ;;  %v7298_v45 = vld [vmem:[#allocation7_spill] sm:$0xff] }
 0x331   :  { %v3716_v22 = vpack.c.bf16 %v3612_v57, %v3612_v57  ;;  %v3476_v15 = vrot.slane %v3475_v40, 1  ;;  %v3480_v32 = vmax.f32 %v3478_v29, %v3479_v4  ;;  %v3244_v54 = vadd.f32 %v3164_v49, %v7296_v30  ;;  %v7299_v57 = vld [vmem:[#allocation8_spill] sm:$0xff] }
 0x332   :  { %v3618_v14 = vrot.slane %v3617_v44, 2  ;;  %v3120_v50 = vrot.slane %v6881_v38, 1  ;;  %v3118_v46 = vrot.slane %v6885_v13, 1  ;;  %v3123_v43 = vrot.slane %v6903_v7, 1  ;;  %v7297_v7 = vld [vmem:[#allocation14_spill] sm:$0xff] }
 0x333   :  { %v6978_v20 = vunpack.c.l.b16 %v3716_v22  ;;  %v3477_v8 = vmax.f32 %v3475_v40, %v3476_v15  ;;  %v3481_v35 = vrot.slane %v3480_v32, 4  ;;  %v3308_v59 = vmax.f32 %v3244_v54, 0.0 }
 0x334   :  { %v3619_v33 = vmax.f32 %v3617_v44, %v3618_v14  ;;  %v3161_v12 = vsel %vm1576_vm2, %v3119_v36, %v3120_v50  ;;  %v3162_v23 = vsel %vm1576_vm2, %v3118_v46, %v3119_v36  ;;  %v3163_v31 = vsel %vm1576_vm2, %v3117_v60, %v3118_v46 }
 0x335   :  { %v3701_v38 = vpack.c.bf16 %v3477_v8, %v3477_v8  ;;  %v3482_v6 = vmax.f32 %v3480_v32, %v3481_v35  ;;  %v3372_v13 = vmul.f32 %v5793_v39, %v3308_v59  ;;  %v3247_v37 = vadd.f32 %v3161_v12, %v7297_v7  ;;  %v6988_v42 = vpop.f32.mrb[184].mxu1 }
 0x336   :  { %v3620_v18 = vrot.slane %v3619_v33, 1  ;;  %v3245_v16 = vadd.f32 %v3163_v31, %v7298_v45  ;;  %v3246_v40 = vadd.f32 %v3162_v23, %v7299_v57  ;;  %v3121_v49 = vrot.slane %v6908_v19, 1  ;;  %v6993_v44 = vpop.f32.mrb[185].mxu1  ;;  %v7301_v57 = vld [vmem:[#allocation18_spill] sm:$0xff] }
 0x337   :  { %v3859_v36 = vunpack.c.l.b16 %v3701_v38  ;;  %v3483_v29 = vrot.slane %v3482_v6, 2  ;;  %v3623_v60 = vsel %vm322_vm0, %v3372_v13, -inf  ;;  %v3311_v4 = vmax.f32 %v3247_v37, 0.0  ;;  %v6996_v22 = vpop.f32.mrb[186].mxu1  ;;  %v7300_v38 = vld [vmem:[#allocation9_spill] sm:$0xff] }
 0x338   :  { %v3621_v15 = vmax.f32 %v3619_v33, %v3620_v18  ;;  %v3624_v32 = vmax.f32 %v3622_v24, %v3623_v60  ;;  %v3309_v30 = vmax.f32 %v3245_v16, 0.0  ;;  %v3310_v54 = vmax.f32 %v3246_v40, 0.0  ;;  %v6998_v14 = vpop.f32.mrb[187].mxu1 }
 0x339   :  { %v3484_v46 = vmax.f32 %v3482_v6, %v3483_v29  ;;  %v3375_v8 = vmul.f32 %v5783_v34, %v3311_v4  ;;  %v3160_v19 = vsel %vm1576_vm2, %v3120_v50, %v3121_v49  ;;  %v3124_v35 = vrot.slane %v6911_v5, 1 }
 0x33a   :  { %v3717_v59 = vpack.c.bf16 %v3621_v15, %v3621_v15  ;;  %v3625_v12 = vrot.slane %v3624_v32, 4  ;;  %v3373_v23 = vmul.f32 %v5775_v17, %v3309_v30  ;;  %v3374_v31 = vmul.f32 %v5778_v47, %v3310_v54 }
 0x33b   :  { %v3485_v33 = vrot.slane %v3484_v46, 1  ;;  %v3631_v24 = vsel %vm322_vm0, %v3375_v8, -inf  ;;  %v3248_v13 = vadd.f32 %v3160_v19, %v7300_v38  ;;  %v3157_v6 = vsel %vm1576_vm2, %v3123_v43, %v3124_v35 }
 0x33c   :  { %v3749_v7 = vunpack.c.l.b16 %v3717_v59  ;;  %v3626_v37 = vmax.f32 %v3624_v32, %v3625_v12  ;;  %v3487_v50 = vsel %vm322_vm0, %v3373_v23, -inf  ;;  %v3488_v5 = vsel %vm322_vm0, %v3374_v31, -inf }
 0x33d   :  { %v3486_v18 = vmax.f32 %v3484_v46, %v3485_v33  ;;  %v3489_v45 = vmax.f32 %v3487_v50, %v3488_v5  ;;  %v3312_v16 = vmax.f32 %v3248_v13, 0.0  ;;  %v3251_v40 = vadd.f32 %v3157_v6, %v7301_v57  ;;  %v7013_v29 = vpop.f32.mrb[188].mxu1 }
 0x33e   :  { %v3627_v60 = vrot.slane %v3626_v37, 2  ;;  %v3122_v4 = vrot.slane %v6916_v1, 1  ;;  %v3127_v15 = vrot.slane %v6930_v53, 1  ;;  %v3125_v30 = vrot.slane %v6935_v3, 1  ;;  %v7018_v54 = vpop.f32.mrb[189].mxu1 }
 0x33f   :  { %v3702_v32 = vpack.c.bf16 %v3486_v18, %v3486_v18  ;;  %v3490_v8 = vrot.slane %v3489_v45, 4  ;;  %v3376_v19 = vmul.f32 %v5793_v39, %v3312_v16  ;;  %v3315_v46 = vmax.f32 %v3251_v40, 0.0  ;;  %v7021_v59 = vpop.f32.mrb[190].mxu1  ;;  %v7303_v18 = vld [vmem:[#allocation12_spill] sm:$0xff] }
 0x340   :  { %v3628_v12 = vmax.f32 %v3626_v37, %v3627_v60  ;;  %v3158_v23 = vsel %vm1576_vm2, %v3122_v4, %v3123_v43  ;;  %v3159_v1 = vsel %vm1576_vm2, %v3121_v49, %v3122_v4  ;;  %v3156_v53 = vsel %vm1576_vm2, %v3124_v35, %v3125_v30  ;;  %v7029_v3 = vpop.f32.mrb[191].mxu1  ;;  %v7302_v37 = vld [vmem:[#allocation11_spill] sm:$0xff]  ;;  %v7304_v35 = vld [vmem:[#allocation13_spill] sm:$0xff] }
 0x341   :  { %v3860_v31 = vunpack.c.l.b16 %v3702_v32  ;;  %v3491_v33 = vmax.f32 %v3489_v45, %v3490_v8  ;;  %v3632_v38 = vsel %vm322_vm0, %v3376_v19, -inf  ;;  %v3379_v13 = vmul.f32 %v5783_v34, %v3315_v46 }
 0x342   :  { %v3629_v6 = vrot.slane %v3628_v12, 1  ;;  %v3633_v50 = vmax.f32 %v3631_v24, %v3632_v38  ;;  %v3249_v5 = vadd.f32 %v3159_v1, %v7302_v37  ;;  %v3250_v43 = vadd.f32 %v3158_v23, %v7303_v18  ;;  %v7305_v18 = vld [vmem:[#allocation19_spill] sm:$0xff] }
 0x343   :  { %v3874_v16 = vsel %vm3757_vm7, %v3860_v31, %v3859_v36  ;;  %v3492_v49 = vrot.slane %v3491_v33, 2  ;;  %v3640_v57 = vsel %vm322_vm0, %v3379_v13, -inf  ;;  %v3252_v40 = vadd.f32 %v3156_v53, %v7304_v35 }
 0x344   :  { %v3630_v60 = vmax.f32 %v3628_v12, %v3629_v6  ;;  %v3634_v4 = vrot.slane %v3633_v50, 4  ;;  %v3313_v45 = vmax.f32 %v3249_v5, 0.0  ;;  %v3314_v32 = vmax.f32 %v3250_v43, 0.0 }
 0x345   :  { %v3493_v8 = vmax.f32 %v3491_v33, %v3492_v49  ;;  %v3316_v19 = vmax.f32 %v3252_v40, 0.0  ;;  %v3128_v46 = vrot.slane %v6937_v21, 1  ;;  %v3126_v24 = vrot.slane %v6947_v52, 1 }
 0x346   :  { %v3718_v1 = vpack.c.bf16 %v3630_v60, %v3630_v60  ;;  %v3635_v38 = vmax.f32 %v3633_v50, %v3634_v4  ;;  %v3377_v23 = vmul.f32 %v5775_v17, %v3313_v45  ;;  %v3378_v36 = vmul.f32 %v5778_v47, %v3314_v32  ;;  %v7306_v32 = vld [vmem:[#allocation15_spill] sm:$0xff] }
 0x347   :  { %v3494_v31 = vrot.slane %v3493_v8, 1  ;;  %v3380_v13 = vmul.f32 %v5793_v39, %v3316_v19  ;;  %v3153_v12 = vsel %vm1576_vm2, %v3127_v15, %v3128_v46  ;;  %v3154_v53 = vsel %vm1576_vm2, %v3126_v24, %v3127_v15 }
 0x348   :  { %v3750_v33 = vunpack.c.l.b16 %v3718_v1  ;;  %v3636_v6 = vrot.slane %v3635_v38, 2  ;;  %v3496_v21 = vsel %vm322_vm0, %v3377_v23, -inf  ;;  %v3497_v52 = vsel %vm322_vm0, %v3378_v36, -inf }
 0x349   :  { %v3495_v50 = vmax.f32 %v3493_v8, %v3494_v31  ;;  %v3498_v37 = vmax.f32 %v3496_v21, %v3497_v52  ;;  %v3641_v5 = vsel %vm322_vm0, %v3380_v13, -inf  ;;  %v3255_v43 = vadd.f32 %v3153_v12, %v7305_v18  ;;  %v7307_v8 = vld [vmem:[#allocation16_spill] sm:$0xff] }
 0x34a   :  { %v3771_v49 = vsel %vm3757_vm7, %v3750_v33, %v3749_v7  ;;  %v3637_v35 = vmax.f32 %v3635_v38, %v3636_v6  ;;  %v3642_v40 = vmax.f32 %v3640_v57, %v3641_v5  ;;  %v3155_v60 = vsel %vm1576_vm2, %v3125_v30, %v3126_v24 }
 0x34b   :  { %v3703_v15 = vpack.c.bf16 %v3495_v50, %v3495_v50  ;;  %v3499_v4 = vrot.slane %v3498_v37, 4  ;;  %v3319_v45 = vmax.f32 %v3255_v43, 0.0  ;;  %v3253_v19 = vadd.f32 %v3155_v60, %v7306_v32 }
 0x34c   :  { %v3638_v1 = vrot.slane %v3637_v35, 1  ;;  %v3643_v23 = vrot.slane %v3642_v40, 4  ;;  %v3254_v36 = vadd.f32 %v3154_v53, %v7307_v8  ;;  %v3131_v31 = vrot.slane %v6956_v62, 1  ;;  %v7309_v8 = vld [vmem:[#allocation23_spill] sm:$0xff] }
 0x34d   :  { %v3861_v13 = vunpack.c.l.b16 %v3703_v15  ;;  %v3500_v12 = vmax.f32 %v3498_v37, %v3499_v4  ;;  %v3383_v7 = vmul.f32 %v5783_v34, %v3319_v45  ;;  %v3317_v38 = vmax.f32 %v3253_v19, 0.0 }
 0x34e   :  { %v3639_v57 = vmax.f32 %v3637_v35, %v3638_v1  ;;  %v3644_v33 = vmax.f32 %v3642_v40, %v3643_v23  ;;  %v3318_v6 = vmax.f32 %v3254_v36, 0.0  ;;  %v3129_v30 = vrot.slane %v6961_v25, 1  ;;  %v7308_v35 = vld [vmem:[#allocation17_spill] sm:$0xff] }
 0x34f   :  { %v3875_v24 = vsel %vm3759_vm8, %v3861_v13, %v3874_v16  ;;  %v3501_v21 = vrot.slane %v3500_v12, 2  ;;  %v3649_v52 = vsel %vm322_vm0, %v3383_v7, -inf  ;;  %v3381_v50 = vmul.f32 %v5775_v17, %v3317_v38 }
 0x350   :  { %v3719_v53 = vpack.c.bf16 %v3639_v57, %v3639_v57  ;;  %v3645_v5 = vrot.slane %v3644_v33, 2  ;;  %v3382_v62 = vmul.f32 %v5778_v47, %v3318_v6  ;;  %v3152_v37 = vsel %vm1576_vm2, %v3128_v46, %v3129_v30 }
 0x351   :  { %v3502_v18 = vmax.f32 %v3500_v12, %v3501_v21  ;;  %v3505_v43 = vsel %vm322_vm0, %v3381_v50, -inf  ;;  %v3256_v40 = vadd.f32 %v3152_v37, %v7308_v35  ;;  %v3132_v25 = vrot.slane %v6967_v51, 1  ;;  %v7311_v21 = vld [vmem:[#allocation21_spill] sm:$0xff] }
 0x352   :  { %v3751_v16 = vunpack.c.l.b16 %v3719_v53  ;;  %v3646_v60 = vmax.f32 %v3644_v33, %v3645_v5  ;;  %v3506_v15 = vsel %vm322_vm0, %v3382_v62, -inf  ;;  %v3130_v4 = vrot.slane %v6972_v56, 1  ;;  %v7310_v33 = vld [vmem:[#allocation20_spill] sm:$0xff] }
 0x353   :  { %v3503_v45 = vrot.slane %v3502_v18, 1  ;;  %v3507_v32 = vmax.f32 %v3505_v43, %v3506_v15  ;;  %v3320_v19 = vmax.f32 %v3256_v40, 0.0  ;;  %v3149_v1 = vsel %vm1576_vm2, %v3131_v31, %v3132_v25 }
 0x354   :  { %v3772_v46 = vsel %vm3759_vm8, %v3751_v16, %v3771_v49  ;;  %v3647_v23 = vrot.slane %v3646_v60, 1  ;;  %v3259_v36 = vadd.f32 %v3149_v1, %v7309_v8  ;;  %v3150_v51 = vsel %vm1576_vm2, %v3130_v4, %v3131_v31 }
 0x355   :  { %v3504_v13 = vmax.f32 %v3502_v18, %v3503_v45  ;;  %v3508_v12 = vrot.slane %v3507_v32, 4  ;;  %v3384_v7 = vmul.f32 %v5793_v39, %v3320_v19  ;;  %v3151_v56 = vsel %vm1576_vm2, %v3129_v30, %v3130_v4 }
 0x356   :  { %v3648_v38 = vmax.f32 %v3646_v60, %v3647_v23  ;;  %v3323_v57 = vmax.f32 %v3259_v36, 0.0  ;;  %v3257_v6 = vadd.f32 %v3151_v56, %v7310_v33  ;;  %v3258_v50 = vadd.f32 %v3150_v51, %v7311_v21 }
 0x357   :  { %v3704_v49 = vpack.c.bf16 %v3504_v13, %v3504_v13  ;;  %v3509_v53 = vmax.f32 %v3507_v32, %v3508_v12  ;;  %v3650_v5 = vsel %vm322_vm0, %v3384_v7, -inf  ;;  %v3135_v62 = vrot.slane %v6988_v42, 1 }
 0x358   :  { %v3720_v31 = vpack.c.bf16 %v3648_v38, %v3648_v38  ;;  %v3651_v37 = vmax.f32 %v3649_v52, %v3650_v5  ;;  %v3387_v18 = vmul.f32 %v5783_v34, %v3323_v57  ;;  %v3321_v43 = vmax.f32 %v3257_v6, 0.0 }
 0x359   :  { %v3862_v35 = vunpack.c.l.b16 %v3704_v49  ;;  %v3510_v40 = vrot.slane %v3509_v53, 2  ;;  %v3322_v30 = vmax.f32 %v3258_v50, 0.0  ;;  %v3133_v16 = vrot.slane %v6993_v44, 1  ;;  %v7312_v44 = vld [vmem:[#allocation22_spill] sm:$0xff] }
 0x35a   :  { %v3752_v60 = vunpack.c.l.b16 %v3720_v31  ;;  %v3652_v15 = vrot.slane %v3651_v37, 4  ;;  %v3658_v4 = vsel %vm322_vm0, %v3387_v18, -inf  ;;  %v3385_v45 = vmul.f32 %v5775_v17, %v3321_v43 }
 0x35b   :  { %v3876_v32 = vsel %vm3761_vm9, %v3862_v35, %v3875_v24  ;;  %v3511_v19 = vmax.f32 %v3509_v53, %v3510_v40  ;;  %v3386_v42 = vmul.f32 %v5778_v47, %v3322_v30  ;;  %v3148_v52 = vsel %vm1576_vm2, %v3132_v25, %v3133_v16  ;;  %v7313_v53 = vld [vmem:[#allocation24_spill] sm:$0xff] }
 0x35c   :  { %v3773_v1 = vsel %vm3761_vm9, %v3752_v60, %v3772_v46  ;;  %v3653_v23 = vmax.f32 %v3651_v37, %v3652_v15  ;;  %v3514_v8 = vsel %vm322_vm0, %v3385_v45, -inf  ;;  %v3260_v36 = vadd.f32 %v3148_v52, %v7312_v44 }
 0x35d   :  { %v3512_v51 = vrot.slane %v3511_v19, 1  ;;  %v3515_v13 = vsel %vm322_vm0, %v3386_v42, -inf  ;;  %v3136_v12 = vrot.slane %v6996_v22, 1  ;;  %v3134_v24 = vrot.slane %v6998_v14, 1 }
 0x35e   :  { %v3654_v7 = vrot.slane %v3653_v23, 2  ;;  %v3516_v56 = vmax.f32 %v3514_v8, %v3515_v13  ;;  %v3324_v38 = vmax.f32 %v3260_v36, 0.0  ;;  %v3139_v57 = vrot.slane %v7013_v29, 1  ;;  %v7314_v8 = vld [vmem:[#allocation25_spill] sm:$0xff] }
 0x35f   :  { %v3513_v25 = vmax.f32 %v3511_v19, %v3512_v51  ;;  %v3145_v46 = vsel %vm1576_vm2, %v3135_v62, %v3136_v12  ;;  %v3146_v33 = vsel %vm1576_vm2, %v3134_v24, %v3135_v62  ;;  %v3147_v6 = vsel %vm1576_vm2, %v3133_v16, %v3134_v24 }
 0x360   :  { %v3655_v21 = vmax.f32 %v3653_v23, %v3654_v7  ;;  %v3517_v50 = vrot.slane %v3516_v56, 4  ;;  %v3388_v22 = vmul.f32 %v5793_v39, %v3324_v38  ;;  %v3263_v14 = vadd.f32 %v3145_v46, %v6609_v2 }
 0x361   :  { %v3705_v49 = vpack.c.bf16 %v3513_v25, %v3513_v25  ;;  %v3261_v5 = vadd.f32 %v3147_v6, %v7313_v53  ;;  %v3262_v29 = vadd.f32 %v3146_v33, %v6607_v0  ;;  %v3137_v31 = vrot.slane %v7018_v54, 1 }
 0x362   :  { %v3656_v37 = vrot.slane %v3655_v21, 1  ;;  %v3518_v18 = vmax.f32 %v3516_v56, %v3517_v50  ;;  %v3659_v62 = vsel %vm322_vm0, %v3388_v22, -inf  ;;  %v3327_v43 = vmax.f32 %v3263_v14, 0.0 }
 0x363   :  { %v3863_v35 = vunpack.c.l.b16 %v3705_v49  ;;  %v3660_v40 = vmax.f32 %v3658_v4, %v3659_v62  ;;  %v3325_v30 = vmax.f32 %v3261_v5, 0.0  ;;  %v3326_v16 = vmax.f32 %v3262_v29, 0.0  ;;  %v7315_v49 = vld [vmem:[#allocation27_spill] sm:$0xff] }
 0x364   :  { %v3657_v60 = vmax.f32 %v3655_v21, %v3656_v37  ;;  %v3519_v15 = vrot.slane %v3518_v18, 2  ;;  %v3391_v2 = vmul.f32 %v5783_v34, %v3327_v43  ;;  %v3144_v45 = vsel %vm1576_vm2, %v3136_v12, %v3137_v31 }
 0x365   :  { %v7114_v0 = vsel %vm3763_vm10, %v3863_v35, %v3876_v32  ;;  %v3661_v54 = vrot.slane %v3660_v40, 4  ;;  %v3389_v19 = vmul.f32 %v5775_v17, %v3325_v30  ;;  %v3390_v42 = vmul.f32 %v5778_v47, %v3326_v16  ;;  %v7317_v30 = vld [vmem:[#allocation28_spill] sm:$0xff] }
 0x366   :  { %v3721_v52 = vpack.c.bf16 %v3657_v60, %v3657_v60  ;;  %v3520_v23 = vmax.f32 %v3518_v18, %v3519_v15  ;;  %v3667_v4 = vsel %vm322_vm0, %v3391_v2, -inf  ;;  %v3264_v44 = vadd.f32 %v3144_v45, %v7314_v8 }
 0x367   :  { %v3662_v36 = vmax.f32 %v3660_v40, %v3661_v54  ;;  %v3523_v51 = vsel %vm322_vm0, %v3389_v19, -inf  ;;  %v3524_v13 = vsel %vm322_vm0, %v3390_v42, -inf  ;;  %v3140_v12 = vrot.slane %v7021_v59, 1  ;;  %v7316_v40 = vld [vmem:[#allocation26_spill] sm:$0xff] }
 0x368   :  { %v3753_v32 = vunpack.c.l.b16 %v3721_v52  ;;  %v3521_v24 = vrot.slane %v3520_v23, 1  ;;  %v3525_v7 = vmax.f32 %v3523_v51, %v3524_v13  ;;  %v3328_v56 = vmax.f32 %v3264_v44, 0.0 }
 0x369   :  { %v3663_v38 = vrot.slane %v3662_v36, 2  ;;  %v3141_v25 = vsel %vm1576_vm2, %v3139_v57, %v3140_v12  ;;  %v3204_v46 = vsel %vm1576_vm2, %v3140_v12, %v3077_v63  ;;  %v3138_v33 = vrot.slane %v7029_v3, 1 }
 0x36a   :  { %v3774_v6 = vsel %vm3763_vm10, %v3753_v32, %v3773_v1  ;;  %v3522_v21 = vmax.f32 %v3520_v23, %v3521_v24  ;;  %v3526_v50 = vrot.slane %v3525_v7, 4  ;;  %v3392_v59 = vmul.f32 %v5793_v39, %v3328_v56 }
 0x36b   :  { %v3664_v22 = vmax.f32 %v3662_v36, %v3663_v38  ;;  %v3267_v14 = vadd.f32 %v3141_v25, %v6635_v27  ;;  %v3268_v53 = vadd.f32 %v3204_v46, %v7315_v49  ;;  %v3142_v55 = vsel %vm1576_vm2, %v3138_v33, %v3139_v57 }
 0x36c   :  { %v3706_v5 = vpack.c.bf16 %v3522_v21, %v3522_v21  ;;  %v3527_v29 = vmax.f32 %v3525_v7, %v3526_v50  ;;  %v3668_v63 = vsel %vm322_vm0, %v3392_v59, -inf  ;;  %v3143_v3 = vsel %vm1576_vm2, %v3137_v31, %v3138_v33 }
 0x36d   :  { %v3665_v1 = vrot.slane %v3664_v22, 1  ;;  %v3669_v37 = vmax.f32 %v3667_v4, %v3668_v63  ;;  %v3331_v18 = vmax.f32 %v3267_v14, 0.0  ;;  %v3332_v62 = vmax.f32 %v3268_v53, 0.0 }
 0x36e   :  { %v3864_v43 = vunpack.c.l.b16 %v3706_v5  ;;  %v3528_v35 = vrot.slane %v3527_v29, 2  ;;  %v3265_v27 = vadd.f32 %v3143_v3, %v7316_v40  ;;  %v3266_v16 = vadd.f32 %v3142_v55, %v7317_v30  ;;  %v4988_v40 = vld [vmem:[%s7204_s7 + $0x8] sm:$0xff]  }
 0x36f   :  { %v3666_v60 = vmax.f32 %v3664_v22, %v3665_v1  ;;  %v3670_v15 = vrot.slane %v3669_v37, 4  ;;  %v3395_v57 = vmul.f32 %v5783_v34, %v3331_v18  ;;  %v3396_v2 = vmul.f32 %v5793_v39, %v3332_v62 }
 0x370   :  { %v3529_v45 = vmax.f32 %v3527_v29, %v3528_v35  ;;  %v3329_v54 = vmax.f32 %v3265_v27, 0.0  ;;  %v3330_v41 = vmax.f32 %v3266_v16, 0.0  ;;  %v3766_v36 = vsel %vm3765_vm11, %v6895_v9, %v6865_v48  ;;  %v4987_v35 = vld [vmem:[%s7204_s7] sm:$0xff]  }
 0x371   :  { %v3722_v31 = vpack.c.bf16 %v3666_v60, %v3666_v60  ;;  %v3671_v19 = vmax.f32 %v3669_v37, %v3670_v15  ;;  %v3676_v42 = vsel %vm322_vm0, %v3395_v57, -inf  ;;  %v3677_v52 = vsel %vm322_vm0, %v3396_v2, -inf  ;;  %v4287_v15 = vld [vmem:[%s7205_s6] ss:$0 sm:$0xff] }
 0x372   :  { %v3530_v23 = vrot.slane %v3529_v45, 1  ;;  %v3678_v34 = vmax.f32 %v3676_v42, %v3677_v52  ;;  %v3393_v39 = vmul.f32 %v5775_v17, %v3329_v54  ;;  %v3394_v4 = vmul.f32 %v5778_v47, %v3330_v41 }
 0x373   :  { %v3754_v8 = vunpack.c.l.b16 %v3722_v31  ;;  %v3672_v44 = vrot.slane %v3671_v19, 2  ;;  %v3768_v17 = vsel %vm3767_vm13, %v6939_v11, %v3766_v36  ;;  %v3871_v46 = vsel %vm3765_vm11, %v6877_v26, %v6838_v61 }
 0x374   :  { %v3531_v51 = vmax.f32 %v3529_v45, %v3530_v23  ;;  %v3679_v13 = vrot.slane %v3678_v34, 4  ;;  %v3532_v12 = vsel %vm322_vm0, %v3393_v39, -inf  ;;  %v3533_v32 = vsel %vm322_vm0, %v3394_v4, -inf }
 0x375   :  { %v3673_v24 = vmax.f32 %v3671_v19, %v3672_v44  ;;  %v3534_v7 = vmax.f32 %v3532_v12, %v3533_v32  ;;  %v3770_v38 = vsel %vm3769_vm14, %v6978_v20, %v3768_v17  ;;  %v3775_v48 = vsel %vm3765_vm11, %v3754_v8, %v3774_v6 }
 0x376   :  { %v3707_v47 = vpack.c.bf16 %v3531_v51, %v3531_v51  ;;  %v3680_v56 = vmax.f32 %v3678_v34, %v3679_v13  ;;  %v3878_v33 = vsel %vm3765_vm11, %v3864_v43, %v7114_v0  ;;  %v3872_v11 = vsel %vm3767_vm13, %v6921_v10, %v3871_v46  ;;  %v4288_v34 = vld [vmem:[%s7206_s8] ss:$0 sm:$0xff] }
 0x377   :  { %v3674_v9 = vrot.slane %v3673_v24, 1  ;;  %v3535_v25 = vrot.slane %v3534_v7, 4  ;;  %v3873_v20 = vsel %vm3769_vm14, %v6963_v28, %v3872_v11 }
 0x378   :  { %v3865_v21 = vunpack.c.l.b16 %v3707_v47  ;;  %v3681_v50 = vrot.slane %v3680_v56, 2 }
 0x379   :  { %v3675_v59 = vmax.f32 %v3673_v24, %v3674_v9  ;;  %v3536_v22 = vmax.f32 %v3534_v7, %v3535_v25 }
 0x37a   :  { %v3682_v6 = vmax.f32 %v3680_v56, %v3681_v50  ;;  %v3879_v14 = vsel %vm3767_vm13, %v3865_v21, %v3878_v33 }
 0x37b   :  { %v3723_v49 = vpack.c.bf16 %v3675_v59, %v3675_v59  ;;  %v3537_v53 = vrot.slane %v3536_v22, 2 }
 0x37c   :  { %v3683_v55 = vrot.slane %v3682_v6, 1 }
 0x37d   :  { %v3755_v61 = vunpack.c.l.b16 %v3723_v49  ;;  %v3538_v26 = vmax.f32 %v3536_v22, %v3537_v53 }
 0x37e   :  { %v3684_v5 = vmax.f32 %v3682_v6, %v3683_v55 }
 0x37f   :  { %v3539_v0 = vrot.slane %v3538_v26, 1  ;;  %v3776_v29 = vsel %vm3767_vm13, %v3755_v61, %v3775_v48 }
 0x380   :  { %v3724_v63 = vpack.c.bf16 %v3684_v5, %v3684_v5 }
 0x381   :  { %v3540_v3 = vmax.f32 %v3538_v26, %v3539_v0 }
 0x382   :  { %v3756_v10 = vunpack.c.l.b16 %v3724_v63 }
 0x383   :  { %v3708_v1 = vpack.c.bf16 %v3540_v3, %v3540_v3 }
 0x384   :  { %v3777_v37 = vsel %vm3769_vm14, %v3756_v10, %v3776_v29 }
 0x385   :  { %v3866_v18 = vunpack.c.l.b16 %v3708_v1  ;;  %v3778_v28 = vpack.c.b16 %v3777_v37, %v3770_v38 }
 0x387   :  { %4918 = vmatmul.mubr.msk.bf16.vlgmr.msra.gmra.mrb[192].mxu0 %vm322_vm0, %v3778_v28  ;;  %v3880_v62 = vsel %vm3769_vm14, %v3866_v18, %v3879_v14 }
 0x388   :  { %v3881_v43 = vpack.c.b16 %v3880_v62, %v3873_v20  ;;  %4933 = vmatprep.mubr.msk.bf16.mxu0 %vm4990_vm12, %v7237_v58  ;;  %4930 = vmatpush3.bf16.msra.mxu0 %v4987_v35 }
 0x389   :  { %4931 = vmatprep.subr.bf16.mxu0 %v7237_v58 }
 0x38a   :  { %4926 = vmatmul.mubr.msk.bf16.vlgmr.msra.gmra.mrb[192].mxu1 %vm322_vm0, %v3881_v43 }
 0x38c   :  { %4932 = vmatpush3.bf16.msra.mxu0 %v4988_v40 }
 0x45a   :  { %v3828_v27 = vpop.f32.mrb[192].mxu0 }
 0x45b   :  { %v4919_v30 = vpop.f32.mrb[193].mxu0 }
 0x45c   :  { %v3831_v16 = vpop.f32.mrb[194].mxu0 }
 0x45d   :  { %v3931_v60 = vpop.f32.mrb[192].mxu1  ;;  %v4920_v57 = vpop.f32.mrb[195].mxu0 }
 0x45e   :  { %v3932_v2 = vadd.f32 %v3931_v60, %v3828_v27  ;;  %v4927_v45 = vpop.f32.mrb[193].mxu1 }
 0x45f   :  { %v3934_v54 = vpop.f32.mrb[194].mxu1 }
 0x460   :  { %v3945_v41 = vadd.f32 %v4287_v15, %v3932_v2  ;;  %v3935_v31 = vadd.f32 %v3934_v54, %v3831_v16  ;;  %v4928_v19 = vpop.f32.mrb[195].mxu1 }
 0x462   :  { %v3946_v42 = vadd.f32 %v4287_v15, %v3935_v31  ;;  %v3947_v52 = vmax.f32 %v3945_v41, 0.0 }
 0x464   :  { %v3948_v23 = vmax.f32 %v3946_v42, 0.0 }
 0x466   :  { %v3949_v58 = vpack.c.bf16 %v3948_v23, %v3947_v52 }
 0x468   :  { %4934 = vmatmul.mubr.msk.bf16.vlgmr.msra.gmra.mrb[196].mxu0 %vm322_vm0, %v3949_v58 }
 0x53b   :  { %v4010_v39 = vpop.f32.mrb[196].mxu0 }
 0x53c   :  { %v4011_v4 = vadd.f32 %v4288_v34, %v4010_v39  ;;  %v4935_v8 = vpop.f32.mrb[197].mxu0 }
 0x53d   :  { %v4013_v44 = vpop.f32.mrb[198].mxu0 }
 0x53e   :  { %4017 = vst [vmem:[%s7207_s9] sm:$0xff] %v4011_v4  ;;  %v4014_v36 = vadd.f32 %v4288_v34, %v4013_v44  ;;  %v4936_v51 = vpop.f32.mrb[199].mxu0 }
 0x540   :  { %4018 = vst [vmem:[%s7207_s9 + $0x8] sm:$0xff] %v4014_v36 }

</bundles_post_ra>
